<compile_context>
chip_gen: v6e
topology: v6e:2x2x1
jax: 0.10.0
libtpu: 0.0.40
codegen_flags: <defaults>
</compile_context>

<pallas_src>
import functools
import math

import jax
import jax.numpy as jnp
from jax.experimental import pallas as pl
from jax.experimental.pallas import tpu as pltpu


def _round_up(x, m):
    return ((x + m - 1) // m) * m


def _nbytes(shape, dtype):
    return math.prod(shape) * jnp.dtype(dtype).itemsize


def _vmem_limit(blocks):
    """Scoped-VMEM limit derived from the actual block footprint.

    Assumes every block is double-buffered (worst case) plus a compiler
    scratch margin; floors at 8 MiB so tiny kernels never under-provision,
    caps below physical VMEM on all generations.
    """
    need = sum(2 * _nbytes(s, d) for s, d in blocks) + (4 << 20)
    return int(min(max(need, 8 << 20), 100 << 20))


def _pick_tm(M, K, itemsize, *, target_bytes=2 << 20, tm_cap=2048):
    """Row tile adaptive to channel width: for narrow K (SegFormer C=32..64)
    push toward ~1-2 MiB input tiles so per-grid-step overhead amortizes."""
    tm = target_bytes // max(K * itemsize, 1)
    tm = max(256, min(tm_cap, tm))
    tm = _round_up(min(tm, _round_up(M, 8)), 8)
    return tm


# ----------------------------- Pallas kernels -----------------------------

def _linear_kernel(x_ref, w_ref, b_ref, o_ref, *, matmul_dtype):
    # x_ref: (TM, K); w_ref: (K, Nout) already in matmul_dtype; b_ref: (1, Nout) f32
    x = x_ref[...].astype(matmul_dtype)
    acc = jnp.dot(x, w_ref[...], preferred_element_type=jnp.float32)
    o_ref[...] = (acc + b_ref[...]).astype(o_ref.dtype)


def _linear_ln_kernel(x_ref, w_ref, b_ref, g_ref, beta_ref, o_ref, *,
                      matmul_dtype, eps):
    # fused (x @ w + b) followed by LayerNorm over the last dim (full C tile).
    x = x_ref[...].astype(matmul_dtype)
    y = jnp.dot(x, w_ref[...], preferred_element_type=jnp.float32) + b_ref[...]
    mu = jnp.mean(y, axis=-1, keepdims=True)
    yc = y - mu
    var = jnp.mean(yc * yc, axis=-1, keepdims=True)
    inv = jax.lax.rsqrt(var + eps)
    o_ref[...] = (yc * inv * g_ref[...] + beta_ref[...]).astype(o_ref.dtype)


def _attn_kernel(x_ref, qw_ref, qb_ref, kv_ref, o_ref, *, num_heads,
                 matmul_dtype, approx_recip):
    # x_ref : (TQ, C) tokens
    # qw_ref: (C, C) query weight, PRE-SCALED by head_dim**-0.5, matmul_dtype
    # qb_ref: (1, C) pre-scaled query bias, f32
    # kv_ref: (M, 2C) packed [K | V], matmul_dtype (resident across q-tiles)
    # o_ref : (TQ, C)
    C = x_ref.shape[-1]
    d = C // num_heads

    # fused query projection (softmax scale already folded into qw/qb)
    q = jnp.dot(x_ref[...].astype(matmul_dtype), qw_ref[...],
                preferred_element_type=jnp.float32) + qb_ref[...]
    kv = kv_ref[...]

    outs = []
    for h in range(num_heads):
        lo, hi = h * d, (h + 1) * d
        qh = q[:, lo:hi].astype(matmul_dtype)
        kh = kv[:, lo:hi]
        vh = kv[:, C + lo:C + hi]
        # contract last dim of q with last dim of k (no k.T materialization)
        s = jax.lax.dot_general(qh, kh, (((1,), (1,)), ((), ())),
                                preferred_element_type=jnp.float32)
        m = jnp.max(s, axis=-1, keepdims=True)
        # softmax math kept in f32 (v5e has no bf16 EUP/VPU)
        p = jnp.exp(s - m)
        l = jnp.sum(p, axis=-1, keepdims=True)
        o = jnp.dot(p.astype(matmul_dtype), vh,
                    preferred_element_type=jnp.float32)
        if approx_recip:
            o = o * pl.reciprocal(l, approx=True)
        else:
            o = o / l
        outs.append(o)
    # single lane-dense, full-C-width store (no per-head masked partial stores)
    o_ref[...] = jnp.concatenate(outs, axis=-1).astype(o_ref.dtype)


# ----------------------------- Pallas wrappers -----------------------------

def linear_pallas(x2d, w, b, *, matmul_dtype=jnp.float32, out_dtype=None):
    """y = x2d @ w + b.  Output dtype defaults to matmul_dtype (bf16 I/O in
    fast mode halves inter-kernel HBM traffic)."""
    M, K = x2d.shape
    Nout = w.shape[1]
    out_dtype = out_dtype if out_dtype is not None else matmul_dtype
    tm = _pick_tm(M, K, x2d.dtype.itemsize)
    Mp = _round_up(M, tm)
    xp = jnp.pad(x2d, ((0, Mp - M), (0, 0))) if Mp != M else x2d
    wp = w.astype(matmul_dtype)                 # one-time cast outside kernel
    b2 = b.reshape(1, Nout).astype(jnp.float32)
    limit = _vmem_limit([((tm, K), x2d.dtype), ((K, Nout), matmul_dtype),
                         ((1, Nout), jnp.float32), ((tm, Nout), out_dtype)])
    out = pl.pallas_call(
        functools.partial(_linear_kernel, matmul_dtype=matmul_dtype),
        out_shape=jax.ShapeDtypeStruct((Mp, Nout), out_dtype),
        grid=(Mp // tm,),
        in_specs=[
            pl.BlockSpec((tm, K), lambda i: (i, 0)),
            # weight/bias blocks are constant across the grid (stay resident)
            pl.BlockSpec((K, Nout), lambda i: (0, 0)),
            pl.BlockSpec((1, Nout), lambda i: (0, 0)),
        ],
        out_specs=pl.BlockSpec((tm, Nout), lambda i: (i, 0)),
        compiler_params=pltpu.CompilerParams(
            dimension_semantics=("parallel",),
            vmem_limit_bytes=limit),
    )(xp, wp, b2)
    return out[:M] if Mp != M else out


def linear_ln_pallas(x2d, w, b, gamma, beta, *, eps=1e-6,
                     matmul_dtype=jnp.float32, out_dtype=None):
    """LayerNorm(x2d @ w + b) fused in one kernel."""
    M, K = x2d.shape
    Nout = w.shape[1]
    out_dtype = out_dtype if out_dtype is not None else matmul_dtype
    tm = _pick_tm(M, K, x2d.dtype.itemsize)
    Mp = _round_up(M, tm)
    xp = jnp.pad(x2d, ((0, Mp - M), (0, 0))) if Mp != M else x2d
    wp = w.astype(matmul_dtype)
    b2 = b.reshape(1, Nout).astype(jnp.float32)
    g2 = gamma.reshape(1, Nout).astype(jnp.float32)
    bb2 = beta.reshape(1, Nout).astype(jnp.float32)
    limit = _vmem_limit([((tm, K), x2d.dtype), ((K, Nout), matmul_dtype),
                         ((1, Nout), jnp.float32), ((1, Nout), jnp.float32),
                         ((1, Nout), jnp.float32), ((tm, Nout), out_dtype)])
    out = pl.pallas_call(
        functools.partial(_linear_ln_kernel, matmul_dtype=matmul_dtype, eps=eps),
        out_shape=jax.ShapeDtypeStruct((Mp, Nout), out_dtype),
        grid=(Mp // tm,),
        in_specs=[
            pl.BlockSpec((tm, K), lambda i: (i, 0)),
            pl.BlockSpec((K, Nout), lambda i: (0, 0)),
            pl.BlockSpec((1, Nout), lambda i: (0, 0)),
            pl.BlockSpec((1, Nout), lambda i: (0, 0)),
            pl.BlockSpec((1, Nout), lambda i: (0, 0)),
        ],
        out_specs=pl.BlockSpec((tm, Nout), lambda i: (i, 0)),
        compiler_params=pltpu.CompilerParams(
            dimension_semantics=("parallel",),
            vmem_limit_bytes=limit),
    )(xp, wp, b2, g2, bb2)
    return out[:M] if Mp != M else out


def attention_pallas(x, qw, qb, kv, *, num_heads, matmul_dtype=jnp.float32,
                     approx_recip=True, tq_max=512, out_dtype=None):
    """Attention with the (pre-scaled) q projection fused in.
    x: (B, N, C) tokens; qw: (C, C); qb: (C,); kv: (B, M, 2C) packed [K | V]."""
    B, N, C = x.shape
    M = kv.shape[1]
    out_dtype = out_dtype if out_dtype is not None else x.dtype
    tq = min(tq_max, _round_up(N, 8))
    Np = _round_up(N, tq)
    xp = jnp.pad(x, ((0, 0), (0, Np - N), (0, 0))) if Np != N else x
    qwp = qw.astype(matmul_dtype)
    qb2 = qb.reshape(1, C).astype(jnp.float32)
    limit = _vmem_limit([((tq, C), x.dtype), ((C, C), matmul_dtype),
                         ((1, C), jnp.float32), ((M, 2 * C), kv.dtype),
                         ((tq, C), out_dtype)])
    out = pl.pallas_call(
        functools.partial(_attn_kernel, num_heads=num_heads,
                          matmul_dtype=matmul_dtype, approx_recip=approx_recip),
        out_shape=jax.ShapeDtypeStruct((B, Np, C), out_dtype),
        grid=(B, Np // tq),
        in_specs=[
            pl.BlockSpec((pl.Squeezed(), tq, C), lambda b, i: (b, i, 0)),
            # q weight/bias and packed KV are constant across the q-tile axis
            # (stay VMEM-resident).  TODO(synk): pl.Buffered(1) would drop the
            # redundant second buffer on these, saving VMEM on v7x.
            pl.BlockSpec((C, C), lambda b, i: (0, 0)),
            pl.BlockSpec((1, C), lambda b, i: (0, 0)),
            pl.BlockSpec((pl.Squeezed(), M, 2 * C), lambda b, i: (b, 0, 0)),
        ],
        out_specs=pl.BlockSpec((pl.Squeezed(), tq, C), lambda b, i: (b, i, 0)),
        compiler_params=pltpu.CompilerParams(
            # both axes are independent -> both TCs usable on v7x even at B=1
            dimension_semantics=("parallel", "parallel"),
            vmem_limit_bytes=limit),
    )(xp, qwp, qb2, kv)
    return out[:, :N] if Np != N else out


# ----------------------------- module wrapper -----------------------------

def init_params(key, dim, sr_ratio):
    ks = jax.random.split(key, 8)
    s = 1.0 / math.sqrt(dim)
    p = {
        # nn.Linear weights stored as (out, in) like PyTorch
        "q_w": jax.random.uniform(ks[0], (dim, dim), jnp.float32, -s, s),
        "q_b": jax.random.uniform(ks[1], (dim,), jnp.float32, -s, s),
        "k_w": jax.random.uniform(ks[2], (dim, dim), jnp.float32, -s, s),
        "k_b": jax.random.uniform(ks[3], (dim,), jnp.float32, -s, s),
        "v_w": jax.random.uniform(ks[4], (dim, dim), jnp.float32, -s, s),
        "v_b": jax.random.uniform(ks[5], (dim,), jnp.float32, -s, s),
        # LayerNorm
        "ln_g": jnp.ones((dim,), jnp.float32),
        "ln_b": jnp.zeros((dim,), jnp.float32),
    }
    if sr_ratio > 1:
        cs = 1.0 / math.sqrt(dim * sr_ratio * sr_ratio)
        p["sr_w"] = jax.random.uniform(
            ks[6], (dim, dim, sr_ratio, sr_ratio), jnp.float32, -cs, cs)
        p["sr_b"] = jax.random.uniform(ks[7], (dim,), jnp.float32, -cs, cs)
    return p


def prepare_params(p, num_heads, sr_ratio):
    """One-time weight layout prep: transpose, K/V concat, and the softmax
    scale folded into the query projection (exact, zero per-call cost)."""
    C = p["q_w"].shape[0]
    scale = (C // num_heads) ** (-0.5)
    prep = {
        "q_wt": p["q_w"].T * scale,                                    # (C, C)
        "q_b": p["q_b"] * scale,
        "kv_wt": jnp.concatenate([p["k_w"].T, p["v_w"].T], axis=1),    # (C, 2C)
        "kv_b": jnp.concatenate([p["k_b"], p["v_b"]]),                 # (2C,)
        "ln_g": p["ln_g"],
        "ln_b": p["ln_b"],
    }
    if sr_ratio > 1:
        r = sr_ratio
        prep["sr_wt"] = p["sr_w"].reshape(C, C * r * r).T              # (C*r*r, C)
        prep["sr_b"] = p["sr_b"]
    return prep


def efficient_attention_forward(prep, x, H, W, num_heads, sr_ratio,
                                matmul_dtype=jnp.bfloat16, approx_recip=True):
    B, N, C = x.shape

    # spatial reduction (Conv2d k=s=sr_ratio) with fused LayerNorm
    if sr_ratio > 1:
        r = sr_ratio
        Hr, Wr = H // r, W // r
        xs = x.reshape(B, H, W, C).reshape(B, Hr, r, Wr, r, C)
        xs = xs.transpose(0, 1, 3, 5, 2, 4)             # (B, Hr, Wr, C, r, r)
        patches = xs.reshape(B * Hr * Wr, C * r * r)    # matches (Cin, kh, kw)
        x_kv = linear_ln_pallas(patches, prep["sr_wt"], prep["sr_b"],
                                prep["ln_g"], prep["ln_b"], eps=1e-6,
                                matmul_dtype=matmul_dtype)
        Nr = Hr * Wr
        x_kv = x_kv.reshape(B, Nr, C)
    else:
        Nr = N
        x_kv = x

    # fused K+V projection -> packed (B, Nr, 2C) in matmul_dtype (bf16 in fast
    # mode: half the HBM traffic and half the resident KV VMEM)
    kv = linear_pallas(x_kv.reshape(B * Nr, C), prep["kv_wt"], prep["kv_b"],
                       matmul_dtype=matmul_dtype).reshape(B, Nr, 2 * C)

    # attention with the pre-scaled q projection fused into the kernel;
    # output written directly in (B, N, C), lane-dense full-C stores
    o = attention_pallas(x, prep["q_wt"], prep["q_b"], kv,
                         num_heads=num_heads, matmul_dtype=matmul_dtype,
                         approx_recip=approx_recip, out_dtype=x.dtype)
    return o


# pure-JAX reference (sanity check)
def _reference(params, x, H, W, num_heads, sr_ratio):
    B, N, C = x.shape
    hd = C // num_heads
    scale = hd ** (-0.5)
    q = x @ params["q_w"].T + params["q_b"]
    if sr_ratio > 1:
        r = sr_ratio
        xi = jnp.transpose(x, (0, 2, 1)).reshape(B, C, H, W)
        xo = jax.lax.conv_general_dilated(
            xi, params["sr_w"], window_strides=(r, r), padding="VALID",
            dimension_numbers=("NCHW", "OIHW", "NCHW"))
        xo = xo + params["sr_b"][None, :, None, None]
        xo = xo.reshape(B, C, -1).transpose(0, 2, 1)
        mu = xo.mean(-1, keepdims=True)
        var = ((xo - mu) ** 2).mean(-1, keepdims=True)
        xkv = (xo - mu) * jax.lax.rsqrt(var + 1e-6) * params["ln_g"] + params["ln_b"]
    else:
        xkv = x
    k = xkv @ params["k_w"].T + params["k_b"]
    v = xkv @ params["v_w"].T + params["v_b"]
    Nr = k.shape[1]
    qh = q.reshape(B, N, num_heads, hd).transpose(0, 2, 1, 3)
    kh = k.reshape(B, Nr, num_heads, hd).transpose(0, 2, 1, 3)
    vh = v.reshape(B, Nr, num_heads, hd).transpose(0, 2, 1, 3)
    attn = jax.nn.softmax(jnp.einsum("bhnd,bhmd->bhnm", qh, kh) * scale, axis=-1)
    o = jnp.einsum("bhnm,bhmd->bhnd", attn, vh)
    return o.transpose(0, 2, 1, 3).reshape(B, N, C)


if __name__ == "__main__":
    B, C, H, W = 2, 32, 16, 16
    num_heads, sr_ratio = 2, 2
    N = H * W

    key = jax.random.PRNGKey(0)
    kp, kx = jax.random.split(key)
    params = init_params(kp, C, sr_ratio)
    prep = prepare_params(params, num_heads, sr_ratio)
    x = jax.random.normal(kx, (B, N, C), jnp.float32)

    fwd = jax.jit(
        efficient_attention_forward,
        static_argnames=("H", "W", "num_heads", "sr_ratio",
                         "matmul_dtype", "approx_recip"))

    ref = _reference(params, x, H, W, num_heads, sr_ratio)

    # precision mode: f32 MXU operands and f32 I/O, exact reciprocal
    out_f32 = jax.block_until_ready(
        fwd(prep, x, H=H, W=W, num_heads=num_heads, sr_ratio=sr_ratio,
            matmul_dtype=jnp.float32, approx_recip=False))
    assert out_f32.shape == (B, N, C)
    err32 = float(jnp.max(jnp.abs(out_f32 - ref)))
    assert err32 < 1e-3, err32

    # fast mode: bf16 MXU operands + bf16 inter-kernel I/O, EUP approx reciprocal
    out_fast = jax.block_until_ready(
        fwd(prep, x, H=H, W=W, num_heads=num_heads, sr_ratio=sr_ratio,
            matmul_dtype=jnp.bfloat16, approx_recip=True))
    assert out_fast.shape == (B, N, C)
    err_fast = float(jnp.max(jnp.abs(out_fast - ref)))
    assert err_fast < 1e-1, err_fast

    print("KERNEL_OK")
</pallas_src>

<mosaic_0001>
module attributes {stable_mosaic.version = 11 : i64} {
  func.func @_linear_kernel(%arg0: i32, %arg1: memref<128x32xf32, #tpu.memory_space<vmem>>, %arg2: memref<32x64xf32, #tpu.memory_space<vmem>>, %arg3: memref<1x64xf32, #tpu.memory_space<vmem>>, %arg4: memref<128x64xf32, #tpu.memory_space<vmem>>) attributes {dimension_semantics = [#tpu.dimension_semantics<parallel>], iteration_bounds = array<i64: 1>, scalar_prefetch = 0 : i64, scratch_operands = 0 : i64, tpu.core_type = #tpu.core_type<tc>, window_params = [{transform_indices = @transform_0, window_bounds = array<i64: 128, 32>}, {pipeline_mode = #tpu.pipeline_mode<synchronous>, transform_indices = @transform_1, window_bounds = array<i64: 32, 64>}, {pipeline_mode = #tpu.pipeline_mode<synchronous>, transform_indices = @transform_2, window_bounds = array<i64: 1, 64>}, {transform_indices = @transform_3, window_bounds = array<i64: 128, 64>}]} {
    %c0 = arith.constant 0 : index
    %c0_0 = arith.constant 0 : index
    %0 = vector.load %arg1[%c0, %c0_0] : memref<128x32xf32, #tpu.memory_space<vmem>>, vector<128x32xf32>
    %c0_1 = arith.constant 0 : index
    %c0_2 = arith.constant 0 : index
    %1 = vector.load %arg2[%c0_1, %c0_2] : memref<32x64xf32, #tpu.memory_space<vmem>>, vector<32x64xf32>
    %cst = arith.constant dense<0.000000e+00> : vector<128x64xf32>
    %2 = tpu.matmul %0, %1, %cst {dimension_numbers = #tpu.dot_dimension_numbers<[1], [0], [0], [1], [0, 0, 1, 1], [], []>} : vector<128x32xf32>, vector<32x64xf32>, vector<128x64xf32> -> vector<128x64xf32>
    %c0_3 = arith.constant 0 : index
    %c0_4 = arith.constant 0 : index
    %3 = vector.load %arg3[%c0_3, %c0_4] : memref<1x64xf32, #tpu.memory_space<vmem>>, vector<1x64xf32>
    %4 = vector.broadcast %3 : vector<1x64xf32> to vector<128x64xf32>
    %5 = arith.addf %2, %4 : vector<128x64xf32>
    %c0_5 = arith.constant 0 : index
    %c0_6 = arith.constant 0 : index
    %6 = vector.load %arg4[%c0_5, %c0_6] : memref<128x64xf32, #tpu.memory_space<vmem>>, vector<128x64xf32>
    tpu.vector_store %arg4[%c0_5, %c0_6], %5 {strides = array<i32>} : memref<128x64xf32, #tpu.memory_space<vmem>>, vector<128x64xf32>,
    return
  }
  func.func @transform_0(%arg0: i32) -> (i32, i32) {
    %c0_i32 = arith.constant 0 : i32
    %c0_i32_0 = arith.constant 0 : i32
    return %arg0, %c0_i32 : i32, i32
  }
  func.func @transform_1(%arg0: i32) -> (i32, i32) {
    %c0_i32 = arith.constant 0 : i32
    %c0_i32_0 = arith.constant 0 : i32
    %c0_i32_1 = arith.constant 0 : i32
    return %c0_i32, %c0_i32_0 : i32, i32
  }
  func.func @transform_2(%arg0: i32) -> (i32, i32) {
    %c0_i32 = arith.constant 0 : i32
    %c0_i32_0 = arith.constant 0 : i32
    %c0_i32_1 = arith.constant 0 : i32
    return %c0_i32, %c0_i32_0 : i32, i32
  }
  func.func @transform_3(%arg0: i32) -> (i32, i32) {
    %c0_i32 = arith.constant 0 : i32
    %c0_i32_0 = arith.constant 0 : i32
    return %arg0, %c0_i32 : i32, i32
  }
}

module attributes {stable_mosaic.version = 11 : i64} {
  func.func @_linear_ln_kernel(%arg0: i32, %arg1: memref<128x128xf32, #tpu.memory_space<vmem>>, %arg2: memref<128x32xf32, #tpu.memory_space<vmem>>, %arg3: memref<1x32xf32, #tpu.memory_space<vmem>>, %arg4: memref<1x32xf32, #tpu.memory_space<vmem>>, %arg5: memref<1x32xf32, #tpu.memory_space<vmem>>, %arg6: memref<128x32xf32, #tpu.memory_space<vmem>>) attributes {dimension_semantics = [#tpu.dimension_semantics<parallel>], iteration_bounds = array<i64: 1>, scalar_prefetch = 0 : i64, scratch_operands = 0 : i64, tpu.core_type = #tpu.core_type<tc>, window_params = [{transform_indices = @transform_0, window_bounds = array<i64: 128, 128>}, {pipeline_mode = #tpu.pipeline_mode<synchronous>, transform_indices = @transform_1, window_bounds = array<i64: 128, 32>}, {pipeline_mode = #tpu.pipeline_mode<synchronous>, transform_indices = @transform_2, window_bounds = array<i64: 1, 32>}, {pipeline_mode = #tpu.pipeline_mode<synchronous>, transform_indices = @transform_3, window_bounds = array<i64: 1, 32>}, {pipeline_mode = #tpu.pipeline_mode<synchronous>, transform_indices = @transform_4, window_bounds = array<i64: 1, 32>}, {transform_indices = @transform_5, window_bounds = array<i64: 128, 32>}]} {
    %c0 = arith.constant 0 : index
    %c0_0 = arith.constant 0 : index
    %0 = vector.load %arg1[%c0, %c0_0] : memref<128x128xf32, #tpu.memory_space<vmem>>, vector<128x128xf32>
    %c0_1 = arith.constant 0 : index
    %c0_2 = arith.constant 0 : index
    %1 = vector.load %arg2[%c0_1, %c0_2] : memref<128x32xf32, #tpu.memory_space<vmem>>, vector<128x32xf32>
    %cst = arith.constant dense<0.000000e+00> : vector<128x32xf32>
    %2 = tpu.matmul %0, %1, %cst {dimension_numbers = #tpu.dot_dimension_numbers<[1], [0], [0], [1], [0, 0, 1, 1], [], []>} : vector<128x128xf32>, vector<128x32xf32>, vector<128x32xf32> -> vector<128x32xf32>
    %c0_3 = arith.constant 0 : index
    %c0_4 = arith.constant 0 : index
    %3 = vector.load %arg3[%c0_3, %c0_4] : memref<1x32xf32, #tpu.memory_space<vmem>>, vector<1x32xf32>
    %4 = vector.broadcast %3 : vector<1x32xf32> to vector<128x32xf32>
    %5 = arith.addf %2, %4 : vector<128x32xf32>
    %cst_5 = arith.constant dense<0.000000e+00> : vector<128xf32>
    %6 = vector.multi_reduction <add>, %5, %cst_5 [1] : vector<128x32xf32> to vector<128xf32>
    %7 = vector.shape_cast %6 : vector<128xf32> to vector<128x1xf32>
    %cst_6 = arith.constant 3.200000e+01 : f32
    %8 = vector.broadcast %cst_6 : f32 to vector<128x1xf32>
    %9 = arith.divf %7, %8 : vector<128x1xf32>
    %10 = vector.broadcast %9 : vector<128x1xf32> to vector<128x32xf32>
    %11 = arith.subf %5, %10 : vector<128x32xf32>
    %12 = arith.mulf %11, %11 : vector<128x32xf32>
    %cst_7 = arith.constant dense<0.000000e+00> : vector<128xf32>
    %13 = vector.multi_reduction <add>, %12, %cst_7 [1] : vector<128x32xf32> to vector<128xf32>
    %14 = vector.shape_cast %13 : vector<128xf32> to vector<128x1xf32>
    %cst_8 = arith.constant 3.200000e+01 : f32
    %15 = vector.broadcast %cst_8 : f32 to vector<128x1xf32>
    %16 = arith.divf %14, %15 : vector<128x1xf32>
    %cst_9 = arith.constant 9.99999997E-7 : f32
    %17 = vector.broadcast %cst_9 : f32 to vector<128x1xf32>
    %18 = arith.addf %16, %17 : vector<128x1xf32>
    %19 = math.rsqrt %18 : vector<128x1xf32>
    %20 = vector.broadcast %19 : vector<128x1xf32> to vector<128x32xf32>
    %21 = arith.mulf %11, %20 : vector<128x32xf32>
    %c0_10 = arith.constant 0 : index
    %c0_11 = arith.constant 0 : index
    %22 = vector.load %arg4[%c0_10, %c0_11] : memref<1x32xf32, #tpu.memory_space<vmem>>, vector<1x32xf32>
    %23 = vector.broadcast %22 : vector<1x32xf32> to vector<128x32xf32>
    %24 = arith.mulf %21, %23 : vector<128x32xf32>
    %c0_12 = arith.constant 0 : index
    %c0_13 = arith.constant 0 : index
    %25 = vector.load %arg5[%c0_12, %c0_13] : memref<1x32xf32, #tpu.memory_space<vmem>>, vector<1x32xf32>
    %26 = vector.broadcast %25 : vector<1x32xf32> to vector<128x32xf32>
    %27 = arith.addf %24, %26 : vector<128x32xf32>
    %c0_14 = arith.constant 0 : index
    %c0_15 = arith.constant 0 : index
    %28 = vector.load %arg6[%c0_14, %c0_15] : memref<128x32xf32, #tpu.memory_space<vmem>>, vector<128x32xf32>
    tpu.vector_store %arg6[%c0_14, %c0_15], %27 {strides = array<i32>} : memref<128x32xf32, #tpu.memory_space<vmem>>, vector<128x32xf32>,
    return
  }
  func.func @transform_0(%arg0: i32) -> (i32, i32) {
    %c0_i32 = arith.constant 0 : i32
    %c0_i32_0 = arith.constant 0 : i32
    return %arg0, %c0_i32 : i32, i32
  }
  func.func @transform_1(%arg0: i32) -> (i32, i32) {
    %c0_i32 = arith.constant 0 : i32
    %c0_i32_0 = arith.constant 0 : i32
    %c0_i32_1 = arith.constant 0 : i32
    return %c0_i32, %c0_i32_0 : i32, i32
  }
  func.func @transform_2(%arg0: i32) -> (i32, i32) {
    %c0_i32 = arith.constant 0 : i32
    %c0_i32_0 = arith.constant 0 : i32
    %c0_i32_1 = arith.constant 0 : i32
    return %c0_i32, %c0_i32_0 : i32, i32
  }
  func.func @transform_3(%arg0: i32) -> (i32, i32) {
    %c0_i32 = arith.constant 0 : i32
    %c0_i32_0 = arith.constant 0 : i32
    %c0_i32_1 = arith.constant 0 : i32
    return %c0_i32, %c0_i32_0 : i32, i32
  }
  func.func @transform_4(%arg0: i32) -> (i32, i32) {
    %c0_i32 = arith.constant 0 : i32
    %c0_i32_0 = arith.constant 0 : i32
    %c0_i32_1 = arith.constant 0 : i32
    return %c0_i32, %c0_i32_0 : i32, i32
  }
  func.func @transform_5(%arg0: i32) -> (i32, i32) {
    %c0_i32 = arith.constant 0 : i32
    %c0_i32_0 = arith.constant 0 : i32
    return %arg0, %c0_i32 : i32, i32
  }
}

module attributes {stable_mosaic.version = 11 : i64} {
  func.func @_attn_kernel(%arg0: i32, %arg1: i32, %arg2: memref<1x256x32xf32, #tpu.memory_space<vmem>>, %arg3: memref<32x32xf32, #tpu.memory_space<vmem>>, %arg4: memref<1x32xf32, #tpu.memory_space<vmem>>, %arg5: memref<1x64x64xf32, #tpu.memory_space<vmem>>, %arg6: memref<1x256x32xf32, #tpu.memory_space<vmem>>) attributes {dimension_semantics = [#tpu.dimension_semantics<parallel>, #tpu.dimension_semantics<parallel>], iteration_bounds = array<i64: 2, 1>, scalar_prefetch = 0 : i64, scratch_operands = 0 : i64, tpu.core_type = #tpu.core_type<tc>, window_params = [{transform_indices = @transform_0, window_bounds = array<i64: 1, 256, 32>}, {pipeline_mode = #tpu.pipeline_mode<synchronous>, transform_indices = @transform_1, window_bounds = array<i64: 32, 32>}, {pipeline_mode = #tpu.pipeline_mode<synchronous>, transform_indices = @transform_2, window_bounds = array<i64: 1, 32>}, {transform_indices = @transform_3, window_bounds = array<i64: 1, 64, 64>}, {transform_indices = @transform_4, window_bounds = array<i64: 1, 256, 32>}]} {
    %c0 = arith.constant 0 : index
    %c0_0 = arith.constant 0 : index
    %c0_1 = arith.constant 0 : index
    %0 = vector.load %arg2[%c0, %c0_0, %c0_1] : memref<1x256x32xf32, #tpu.memory_space<vmem>>, vector<1x256x32xf32>
    %1 = vector.shape_cast %0 : vector<1x256x32xf32> to vector<256x32xf32>
    %c0_2 = arith.constant 0 : index
    %c0_3 = arith.constant 0 : index
    %2 = vector.load %arg3[%c0_2, %c0_3] : memref<32x32xf32, #tpu.memory_space<vmem>>, vector<32x32xf32>
    %cst = arith.constant dense<0.000000e+00> : vector<256x32xf32>
    %3 = tpu.matmul %1, %2, %cst {dimension_numbers = #tpu.dot_dimension_numbers<[1], [0], [0], [1], [0, 0, 1, 1], [], []>} : vector<256x32xf32>, vector<32x32xf32>, vector<256x32xf32> -> vector<256x32xf32>
    %c0_4 = arith.constant 0 : index
    %c0_5 = arith.constant 0 : index
    %4 = vector.load %arg4[%c0_4, %c0_5] : memref<1x32xf32, #tpu.memory_space<vmem>>, vector<1x32xf32>
    %5 = vector.broadcast %4 : vector<1x32xf32> to vector<256x32xf32>
    %6 = arith.addf %3, %5 : vector<256x32xf32>
    %c0_6 = arith.constant 0 : index
    %c0_7 = arith.constant 0 : index
    %c0_8 = arith.constant 0 : index
    %7 = vector.load %arg5[%c0_6, %c0_7, %c0_8] : memref<1x64x64xf32, #tpu.memory_space<vmem>>, vector<1x64x64xf32>
    %8 = vector.shape_cast %7 : vector<1x64x64xf32> to vector<64x64xf32>
    %9 = vector.extract_strided_slice %6 {offsets = [0, 0], sizes = [256, 16], strides = [1, 1]} : vector<256x32xf32> to vector<256x16xf32>
    %10 = vector.extract_strided_slice %8 {offsets = [0, 0], sizes = [64, 16], strides = [1, 1]} : vector<64x64xf32> to vector<64x16xf32>
    %11 = vector.extract_strided_slice %8 {offsets = [0, 32], sizes = [64, 16], strides = [1, 1]} : vector<64x64xf32> to vector<64x16xf32>
    %cst_9 = arith.constant dense<0.000000e+00> : vector<256x64xf32>
    %12 = tpu.matmul %9, %10, %cst_9 {dimension_numbers = #tpu.dot_dimension_numbers<[1], [1], [0], [0], [0, 0, 1, 0], [], []>} : vector<256x16xf32>, vector<64x16xf32>, vector<256x64xf32> -> vector<256x64xf32>
    %cst_10 = arith.constant dense<0xFF800000> : vector<256xf32>
    %13 = vector.multi_reduction <maximumf>, %12, %cst_10 [1] : vector<256x64xf32> to vector<256xf32>
    %14 = vector.shape_cast %13 : vector<256xf32> to vector<256x1xf32>
    %15 = vector.broadcast %14 : vector<256x1xf32> to vector<256x64xf32>
    %16 = arith.subf %12, %15 : vector<256x64xf32>
    %17 = math.exp %16 : vector<256x64xf32>
    %cst_11 = arith.constant dense<0.000000e+00> : vector<256xf32>
    %18 = vector.multi_reduction <add>, %17, %cst_11 [1] : vector<256x64xf32> to vector<256xf32>
    %19 = vector.shape_cast %18 : vector<256xf32> to vector<256x1xf32>
    %cst_12 = arith.constant dense<0.000000e+00> : vector<256x16xf32>
    %20 = tpu.matmul %17, %11, %cst_12 {dimension_numbers = #tpu.dot_dimension_numbers<[1], [0], [0], [1], [0, 0, 1, 1], [], []>} : vector<256x64xf32>, vector<64x16xf32>, vector<256x16xf32> -> vector<256x16xf32>
    %21 = vector.broadcast %19 : vector<256x1xf32> to vector<256x16xf32>
    %22 = arith.divf %20, %21 : vector<256x16xf32>
    %23 = vector.extract_strided_slice %6 {offsets = [0, 16], sizes = [256, 16], strides = [1, 1]} : vector<256x32xf32> to vector<256x16xf32>
    %24 = vector.extract_strided_slice %8 {offsets = [0, 16], sizes = [64, 16], strides = [1, 1]} : vector<64x64xf32> to vector<64x16xf32>
    %25 = vector.extract_strided_slice %8 {offsets = [0, 48], sizes = [64, 16], strides = [1, 1]} : vector<64x64xf32> to vector<64x16xf32>
    %cst_13 = arith.constant dense<0.000000e+00> : vector<256x64xf32>
    %26 = tpu.matmul %23, %24, %cst_13 {dimension_numbers = #tpu.dot_dimension_numbers<[1], [1], [0], [0], [0, 0, 1, 0], [], []>} : vector<256x16xf32>, vector<64x16xf32>, vector<256x64xf32> -> vector<256x64xf32>
    %cst_14 = arith.constant dense<0xFF800000> : vector<256xf32>
    %27 = vector.multi_reduction <maximumf>, %26, %cst_14 [1] : vector<256x64xf32> to vector<256xf32>
    %28 = vector.shape_cast %27 : vector<256xf32> to vector<256x1xf32>
    %29 = vector.broadcast %28 : vector<256x1xf32> to vector<256x64xf32>
    %30 = arith.subf %26, %29 : vector<256x64xf32>
    %31 = math.exp %30 : vector<256x64xf32>
    %cst_15 = arith.constant dense<0.000000e+00> : vector<256xf32>
    %32 = vector.multi_reduction <add>, %31, %cst_15 [1] : vector<256x64xf32> to vector<256xf32>
    %33 = vector.shape_cast %32 : vector<256xf32> to vector<256x1xf32>
    %cst_16 = arith.constant dense<0.000000e+00> : vector<256x16xf32>
    %34 = tpu.matmul %31, %25, %cst_16 {dimension_numbers = #tpu.dot_dimension_numbers<[1], [0], [0], [1], [0, 0, 1, 1], [], []>} : vector<256x64xf32>, vector<64x16xf32>, vector<256x16xf32> -> vector<256x16xf32>
    %35 = vector.broadcast %33 : vector<256x1xf32> to vector<256x16xf32>
    %36 = arith.divf %34, %35 : vector<256x16xf32>
    %37 = tpu.concatenate %22, %36 in 1 : vector<256x16xf32>, vector<256x16xf32> -> vector<256x32xf32>
    %c0_17 = arith.constant 0 : index
    %c0_18 = arith.constant 0 : index
    %c0_19 = arith.constant 0 : index
    %38 = vector.load %arg6[%c0_17, %c0_18, %c0_19] : memref<1x256x32xf32, #tpu.memory_space<vmem>>, vector<1x256x32xf32>
    %39 = vector.shape_cast %38 : vector<1x256x32xf32> to vector<256x32xf32>
    %40 = vector.shape_cast %37 : vector<256x32xf32> to vector<1x256x32xf32>
    tpu.vector_store %arg6[%c0_17, %c0_18, %c0_19], %40 {strides = array<i32>} : memref<1x256x32xf32, #tpu.memory_space<vmem>>, vector<1x256x32xf32>,
    return
  }
  func.func @transform_0(%arg0: i32, %arg1: i32) -> (i32, i32, i32) {
    %c0_i32 = arith.constant 0 : i32
    %c0_i32_0 = arith.constant 0 : i32
    return %arg0, %arg1, %c0_i32 : i32, i32, i32
  }
  func.func @transform_1(%arg0: i32, %arg1: i32) -> (i32, i32) {
    %c0_i32 = arith.constant 0 : i32
    %c0_i32_0 = arith.constant 0 : i32
    %c0_i32_1 = arith.constant 0 : i32
    return %c0_i32, %c0_i32_0 : i32, i32
  }
  func.func @transform_2(%arg0: i32, %arg1: i32) -> (i32, i32) {
    %c0_i32 = arith.constant 0 : i32
    %c0_i32_0 = arith.constant 0 : i32
    %c0_i32_1 = arith.constant 0 : i32
    return %c0_i32, %c0_i32_0 : i32, i32
  }
  func.func @transform_3(%arg0: i32, %arg1: i32) -> (i32, i32, i32) {
    %c0_i32 = arith.constant 0 : i32
    %c0_i32_0 = arith.constant 0 : i32
    %c0_i32_1 = arith.constant 0 : i32
    return %arg0, %c0_i32, %c0_i32_0 : i32, i32, i32
  }
  func.func @transform_4(%arg0: i32, %arg1: i32) -> (i32, i32, i32) {
    %c0_i32 = arith.constant 0 : i32
    %c0_i32_0 = arith.constant 0 : i32
    return %arg0, %arg1, %c0_i32 : i32, i32, i32
  }
}

</mosaic_0001>

<bundles_post_ra>
// kernel: efficient_attention_forward.4
= control target key start
LH: loop header
LB: loop body
LE: loop exit
PB: predicated region body
PF: predicated region fallthrough
CT: control target
= control target key end

     0   :  { %vm41_vm0 = vcmask 261120   ;;  %vm235_vm1 = vcmask 523264   ;;  %s496_s1 = inlined_call_operand.vmem [shape: f32[32,64], index: 1, kind: input, shape index: {}]   ;;  %s497_s0 = inlined_call_operand.vmem [shape: f32[128,32], index: 0, kind: input, shape index: {}]   ;;  %s498_s2 = inlined_call_operand.vmem [shape: f32[1,64], index: 2, kind: input, shape index: {}]   ;;  %s499_s3 = inlined_call_operand.vmem [shape: f32[128,64], index: 3, kind: output, shape index: {}]  }
   0x1   :  { %v33_v0 = vld [vmem:[%s496_s1 + $0x18] sm:$0xff]  ;;  %v32_v1 = vld [vmem:[%s496_s1 + $0x10] sm:$0xff]  ;;  %v31_v2 = vld [vmem:[%s496_s1 + $0x8] sm:$0xff] }
   0x2   :  { %293 = vmatprep.subr.mxu0 %v33_v0  ;;  %325 = vmatprep.subr.mxu1 %v33_v0  ;;  %v30_v3 = vld [vmem:[%s496_s1] sm:$0xff]  ;;  %v15_v6 = vld [vmem:[%s497_s0 + $0x8] sm:$0xff]  ;;  %v16_v8 = vld [vmem:[%s497_s0 + $0x10] sm:$0xff] }
   0x3   :  { %294 = vmatpush3.msra.mxu0 %v33_v0  ;;  %329 = vmatpush3.msra.mxu1 %v33_v0  ;;  %v14_v4 = vld [vmem:[%s497_s0] sm:$0xff]  ;;  %v23_v7 = vld [vmem:[%s497_s0 + $0x48] sm:$0xff]  ;;  %v24_v9 = vld [vmem:[%s497_s0 + $0x50] sm:$0xff] }
   0x4   :  { %295 = vmatprep.subr.mxu0 %v32_v1  ;;  %326 = vmatprep.subr.mxu1 %v32_v1  ;;  %v22_v5 = vld [vmem:[%s497_s0 + $0x40] sm:$0xff]  ;;  %v17_v10 = vld [vmem:[%s497_s0 + $0x18] sm:$0xff]  ;;  %v19_v14 = vld [vmem:[%s497_s0 + $0x28] sm:$0xff] }
   0x5   :  { %296 = vmatpush3.msra.mxu0 %v32_v1  ;;  %330 = vmatpush3.msra.mxu1 %v32_v1  ;;  %v25_v11 = vld [vmem:[%s497_s0 + $0x58] sm:$0xff]  ;;  %v18_v12 = vld [vmem:[%s497_s0 + $0x20] sm:$0xff]  ;;  %v27_v15 = vld [vmem:[%s497_s0 + $0x68] sm:$0xff] }
   0x6   :  { %297 = vmatprep.subr.mxu0 %v31_v2  ;;  %327 = vmatprep.subr.mxu1 %v31_v2  ;;  %v26_v13 = vld [vmem:[%s497_s0 + $0x60] sm:$0xff]  ;;  %v20_v16 = vld [vmem:[%s497_s0 + $0x30] sm:$0xff]  ;;  %v21_v18 = vld [vmem:[%s497_s0 + $0x38] sm:$0xff] }
   0x7   :  { %298 = vmatpush3.msra.mxu0 %v31_v2  ;;  %331 = vmatpush3.msra.mxu1 %v31_v2  ;;  %v28_v17 = vld [vmem:[%s497_s0 + $0x70] sm:$0xff]  ;;  %v29_v19 = vld [vmem:[%s497_s0 + $0x78] sm:$0xff]  ;;  %v256_v20 = vld [vmem:[%s498_s2] ss:$0 sm:$0xff] }
   0x8   :  { %299 = vmatprep.subr.mxu0 %v30_v3  ;;  %328 = vmatprep.subr.mxu1 %v30_v3 }
   0x9   :  { %300 = vmatpush3.msra.mxu0 %v30_v3  ;;  %332 = vmatpush3.msra.mxu1 %v30_v3 }
   0xa   :  { %301 = vmatprep.mubr.msk.f32.mxu0 %vm41_vm0, %v14_v4  ;;  %313 = vmatprep.mubr.msk.f32.mxu1 %vm41_vm0, %v22_v5 }
   0xb   :  { %302 = vmatmul.mubr.msk.f32.vlgmr.msra.gmra.mxu0 %vm41_vm0, %v15_v6  ;;  %314 = vmatmul.mubr.msk.f32.vlgmr.msra.gmra.mxu1 %vm41_vm0, %v23_v7 }
   0xc   :  { %304 = vmatprep.mubr.msk.f32.mxu0 %vm41_vm0, %v16_v8  ;;  %316 = vmatprep.mubr.msk.f32.mxu1 %vm41_vm0, %v24_v9 }
   0xf   :  { %305 = vmatmul.mubr.msk.f32.gmra.mxu0 %vm41_vm0, %v17_v10  ;;  %317 = vmatmul.mubr.msk.f32.gmra.mxu1 %vm41_vm0, %v25_v11 }
  0x10   :  { %307 = vmatprep.mubr.msk.f32.mxu0 %vm41_vm0, %v18_v12  ;;  %319 = vmatprep.mubr.msk.f32.mxu1 %vm41_vm0, %v26_v13 }
  0x13   :  { %308 = vmatmul.mubr.msk.f32.gmra.mxu0 %vm41_vm0, %v19_v14  ;;  %320 = vmatmul.mubr.msk.f32.gmra.mxu1 %vm41_vm0, %v27_v15 }
  0x14   :  { %310 = vmatprep.mubr.msk.f32.mxu0 %vm41_vm0, %v20_v16  ;;  %322 = vmatprep.mubr.msk.f32.mxu1 %vm41_vm0, %v28_v17 }
  0x17   :  { %311 = vmatmul.mubr.msk.f32.gmra.mxu0 %vm41_vm0, %v21_v18  ;;  %323 = vmatmul.mubr.msk.f32.gmra.mxu1 %vm41_vm0, %v29_v19 }
  0xcb   :  { %v303_v21 = vpop.f32.mrf.mxu0  ;;  %v315_v22 = vpop.f32.mrf.mxu1 }
  0xcc   :  { %v162_v23 = vadd.f32 %v303_v21, %v256_v20  ;;  %v202_v24 = vadd.f32 %v315_v22, %v256_v20 }
  0xcd   :  { %v156_v25 = vpop.f32.mrf.mxu0  ;;  %v196_v26 = vpop.f32.mrf.mxu1 }
  0xce   :  { %237 = vst.msk [vmem:[%s499_s3 + $0x8] sm:$0xff] %vm235_vm1, %v162_v23  ;;  %245 = vst.msk [vmem:[%s499_s3 + $0x48] sm:$0xff] %vm235_vm1, %v202_v24  ;;  %v157_v27 = vadd.f32 %v256_v20, %v156_v25  ;;  %v197_v28 = vadd.f32 %v256_v20, %v196_v26 }
  0xcf   :  { %v306_v29 = vpop.f32.mrf.mxu0  ;;  %v318_v30 = vpop.f32.mrf.mxu1 }
  0xd0   :  { %236 = vst.msk [vmem:[%s499_s3] sm:$0xff] %vm235_vm1, %v157_v27  ;;  %244 = vst.msk [vmem:[%s499_s3 + $0x40] sm:$0xff] %vm235_vm1, %v197_v28  ;;  %v172_v31 = vadd.f32 %v306_v29, %v256_v20  ;;  %v212_v32 = vadd.f32 %v318_v30, %v256_v20 }
  0xd1   :  { %v166_v33 = vpop.f32.mrf.mxu0  ;;  %v206_v34 = vpop.f32.mrf.mxu1 }
  0xd2   :  { %239 = vst.msk [vmem:[%s499_s3 + $0x18] sm:$0xff] %vm235_vm1, %v172_v31  ;;  %247 = vst.msk [vmem:[%s499_s3 + $0x58] sm:$0xff] %vm235_vm1, %v212_v32  ;;  %v167_v35 = vadd.f32 %v256_v20, %v166_v33  ;;  %v207_v36 = vadd.f32 %v256_v20, %v206_v34 }
  0xd3   :  { %v309_v37 = vpop.f32.mrf.mxu0  ;;  %v321_v38 = vpop.f32.mrf.mxu1 }
  0xd4   :  { %238 = vst.msk [vmem:[%s499_s3 + $0x10] sm:$0xff] %vm235_vm1, %v167_v35  ;;  %246 = vst.msk [vmem:[%s499_s3 + $0x50] sm:$0xff] %vm235_vm1, %v207_v36  ;;  %v182_v39 = vadd.f32 %v309_v37, %v256_v20  ;;  %v222_v40 = vadd.f32 %v321_v38, %v256_v20 }
  0xd5   :  { %v176_v41 = vpop.f32.mrf.mxu0  ;;  %v216_v42 = vpop.f32.mrf.mxu1 }
  0xd6   :  { %241 = vst.msk [vmem:[%s499_s3 + $0x28] sm:$0xff] %vm235_vm1, %v182_v39  ;;  %249 = vst.msk [vmem:[%s499_s3 + $0x68] sm:$0xff] %vm235_vm1, %v222_v40  ;;  %v177_v43 = vadd.f32 %v256_v20, %v176_v41  ;;  %v217_v44 = vadd.f32 %v256_v20, %v216_v42 }
  0xd7   :  { %v312_v45 = vpop.f32.mrf.mxu0  ;;  %v324_v46 = vpop.f32.mrf.mxu1 }
  0xd8   :  { %240 = vst.msk [vmem:[%s499_s3 + $0x20] sm:$0xff] %vm235_vm1, %v177_v43  ;;  %248 = vst.msk [vmem:[%s499_s3 + $0x60] sm:$0xff] %vm235_vm1, %v217_v44  ;;  %v192_v47 = vadd.f32 %v312_v45, %v256_v20  ;;  %v232_v48 = vadd.f32 %v324_v46, %v256_v20 }
  0xd9   :  { %v186_v49 = vpop.f32.mrf.mxu0  ;;  %v226_v50 = vpop.f32.mrf.mxu1 }
  0xda   :  { %243 = vst.msk [vmem:[%s499_s3 + $0x38] sm:$0xff] %vm235_vm1, %v192_v47  ;;  %251 = vst.msk [vmem:[%s499_s3 + $0x78] sm:$0xff] %vm235_vm1, %v232_v48  ;;  %v187_v51 = vadd.f32 %v256_v20, %v186_v49  ;;  %v227_v52 = vadd.f32 %v256_v20, %v226_v50 }
  0xdc   :  { %242 = vst.msk [vmem:[%s499_s3 + $0x30] sm:$0xff] %vm235_vm1, %v187_v51  ;;  %250 = vst.msk [vmem:[%s499_s3 + $0x70] sm:$0xff] %vm235_vm1, %v227_v52 }

// kernel: efficient_attention_forward.3
= control target key start
LH: loop header
LB: loop body
LE: loop exit
PB: predicated region body
PF: predicated region fallthrough
CT: control target
= control target key end

     0   :  { %vm204_vm0 = vcmask 261120   ;;  %s1042_s1 = inlined_call_operand.vmem [shape: f32[128,32], index: 1, kind: input, shape index: {}]   ;;  %s1043_s0 = inlined_call_operand.vmem [shape: f32[128,128], index: 0, kind: input, shape index: {}]   ;;  %s1044_s2 = inlined_call_operand.vmem [shape: f32[1,32], index: 2, kind: input, shape index: {}]   ;;  %s1045_s3 = inlined_call_operand.vmem [shape: f32[1,32], index: 3, kind: input, shape index: {}]   ;;  %s1046_s4 = inlined_call_operand.vmem [shape: f32[1,32], index: 4, kind: input, shape index: {}]   ;;  %s1047_s5 = inlined_call_operand.vmem [shape: f32[128,32], index: 5, kind: output, shape index: {}]  }
   0x1   :  { %v51_v0 = vld [vmem:[%s1042_s1 + $0x78] sm:$0xff]  ;;  %v50_v1 = vld [vmem:[%s1042_s1 + $0x70] sm:$0xff]  ;;  %v49_v2 = vld [vmem:[%s1042_s1 + $0x68] sm:$0xff] }
   0x2   :  { %515 = vmatprep.subr.mxu0 %v51_v0  ;;  %571 = vmatprep.subr.mxu1 %v51_v0  ;;  %v48_v3 = vld [vmem:[%s1042_s1 + $0x60] sm:$0xff]  ;;  %v47_v4 = vld [vmem:[%s1042_s1 + $0x58] sm:$0xff]  ;;  %v46_v5 = vld [vmem:[%s1042_s1 + $0x50] sm:$0xff] }
   0x3   :  { %516 = vmatpush3.msra.mxu0 %v51_v0  ;;  %587 = vmatpush3.msra.mxu1 %v51_v0  ;;  %v45_v6 = vld [vmem:[%s1042_s1 + $0x48] sm:$0xff]  ;;  %v44_v7 = vld [vmem:[%s1042_s1 + $0x40] sm:$0xff]  ;;  %v43_v8 = vld [vmem:[%s1042_s1 + $0x38] sm:$0xff] }
   0x4   :  { %517 = vmatprep.subr.mxu0 %v50_v1  ;;  %572 = vmatprep.subr.mxu1 %v50_v1  ;;  %v42_v9 = vld [vmem:[%s1042_s1 + $0x30] sm:$0xff]  ;;  %v41_v10 = vld [vmem:[%s1042_s1 + $0x28] sm:$0xff]  ;;  %v40_v11 = vld [vmem:[%s1042_s1 + $0x20] sm:$0xff] }
   0x5   :  { %518 = vmatpush3.msra.mxu0 %v50_v1  ;;  %588 = vmatpush3.msra.mxu1 %v50_v1  ;;  %v39_v12 = vld [vmem:[%s1042_s1 + $0x18] sm:$0xff]  ;;  %v38_v13 = vld [vmem:[%s1042_s1 + $0x10] sm:$0xff]  ;;  %v37_v14 = vld [vmem:[%s1042_s1 + $0x8] sm:$0xff] }
   0x6   :  { %519 = vmatprep.subr.mxu0 %v49_v2  ;;  %573 = vmatprep.subr.mxu1 %v49_v2  ;;  %v36_v15 = vld [vmem:[%s1042_s1] sm:$0xff]  ;;  %v21_v18 = vld [vmem:[%s1043_s0 + $0x8] sm:$0xff]  ;;  %v22_v20 = vld [vmem:[%s1043_s0 + $0x10] sm:$0xff] }
   0x7   :  { %520 = vmatpush3.msra.mxu0 %v49_v2  ;;  %589 = vmatpush3.msra.mxu1 %v49_v2  ;;  %v20_v16 = vld [vmem:[%s1043_s0] sm:$0xff]  ;;  %v29_v19 = vld [vmem:[%s1043_s0 + $0x48] sm:$0xff]  ;;  %v30_v21 = vld [vmem:[%s1043_s0 + $0x50] sm:$0xff] }
   0x8   :  { %521 = vmatprep.subr.mxu0 %v48_v3  ;;  %574 = vmatprep.subr.mxu1 %v48_v3  ;;  %v28_v17 = vld [vmem:[%s1043_s0 + $0x40] sm:$0xff]  ;;  %v23_v22 = vld [vmem:[%s1043_s0 + $0x18] sm:$0xff]  ;;  %v25_v26 = vld [vmem:[%s1043_s0 + $0x28] sm:$0xff] }
   0x9   :  { %522 = vmatpush3.msra.mxu0 %v48_v3  ;;  %590 = vmatpush3.msra.mxu1 %v48_v3  ;;  %v31_v23 = vld [vmem:[%s1043_s0 + $0x58] sm:$0xff]  ;;  %v24_v24 = vld [vmem:[%s1043_s0 + $0x20] sm:$0xff]  ;;  %v33_v27 = vld [vmem:[%s1043_s0 + $0x68] sm:$0xff] }
   0xa   :  { %523 = vmatprep.subr.mxu0 %v47_v4  ;;  %575 = vmatprep.subr.mxu1 %v47_v4  ;;  %v32_v25 = vld [vmem:[%s1043_s0 + $0x60] sm:$0xff]  ;;  %v26_v28 = vld [vmem:[%s1043_s0 + $0x30] sm:$0xff]  ;;  %v27_v30 = vld [vmem:[%s1043_s0 + $0x38] sm:$0xff] }
   0xb   :  { %524 = vmatpush3.msra.mxu0 %v47_v4  ;;  %591 = vmatpush3.msra.mxu1 %v47_v4  ;;  %v34_v29 = vld [vmem:[%s1043_s0 + $0x70] sm:$0xff]  ;;  %v35_v31 = vld [vmem:[%s1043_s0 + $0x78] sm:$0xff]  ;;  %v480_v32 = vld [vmem:[%s1044_s2] ss:$0 sm:$0xff] }
   0xc   :  { %525 = vmatprep.subr.mxu0 %v46_v5  ;;  %576 = vmatprep.subr.mxu1 %v46_v5 }
   0xd   :  { %526 = vmatpush3.msra.mxu0 %v46_v5  ;;  %592 = vmatpush3.msra.mxu1 %v46_v5 }
   0xe   :  { %527 = vmatprep.subr.mxu0 %v45_v6  ;;  %577 = vmatprep.subr.mxu1 %v45_v6 }
   0xf   :  { %528 = vmatpush3.msra.mxu0 %v45_v6  ;;  %593 = vmatpush3.msra.mxu1 %v45_v6 }
  0x10   :  { %529 = vmatprep.subr.mxu0 %v44_v7  ;;  %578 = vmatprep.subr.mxu1 %v44_v7 }
  0x11   :  { %530 = vmatpush3.msra.mxu0 %v44_v7  ;;  %594 = vmatpush3.msra.mxu1 %v44_v7 }
  0x12   :  { %531 = vmatprep.subr.mxu0 %v43_v8  ;;  %579 = vmatprep.subr.mxu1 %v43_v8 }
  0x13   :  { %532 = vmatpush3.msra.mxu0 %v43_v8  ;;  %595 = vmatpush3.msra.mxu1 %v43_v8 }
  0x14   :  { %533 = vmatprep.subr.mxu0 %v42_v9  ;;  %580 = vmatprep.subr.mxu1 %v42_v9 }
  0x15   :  { %534 = vmatpush3.msra.mxu0 %v42_v9  ;;  %596 = vmatpush3.msra.mxu1 %v42_v9 }
  0x16   :  { %535 = vmatprep.subr.mxu0 %v41_v10  ;;  %581 = vmatprep.subr.mxu1 %v41_v10 }
  0x17   :  { %536 = vmatpush3.msra.mxu0 %v41_v10  ;;  %597 = vmatpush3.msra.mxu1 %v41_v10 }
  0x18   :  { %537 = vmatprep.subr.mxu0 %v40_v11  ;;  %582 = vmatprep.subr.mxu1 %v40_v11 }
  0x19   :  { %538 = vmatpush3.msra.mxu0 %v40_v11  ;;  %598 = vmatpush3.msra.mxu1 %v40_v11 }
  0x1a   :  { %539 = vmatprep.subr.mxu0 %v39_v12  ;;  %583 = vmatprep.subr.mxu1 %v39_v12 }
  0x1b   :  { %540 = vmatpush3.msra.mxu0 %v39_v12  ;;  %599 = vmatpush3.msra.mxu1 %v39_v12 }
  0x1c   :  { %541 = vmatprep.subr.mxu0 %v38_v13  ;;  %584 = vmatprep.subr.mxu1 %v38_v13 }
  0x1d   :  { %542 = vmatpush3.msra.mxu0 %v38_v13  ;;  %600 = vmatpush3.msra.mxu1 %v38_v13 }
  0x1e   :  { %543 = vmatprep.subr.mxu0 %v37_v14  ;;  %585 = vmatprep.subr.mxu1 %v37_v14 }
  0x1f   :  { %544 = vmatpush3.msra.mxu0 %v37_v14  ;;  %601 = vmatpush3.msra.mxu1 %v37_v14 }
  0x20   :  { %545 = vmatprep.subr.mxu0 %v36_v15  ;;  %586 = vmatprep.subr.mxu1 %v36_v15 }
  0x21   :  { %546 = vmatpush3.msra.mxu0 %v36_v15  ;;  %602 = vmatpush3.msra.mxu1 %v36_v15 }
  0x22   :  { %547 = vmatprep.mubr.f32.mxu0 %v20_v16  ;;  %559 = vmatprep.mubr.f32.mxu1 %v28_v17 }
  0x23   :  { %548 = vmatmul.mubr.f32.vlgmr.msra.gmra.mxu0 %v21_v18  ;;  %560 = vmatmul.mubr.f32.vlgmr.msra.gmra.mxu1 %v29_v19 }
  0x24   :  { %550 = vmatprep.mubr.f32.mxu0 %v22_v20  ;;  %562 = vmatprep.mubr.f32.mxu1 %v30_v21 }
  0x27   :  { %551 = vmatmul.mubr.f32.gmra.mxu0 %v23_v22  ;;  %563 = vmatmul.mubr.f32.gmra.mxu1 %v31_v23 }
  0x28   :  { %553 = vmatprep.mubr.f32.mxu0 %v24_v24  ;;  %565 = vmatprep.mubr.f32.mxu1 %v32_v25 }
  0x2b   :  { %554 = vmatmul.mubr.f32.gmra.mxu0 %v25_v26  ;;  %566 = vmatmul.mubr.f32.gmra.mxu1 %v33_v27 }
  0x2c   :  { %556 = vmatprep.mubr.f32.mxu0 %v26_v28  ;;  %568 = vmatprep.mubr.f32.mxu1 %v34_v29 }
  0x2f   :  { %557 = vmatmul.mubr.f32.gmra.mxu0 %v27_v30  ;;  %569 = vmatmul.mubr.f32.gmra.mxu1 %v35_v31 }
  0xe3   :  { %v549_v33 = vpop.f32.mrf.mxu0  ;;  %v561_v34 = vpop.f32.mrf.mxu1 }
  0xe4   :  { %v764_v35 = vadd.f32 %v549_v33, %v480_v32  ;;  %v766_v36 = vadd.f32 %v561_v34, %v480_v32 }
  0xe5   :  { %v125_v37 = vpop.f32.mrf.mxu0  ;;  %v165_v38 = vpop.f32.mrf.mxu1 }
  0xe6   :  { %v768_v39 = vadd.f32 %v480_v32, %v125_v37  ;;  %v232_v40 = vsel %vm204_vm0, %v766_v36, 0.0  ;;  %v208_v41 = vsel %vm204_vm0, %v764_v35, 0.0  ;;  %v776_v47 = vadd.f32 %v480_v32, %v165_v38 }
  0xe7   :  { %233 = vadd.xlane.f32.xlu1 %v232_v40  ;;  %209 = vadd.xlane.f32.xlu0 %v208_v41  ;;  %v552_v42 = vpop.f32.mrf.mxu0  ;;  %v564_v43 = vpop.f32.mrf.mxu1 }
  0xe8   :  { %v141_v44 = vadd.f32 %v552_v42, %v480_v32  ;;  %v774_v45 = vadd.f32 %v564_v43, %v480_v32  ;;  %v205_v49 = vsel %vm204_vm0, %v768_v39, 0.0  ;;  %v229_v57 = vsel %vm204_vm0, %v776_v47, 0.0 }
  0xe9   :  { %v135_v46 = vpop.f32.mrf.mxu0  ;;  %v175_v50 = vpop.f32.mrf.mxu1 }
  0xea   :  { %v214_v48 = vsel %vm204_vm0, %v141_v44, 0.0  ;;  %v238_v52 = vsel %vm204_vm0, %v774_v45, 0.0  ;;  %v783_v55 = vadd.f32 %v480_v32, %v135_v46  ;;  %v785_v56 = vadd.f32 %v480_v32, %v175_v50 }
  0xeb   :  { %215 = vadd.xlane.f32.xlu1 %v214_v48  ;;  %206 = vadd.xlane.f32.xlu0 %v205_v49  ;;  %v555_v51 = vpop.f32.mrf.mxu0  ;;  %v567_v54 = vpop.f32.mrf.mxu1 }
  0xec   :  { %v789_v58 = vadd.f32 %v555_v51, %v480_v32  ;;  %v211_v62 = vsel %vm204_vm0, %v783_v55, 0.0  ;;  %v235_v63 = vsel %vm204_vm0, %v785_v56, 0.0  ;;  %v797_v0 = vadd.f32 %v567_v54, %v480_v32 }
  0xed   :  { %v145_v53 = vpop.f32.mrf.mxu0  ;;  %v185_v60 = vpop.f32.mrf.mxu1 }
  0xee   :  { %v791_v59 = vadd.f32 %v480_v32, %v145_v53  ;;  %v799_v1 = vadd.f32 %v480_v32, %v185_v60  ;;  %v220_v2 = vsel %vm204_vm0, %v789_v58, 0.0  ;;  %v244_v8 = vsel %vm204_vm0, %v797_v0, 0.0 }
  0xef   :  { %239 = vadd.xlane.f32.xlu1 %v238_v52  ;;  %230 = vadd.xlane.f32.xlu0 %v229_v57  ;;  %v558_v61 = vpop.f32.mrf.mxu0  ;;  %v570_v5 = vpop.f32.mrf.mxu1 }
  0xf0   :  { %v217_v3 = vsel %vm204_vm0, %v791_v59, 0.0  ;;  %v805_v6 = vadd.f32 %v558_v61, %v480_v32  ;;  %v241_v9 = vsel %vm204_vm0, %v799_v1, 0.0  ;;  %v813_v11 = vadd.f32 %v570_v5, %v480_v32 }
  0xf1   :  { %v155_v4 = vpop.f32.mrf.mxu0  ;;  %v195_v10 = vpop.f32.mrf.mxu1 }
  0xf2   :  { %v807_v7 = vadd.f32 %v480_v32, %v155_v4  ;;  %v815_v12 = vadd.f32 %v480_v32, %v195_v10  ;;  %v226_v13 = vsel %vm204_vm0, %v805_v6, 0.0  ;;  %v250_v15 = vsel %vm204_vm0, %v813_v11, 0.0 }
  0xf3   :  { %212 = vadd.xlane.f32.xlu1 %v211_v62  ;;  %236 = vadd.xlane.f32.xlu0 %v235_v63 }
  0xf4   :  { %v223_v14 = vsel %vm204_vm0, %v807_v7, 0.0  ;;  %v247_v16 = vsel %vm204_vm0, %v815_v12, 0.0 }
  0xf7   :  { %221 = vadd.xlane.f32.xlu1 %v220_v2  ;;  %218 = vadd.xlane.f32.xlu0 %v217_v3 }
  0xfb   :  { %245 = vadd.xlane.f32.xlu1 %v244_v8  ;;  %242 = vadd.xlane.f32.xlu0 %v241_v9 }
  0xff   :  { %227 = vadd.xlane.f32.xlu1 %v226_v13  ;;  %224 = vadd.xlane.f32.xlu0 %v223_v14 }
 0x103   :  { %251 = vadd.xlane.f32.xlu1 %v250_v15  ;;  %248 = vadd.xlane.f32.xlu0 %v247_v16 }
 0x170   :  { %v234_v17 = vpop.xlane.xlu1 %233  ;;  %v210_v18 = vpop.xlane.xlu0 %209 }
 0x171   :  { %v263_v19 = vmul.f32 0.03125, %v234_v17  ;;  %v255_v20 = vmul.f32 0.03125, %v210_v18 }
 0x173   :  { %v826_v21 = vsub.f32 %v766_v36, %v263_v19  ;;  %v829_v22 = vsub.f32 %v764_v35, %v255_v20 }
 0x174   :  { %v216_v23 = vpop.xlane.xlu1 %215  ;;  %v207_v24 = vpop.xlane.xlu0 %206 }
 0x175   :  { %v257_v25 = vmul.f32 0.03125, %v216_v23  ;;  %v254_v26 = vmul.f32 0.03125, %v207_v24  ;;  %v287_v27 = vmul.f32 %v829_v22, %v829_v22  ;;  %v295_v31 = vmul.f32 %v826_v21, %v826_v21 }
 0x177   :  { %v833_v28 = vsub.f32 %v141_v44, %v257_v25  ;;  %v836_v29 = vsub.f32 %v768_v39, %v254_v26  ;;  %v305_v30 = vsel %vm204_vm0, %v287_v27, 0.0  ;;  %v329_v40 = vsel %vm204_vm0, %v295_v31, 0.0 }
 0x178   :  { %v240_v32 = vpop.xlane.xlu1 %239  ;;  %306 = vadd.xlane.f32.xlu1 %v305_v30  ;;  %v231_v33 = vpop.xlane.xlu0 %230 }
 0x179   :  { %v265_v34 = vmul.f32 0.03125, %v240_v32  ;;  %v262_v35 = vmul.f32 0.03125, %v231_v33  ;;  %v286_v36 = vmul.f32 %v836_v29, %v836_v29  ;;  %v289_v37 = vmul.f32 %v833_v28, %v833_v28 }
 0x17b   :  { %v846_v38 = vsub.f32 %v774_v45, %v265_v34  ;;  %v849_v39 = vsub.f32 %v776_v47, %v262_v35  ;;  %v302_v41 = vsel %vm204_vm0, %v286_v36, 0.0  ;;  %v311_v49 = vsel %vm204_vm0, %v289_v37, 0.0 }
 0x17c   :  { %330 = vadd.xlane.f32.xlu1 %v329_v40  ;;  %v213_v42 = vpop.xlane.xlu1 %212  ;;  %303 = vadd.xlane.f32.xlu0 %v302_v41  ;;  %v237_v43 = vpop.xlane.xlu0 %236 }
 0x17d   :  { %v256_v44 = vmul.f32 0.03125, %v213_v42  ;;  %v264_v46 = vmul.f32 0.03125, %v237_v43  ;;  %v294_v48 = vmul.f32 %v849_v39, %v849_v39  ;;  %v297_v51 = vmul.f32 %v846_v38, %v846_v38 }
 0x17f   :  { %v857_v45 = vsub.f32 %v783_v55, %v256_v44  ;;  %v860_v47 = vsub.f32 %v785_v56, %v264_v46  ;;  %v326_v50 = vsel %vm204_vm0, %v294_v48, 0.0  ;;  %v335_v62 = vsel %vm204_vm0, %v297_v51, 0.0 }
 0x180   :  { %312 = vadd.xlane.f32.xlu1 %v311_v49  ;;  %v222_v52 = vpop.xlane.xlu1 %221  ;;  %327 = vadd.xlane.f32.xlu0 %v326_v50  ;;  %v219_v53 = vpop.xlane.xlu0 %218 }
 0x181   :  { %v259_v54 = vmul.f32 0.03125, %v222_v52  ;;  %v258_v57 = vmul.f32 0.03125, %v219_v53  ;;  %v288_v60 = vmul.f32 %v857_v45, %v857_v45  ;;  %v296_v55 = vmul.f32 %v860_v47, %v860_v47 }
 0x183   :  { %v870_v56 = vsub.f32 %v789_v58, %v259_v54  ;;  %v873_v61 = vsub.f32 %v791_v59, %v258_v57  ;;  %v308_v63 = vsel %vm204_vm0, %v288_v60, 0.0  ;;  %v332_v9 = vsel %vm204_vm0, %v296_v55, 0.0 }
 0x184   :  { %336 = vadd.xlane.f32.xlu1 %v335_v62  ;;  %v246_v2 = vpop.xlane.xlu1 %245  ;;  %309 = vadd.xlane.f32.xlu0 %v308_v63  ;;  %v243_v3 = vpop.xlane.xlu0 %242 }
 0x185   :  { %v267_v4 = vmul.f32 0.03125, %v246_v2  ;;  %v266_v5 = vmul.f32 0.03125, %v243_v3  ;;  %v291_v8 = vmul.f32 %v870_v56, %v870_v56  ;;  %v290_v13 = vmul.f32 %v873_v61, %v873_v61 }
 0x187   :  { %v881_v58 = vsub.f32 %v797_v0, %v267_v4  ;;  %v884_v59 = vsub.f32 %v799_v1, %v266_v5  ;;  %v317_v10 = vsel %vm204_vm0, %v291_v8, 0.0  ;;  %v314_v23 = vsel %vm204_vm0, %v290_v13, 0.0  ;;  %v923_v13 = vld [vmem:[%s1045_s3] ss:$0 sm:$0xff] }
 0x188   :  { %318 = vadd.xlane.f32.xlu1 %v317_v10  ;;  %v228_v14 = vpop.xlane.xlu1 %227  ;;  %333 = vadd.xlane.f32.xlu0 %v332_v9  ;;  %v225_v15 = vpop.xlane.xlu0 %224 }
 0x189   :  { %v261_v16 = vmul.f32 0.03125, %v228_v14  ;;  %v260_v17 = vmul.f32 0.03125, %v225_v15  ;;  %v299_v18 = vmul.f32 %v881_v58, %v881_v58  ;;  %v298_v0 = vmul.f32 %v884_v59, %v884_v59 }
 0x18b   :  { %v894_v1 = vsub.f32 %v805_v6, %v261_v16  ;;  %v897_v19 = vsub.f32 %v807_v7, %v260_v17  ;;  %v341_v20 = vsel %vm204_vm0, %v299_v18, 0.0  ;;  %v338_v31 = vsel %vm204_vm0, %v298_v0, 0.0  ;;  %v929_v17 = vld [vmem:[%s1046_s4] ss:$0 sm:$0xff] }
 0x18c   :  { %342 = vadd.xlane.f32.xlu1 %v341_v20  ;;  %v252_v24 = vpop.xlane.xlu1 %251  ;;  %315 = vadd.xlane.f32.xlu0 %v314_v23  ;;  %v249_v25 = vpop.xlane.xlu0 %248 }
 0x18d   :  { %v269_v26 = vmul.f32 0.03125, %v252_v24  ;;  %v268_v27 = vmul.f32 0.03125, %v249_v25  ;;  %v293_v30 = vmul.f32 %v894_v1, %v894_v1  ;;  %v292_v33 = vmul.f32 %v897_v19, %v897_v19 }
 0x18f   :  { %v905_v6 = vsub.f32 %v813_v11, %v269_v26  ;;  %v908_v7 = vsub.f32 %v815_v12, %v268_v27  ;;  %v323_v32 = vsel %vm204_vm0, %v293_v30, 0.0  ;;  %v320_v36 = vsel %vm204_vm0, %v292_v33, 0.0 }
 0x190   :  { %324 = vadd.xlane.f32.xlu1 %v323_v32  ;;  %339 = vadd.xlane.f32.xlu0 %v338_v31 }
 0x191   :  { %v301_v34 = vmul.f32 %v905_v6, %v905_v6  ;;  %v300_v11 = vmul.f32 %v908_v7, %v908_v7 }
 0x193   :  { %v347_v35 = vsel %vm204_vm0, %v301_v34, 0.0  ;;  %v344_v12 = vsel %vm204_vm0, %v300_v11, 0.0 }
 0x194   :  { %348 = vadd.xlane.f32.xlu1 %v347_v35  ;;  %321 = vadd.xlane.f32.xlu0 %v320_v36 }
 0x198   :  { %345 = vadd.xlane.f32.xlu0 %v344_v12 }
 0x201   :  { %v307_v37 = vpop.xlane.xlu1 %306 }
 0x202   :  { %v351_v40 = vmul.f32 0.03125, %v307_v37 }
 0x204   :  { %v367_v41 = vadd.f32 1e-06, %v351_v40 }
 0x205   :  { %v331_v42 = vpop.xlane.xlu1 %330  ;;  %v304_v43 = vpop.xlane.xlu0 %303 }
 0x206   :  { %603 = vrsqrt.f32 %v367_v41  ;;  %v359_v44 = vmul.f32 0.03125, %v331_v42  ;;  %v350_v46 = vmul.f32 0.03125, %v304_v43 }
 0x208   :  { %v375_v48 = vadd.f32 1e-06, %v359_v44  ;;  %v366_v49 = vadd.f32 1e-06, %v350_v46 }
 0x209   :  { %v313_v50 = vpop.xlane.xlu1 %312  ;;  %v328_v51 = vpop.xlane.xlu0 %327 }
 0x20a   :  { %605 = vrsqrt.f32 %v375_v48  ;;  %v353_v52 = vmul.f32 0.03125, %v313_v50  ;;  %v358_v53 = vmul.f32 0.03125, %v328_v51 }
 0x20b   :  { %607 = vrsqrt.f32 %v366_v49 }
 0x20c   :  { %v369_v54 = vadd.f32 1e-06, %v353_v52  ;;  %v374_v57 = vadd.f32 1e-06, %v358_v53 }
 0x20d   :  { %v337_v60 = vpop.xlane.xlu1 %336  ;;  %v310_v55 = vpop.xlane.xlu0 %309 }
 0x20e   :  { %609 = vrsqrt.f32 %v369_v54  ;;  %v361_v62 = vmul.f32 0.03125, %v337_v60  ;;  %v352_v63 = vmul.f32 0.03125, %v310_v55 }
 0x20f   :  { %611 = vrsqrt.f32 %v374_v57 }
 0x210   :  { %v377_v2 = vadd.f32 1e-06, %v361_v62  ;;  %v368_v3 = vadd.f32 1e-06, %v352_v63 }
 0x211   :  { %v319_v4 = vpop.xlane.xlu1 %318  ;;  %v334_v5 = vpop.xlane.xlu0 %333 }
 0x212   :  { %613 = vrsqrt.f32 %v377_v2  ;;  %v355_v8 = vmul.f32 0.03125, %v319_v4  ;;  %v360_v9 = vmul.f32 0.03125, %v334_v5 }
 0x213   :  { %v604_v10 = vpop.eup %603  ;;  %615 = vrsqrt.f32 %v368_v3 }
 0x214   :  { %v399_v14 = vmul.f32 %v604_v10, %v829_v22  ;;  %v371_v15 = vadd.f32 1e-06, %v355_v8  ;;  %v376_v16 = vadd.f32 1e-06, %v360_v9 }
 0x215   :  { %v343_v18 = vpop.xlane.xlu1 %342  ;;  %v316_v0 = vpop.xlane.xlu0 %315 }
 0x216   :  { %v422_v20 = vmul.f32 %v923_v13, %v399_v14  ;;  %617 = vrsqrt.f32 %v371_v15  ;;  %v363_v23 = vmul.f32 0.03125, %v343_v18  ;;  %v354_v24 = vmul.f32 0.03125, %v316_v0 }
 0x217   :  { %v606_v25 = vpop.eup %605  ;;  %619 = vrsqrt.f32 %v376_v16 }
 0x218   :  { %v608_v26 = vpop.eup %607  ;;  %v445_v27 = vadd.f32 %v929_v17, %v422_v20  ;;  %v407_v22 = vmul.f32 %v606_v25, %v826_v21  ;;  %v379_v30 = vadd.f32 1e-06, %v363_v23  ;;  %v370_v31 = vadd.f32 1e-06, %v354_v24 }
 0x219   :  { %v398_v32 = vmul.f32 %v608_v26, %v836_v29  ;;  %v325_v33 = vpop.xlane.xlu1 %324  ;;  %v340_v34 = vpop.xlane.xlu0 %339 }
 0x21a   :  { %461 = vst.msk [vmem:[%s1047_s5 + $0x8] sm:$0xff] %vm204_vm0, %v445_v27  ;;  %v430_v35 = vmul.f32 %v923_v13, %v407_v22  ;;  %621 = vrsqrt.f32 %v379_v30  ;;  %v357_v36 = vmul.f32 0.03125, %v325_v33  ;;  %v362_v11 = vmul.f32 0.03125, %v340_v34 }
 0x21b   :  { %v610_v12 = vpop.eup %609  ;;  %v421_v37 = vmul.f32 %v923_v13, %v398_v32  ;;  %623 = vrsqrt.f32 %v370_v31 }
 0x21c   :  { %v612_v21 = vpop.eup %611  ;;  %v453_v40 = vadd.f32 %v929_v17, %v430_v35  ;;  %v401_v29 = vmul.f32 %v610_v12, %v833_v28  ;;  %v373_v41 = vadd.f32 1e-06, %v357_v36  ;;  %v378_v42 = vadd.f32 1e-06, %v362_v11 }
 0x21d   :  { %v444_v43 = vadd.f32 %v929_v17, %v421_v37  ;;  %v406_v44 = vmul.f32 %v612_v21, %v849_v39  ;;  %v349_v46 = vpop.xlane.xlu1 %348  ;;  %v322_v48 = vpop.xlane.xlu0 %321 }
 0x21e   :  { %469 = vst.msk [vmem:[%s1047_s5 + $0x48] sm:$0xff] %vm204_vm0, %v453_v40  ;;  %v424_v49 = vmul.f32 %v923_v13, %v401_v29  ;;  %625 = vrsqrt.f32 %v373_v41  ;;  %v365_v50 = vmul.f32 0.03125, %v349_v46  ;;  %v356_v51 = vmul.f32 0.03125, %v322_v48 }
 0x21f   :  { %v614_v52 = vpop.eup %613  ;;  %460 = vst.msk [vmem:[%s1047_s5] sm:$0xff] %vm204_vm0, %v444_v43  ;;  %v429_v28 = vmul.f32 %v923_v13, %v406_v44  ;;  %627 = vrsqrt.f32 %v378_v42 }
 0x220   :  { %v616_v39 = vpop.eup %615  ;;  %v447_v53 = vadd.f32 %v929_v17, %v424_v49  ;;  %v409_v54 = vmul.f32 %v614_v52, %v846_v38  ;;  %v381_v57 = vadd.f32 1e-06, %v365_v50  ;;  %v372_v60 = vadd.f32 1e-06, %v356_v51 }
 0x221   :  { %v452_v55 = vadd.f32 %v929_v17, %v429_v28  ;;  %v400_v62 = vmul.f32 %v616_v39, %v857_v45  ;;  %v346_v63 = vpop.xlane.xlu0 %345 }
 0x222   :  { %463 = vst.msk [vmem:[%s1047_s5 + $0x18] sm:$0xff] %vm204_vm0, %v447_v53  ;;  %v432_v2 = vmul.f32 %v923_v13, %v409_v54  ;;  %629 = vrsqrt.f32 %v381_v57  ;;  %v364_v3 = vmul.f32 0.03125, %v346_v63 }
 0x223   :  { %v618_v4 = vpop.eup %617  ;;  %468 = vst.msk [vmem:[%s1047_s5 + $0x40] sm:$0xff] %vm204_vm0, %v452_v55  ;;  %v423_v38 = vmul.f32 %v923_v13, %v400_v62  ;;  %631 = vrsqrt.f32 %v372_v60 }
 0x224   :  { %v620_v45 = vpop.eup %619  ;;  %v455_v5 = vadd.f32 %v929_v17, %v432_v2  ;;  %v403_v8 = vmul.f32 %v618_v4, %v870_v56  ;;  %v380_v9 = vadd.f32 1e-06, %v364_v3 }
 0x225   :  { %v446_v10 = vadd.f32 %v929_v17, %v423_v38  ;;  %v408_v14 = vmul.f32 %v620_v45, %v860_v47 }
 0x226   :  { %471 = vst.msk [vmem:[%s1047_s5 + $0x58] sm:$0xff] %vm204_vm0, %v455_v5  ;;  %v426_v15 = vmul.f32 %v923_v13, %v403_v8  ;;  %633 = vrsqrt.f32 %v380_v9 }
 0x227   :  { %v622_v16 = vpop.eup %621  ;;  %462 = vst.msk [vmem:[%s1047_s5 + $0x10] sm:$0xff] %vm204_vm0, %v446_v10  ;;  %v431_v56 = vmul.f32 %v923_v13, %v408_v14 }
 0x228   :  { %v624_v18 = vpop.eup %623  ;;  %v449_v0 = vadd.f32 %v929_v17, %v426_v15  ;;  %v411_v47 = vmul.f32 %v622_v16, %v881_v58 }
 0x229   :  { %v454_v20 = vadd.f32 %v929_v17, %v431_v56  ;;  %v402_v23 = vmul.f32 %v624_v18, %v873_v61 }
 0x22a   :  { %465 = vst.msk [vmem:[%s1047_s5 + $0x28] sm:$0xff] %vm204_vm0, %v449_v0  ;;  %v434_v24 = vmul.f32 %v923_v13, %v411_v47 }
 0x22b   :  { %v626_v25 = vpop.eup %625  ;;  %470 = vst.msk [vmem:[%s1047_s5 + $0x50] sm:$0xff] %vm204_vm0, %v454_v20  ;;  %v425_v26 = vmul.f32 %v923_v13, %v402_v23 }
 0x22c   :  { %v628_v58 = vpop.eup %627  ;;  %v457_v27 = vadd.f32 %v929_v17, %v434_v24  ;;  %v405_v61 = vmul.f32 %v626_v25, %v894_v1 }
 0x22d   :  { %v448_v22 = vadd.f32 %v929_v17, %v425_v26  ;;  %v410_v30 = vmul.f32 %v628_v58, %v884_v59 }
 0x22e   :  { %473 = vst.msk [vmem:[%s1047_s5 + $0x68] sm:$0xff] %vm204_vm0, %v457_v27  ;;  %v428_v31 = vmul.f32 %v923_v13, %v405_v61 }
 0x22f   :  { %v630_v32 = vpop.eup %629  ;;  %464 = vst.msk [vmem:[%s1047_s5 + $0x20] sm:$0xff] %vm204_vm0, %v448_v22  ;;  %v433_v33 = vmul.f32 %v923_v13, %v410_v30 }
 0x230   :  { %v632_v1 = vpop.eup %631  ;;  %v451_v34 = vadd.f32 %v929_v17, %v428_v31  ;;  %v413_v59 = vmul.f32 %v630_v32, %v905_v6 }
 0x231   :  { %v456_v35 = vadd.f32 %v929_v17, %v433_v33  ;;  %v404_v36 = vmul.f32 %v632_v1, %v897_v19 }
 0x232   :  { %467 = vst.msk [vmem:[%s1047_s5 + $0x38] sm:$0xff] %vm204_vm0, %v451_v34  ;;  %v436_v11 = vmul.f32 %v923_v13, %v413_v59 }
 0x233   :  { %v634_v12 = vpop.eup %633  ;;  %472 = vst.msk [vmem:[%s1047_s5 + $0x60] sm:$0xff] %vm204_vm0, %v456_v35  ;;  %v427_v37 = vmul.f32 %v923_v13, %v404_v36 }
 0x234   :  { %v459_v6 = vadd.f32 %v929_v17, %v436_v11  ;;  %v412_v21 = vmul.f32 %v634_v12, %v908_v7 }
 0x235   :  { %v450_v19 = vadd.f32 %v929_v17, %v427_v37 }
 0x236   :  { %475 = vst.msk [vmem:[%s1047_s5 + $0x78] sm:$0xff] %vm204_vm0, %v459_v6  ;;  %v435_v40 = vmul.f32 %v923_v13, %v412_v21 }
 0x237   :  { %466 = vst.msk [vmem:[%s1047_s5 + $0x30] sm:$0xff] %vm204_vm0, %v450_v19 }
 0x238   :  { %v458_v29 = vadd.f32 %v929_v17, %v435_v40 }
 0x23a   :  { %474 = vst.msk [vmem:[%s1047_s5 + $0x70] sm:$0xff] %vm204_vm0, %v458_v29 }

// kernel: efficient_attention_forward.5
= control target key start
LH: loop header
LB: loop body
LE: loop exit
PB: predicated region body
PF: predicated region fallthrough
CT: control target
= control target key end

     0   :  { %s4093_s15 = smov 0   ;;  %s4095_s16 = smov 0   ;;  %s5252_s0 = inlined_call_operand.vmem [shape: f32[2,256,32], index: 0, kind: input, shape index: {}]   ;;  %s5253_s1 = inlined_call_operand.vmem [shape: f32[32,32], index: 1, kind: input, shape index: {}]   ;;  %s5254_s2 = inlined_call_operand.vmem [shape: f32[1,32], index: 2, kind: input, shape index: {}]   ;;  %s5255_s3 = inlined_call_operand.vmem [shape: f32[2,64,64], index: 3, kind: input, shape index: {}]   ;;  %s5256_s4 = inlined_call_operand.vmem [shape: f32[2,256,32], index: 4, kind: output, shape index: {}]  }
   0x1   :  { %s4097_s17 = smov 0  }
   0x2 LB: > { %s26_s18 = sadd.s32 1, %s4058_s16  ;;  %p3051_p0 = scmp.ge.s32.totalorder %s4062_s17, 1  ;;  %s4062_s17 = sphi %s4097_s17, %s14_s17   ;;  %s4058_s16 = sphi %s4095_s16, %s5315_s16   ;;  %s4054_s15 = sphi %s4093_s15, %s5314_s15  }
   0x3   : > { %p28_p1 = scmp.ge.s32.totalorder %s26_s18, 2  ;;  %p193_p2 = scmp.lt.s32.totalorder %s4062_s17, 3 }
   0x5   : > { %s5317_s18 = smov (%p28_p1, %s26_s18), 0  ;;  %p194_p3 = pnand %p3051_p0, %p193_p2 }
   0x7   : > { %197 = sbr.rel (%p194_p3) target bundleno = 1104 (0x450), region = 36 }
   0xc   : > { %v292_v0 = vld [vmem:[%s5253_s1 + $0x18] sm:$0xff]  ;;  %v291_v1 = vld [vmem:[%s5253_s1 + $0x10] sm:$0xff]  ;;  %p233_p4 = scmp.lt.s32.totalorder %s4054_s15, 1  ;;  %v290_v2 = vld [vmem:[%s5253_s1 + $0x8] sm:$0xff]  ;;  %vm300_vm0 = vcmask 261120   ;;  %vm630_vm1 = vcmask 130048  }
   0xd   : > { %3436 = vmatprep.subr.mxu0 %v292_v0  ;;  %3748 = vmatprep.subr.mxu1 %v292_v0  ;;  %v289_v3 = vld [vmem:[%s5253_s1] sm:$0xff]  ;;  %s4064_s9 = smov 112   ;;  %s4065_s12 = smov 96   ;;  %vm976_vm2 = vcmask 523264  }
   0xe   : > { %3437 = vmatpush3.msra.mxu0 %v292_v0  ;;  %s5319_s15 = smov (!%p233_p4, %s4054_s15), 1  ;;  %3752 = vmatpush3.msra.mxu1 %v292_v0  ;;  %v4279_v45 = vld [vmem:[%s5254_s2] ss:$0 sm:$0xff]  ;;  %s4066_s13 = smov 80  }
   0xf   : > { %3438 = vmatprep.subr.mxu0 %v291_v1  ;;  %3749 = vmatprep.subr.mxu1 %v291_v1  ;;  %s3237_s27 = sshll.u32 %s5319_s15, 8  ;;  %s3238_s5 = sshll.u32 %s5319_s15, 6 }
  0x10   : > { %3439 = vmatpush3.msra.mxu0 %v291_v1  ;;  %3753 = vmatpush3.msra.mxu1 %v291_v1  ;;  %s4131_s30 = scalar_lea.vmem %s5252_s0, %s3237_s27  ;;  %s4151_s8 = scalar_lea.vmem %s5255_s3, %s3238_s5 }
  0x11   : > { %3440 = vmatprep.subr.mxu0 %v290_v2  ;;  %3750 = vmatprep.subr.mxu1 %v290_v2  ;;  %v257_v4 = vld [vmem:[%s4131_s30] sm:$0xff]  ;;  %v258_v5 = vld [vmem:[%s4131_s30 + $0x8] sm:$0xff]  ;;  %v259_v6 = vld [vmem:[%s4131_s30 + $0x10] sm:$0xff]  ;;  %s4067_s14 = smov 16   ;;  %s5113_s21 = scalar_lea.vmem %s5256_s4, %s3237_s27 }
  0x12   : > { %3441 = vmatpush3.msra.mxu0 %v290_v2  ;;  %3754 = vmatpush3.msra.mxu1 %v290_v2  ;;  %v260_v7 = vld [vmem:[%s4131_s30 + $0x18] sm:$0xff]  ;;  %v261_v8 = vld [vmem:[%s4131_s30 + $0x20] sm:$0xff]  ;;  %v274_v10 = vld [vmem:[%s4131_s30 + $0x88] sm:$0xff] }
  0x13   : > { %3442 = vmatprep.subr.mxu0 %v289_v3  ;;  %3444 = vmatprep.mubr.msk.f32.mxu0 %vm300_vm0, %v257_v4  ;;  %v273_v9 = vld [vmem:[%s4131_s30 + $0x80] sm:$0xff]  ;;  %v275_v11 = vld [vmem:[%s4131_s30 + $0x90] sm:$0xff]  ;;  %v262_v12 = vld [vmem:[%s4131_s30 + $0x28] sm:$0xff] }
  0x14   : > { %3443 = vmatpush3.msra.mxu0 %v289_v3  ;;  %3751 = vmatprep.subr.mxu1 %v289_v3  ;;  %v276_v13 = vld [vmem:[%s4131_s30 + $0x98] sm:$0xff]  ;;  %v263_v14 = vld [vmem:[%s4131_s30 + $0x30] sm:$0xff]  ;;  %v277_v15 = vld [vmem:[%s4131_s30 + $0xa0] sm:$0xff] }
  0x15   : > { %3445 = vmatmul.mubr.msk.f32.vlgmr.msra.gmra.mxu0 %vm300_vm0, %v258_v5  ;;  %3755 = vmatpush3.msra.mxu1 %v289_v3  ;;  %v4160_v16 = vld [vmem:[%s4151_s8 + $0x38] sm:$0xff]  ;;  %v4165_v17 = vld [vmem:[%s4151_s8 + $0x28] sm:$0xff]  ;;  %v265_v20 = vld [vmem:[%s4131_s30 + $0x40] sm:$0xff] }
  0x16   : > { %3447 = vmatprep.mubr.msk.f32.mxu0 %vm300_vm0, %v259_v6  ;;  %3468 = vmatprep.mubr.msk.f32.mxu1 %vm300_vm0, %v273_v9  ;;  %v264_v18 = vld [vmem:[%s4131_s30 + $0x38] sm:$0xff]  ;;  %v278_v19 = vld [vmem:[%s4131_s30 + $0xa8] sm:$0xff]  ;;  %v279_v21 = vld [vmem:[%s4131_s30 + $0xb0] sm:$0xff] }
  0x17   : > { %3469 = vmatmul.mubr.msk.f32.vlgmr.msra.gmra.mxu1 %vm300_vm0, %v274_v10  ;;  %1752 = vrot.lane.b32.xlu0 %v4160_v16, %s4064_s9  ;;  %v4178_v22 = vld [vmem:[%s4151_s8 + $0x30] sm:$0xff]  ;;  %v4181_v23 = vld [vmem:[%s4151_s8 + $0x20] sm:$0xff]  ;;  %v266_v24 = vld [vmem:[%s4131_s30 + $0x48] sm:$0xff] }
  0x18   : > { %3471 = vmatprep.mubr.msk.f32.mxu1 %vm300_vm0, %v275_v11  ;;  %1748 = vrot.lane.b32.xlu1 %v4165_v17, %s4064_s9  ;;  %v280_v25 = vld [vmem:[%s4131_s30 + $0xb8] sm:$0xff]  ;;  %v267_v26 = vld [vmem:[%s4131_s30 + $0x50] sm:$0xff]  ;;  %v281_v27 = vld [vmem:[%s4131_s30 + $0xc0] sm:$0xff] }
  0x19   : > { %3448 = vmatmul.mubr.msk.f32.gmra.mxu0 %vm300_vm0, %v260_v7  ;;  %3492 = vmatprep.subr.msk.mxu1 %vm630_vm1, %v4160_v16  ;;  %v4198_v28 = vld [vmem:[%s4151_s8 + $0x18] sm:$0xff]  ;;  %v4205_v29 = vld [vmem:[%s4151_s8 + $0x10] sm:$0xff]  ;;  %v282_v31 = vld [vmem:[%s4131_s30 + $0xc8] sm:$0xff] }
  0x1a   : > { %3450 = vmatprep.mubr.msk.f32.mxu0 %vm300_vm0, %v261_v8  ;;  %3493 = vmatpush3.xpose.msk.msra.mxu1 %vm630_vm1, %v4160_v16  ;;  %v268_v30 = vld [vmem:[%s4131_s30 + $0x58] sm:$0xff]  ;;  %v269_v32 = vld [vmem:[%s4131_s30 + $0x60] sm:$0xff]  ;;  %v283_v33 = vld [vmem:[%s4131_s30 + $0xd0] sm:$0xff] }
  0x1b   : > { %3472 = vmatmul.mubr.msk.f32.gmra.mxu1 %vm300_vm0, %v276_v13  ;;  %1750 = vrot.lane.b32.xlu0 %v4178_v22, %s4064_s9  ;;  %v4222_v34 = vld [vmem:[%s4151_s8 + $0x8] sm:$0xff]  ;;  %v4227_v35 = vld [vmem:[%s4151_s8] sm:$0xff]  ;;  %v284_v37 = vld [vmem:[%s4131_s30 + $0xd8] sm:$0xff] }
  0x1c   : > { %3474 = vmatprep.mubr.msk.f32.mxu1 %vm300_vm0, %v277_v15  ;;  %1746 = vrot.lane.b32.xlu1 %v4181_v23, %s4064_s9  ;;  %v270_v36 = vld [vmem:[%s4131_s30 + $0x68] sm:$0xff]  ;;  %v271_v38 = vld [vmem:[%s4131_s30 + $0x70] sm:$0xff]  ;;  %v285_v39 = vld [vmem:[%s4131_s30 + $0xe0] sm:$0xff] }
  0x1d   : > { %3451 = vmatmul.mubr.msk.f32.gmra.mxu0 %vm300_vm0, %v262_v12  ;;  %3494 = vmatprep.subr.msk.mxu1 %vm630_vm1, %v4178_v22  ;;  %v272_v40 = vld [vmem:[%s4131_s30 + $0x78] sm:$0xff]  ;;  %v286_v41 = vld [vmem:[%s4131_s30 + $0xe8] sm:$0xff]  ;;  %v287_v42 = vld [vmem:[%s4131_s30 + $0xf0] sm:$0xff] }
  0x1e   : > { %3453 = vmatprep.mubr.msk.f32.mxu0 %vm300_vm0, %v263_v14  ;;  %3495 = vmatpush3.xpose.msk.msra.mxu1 %vm630_vm1, %v4178_v22  ;;  %v288_v43 = vld [vmem:[%s4131_s30 + $0xf8] sm:$0xff] }
  0x1f   : > { %3475 = vmatmul.mubr.msk.f32.gmra.mxu1 %vm300_vm0, %v278_v19  ;;  %1744 = vrot.lane.b32.xlu0 %v4198_v28, %s4064_s9 }
  0x20   : > { %3477 = vmatprep.mubr.msk.f32.mxu1 %vm300_vm0, %v279_v21  ;;  %1742 = vrot.lane.b32.xlu1 %v4205_v29, %s4064_s9 }
  0x21   : > { %3454 = vmatmul.mubr.msk.f32.gmra.mxu0 %vm300_vm0, %v264_v18  ;;  %3496 = vmatprep.subr.msk.mxu1 %vm630_vm1, %v4165_v17 }
  0x22   : > { %3456 = vmatprep.mubr.msk.f32.mxu0 %vm300_vm0, %v265_v20  ;;  %3497 = vmatpush3.xpose.msk.msra.mxu1 %vm630_vm1, %v4165_v17 }
  0x23   : > { %3478 = vmatmul.mubr.msk.f32.gmra.mxu1 %vm300_vm0, %v280_v25  ;;  %1740 = vrot.lane.b32.xlu0 %v4222_v34, %s4064_s9 }
  0x24   : > { %3480 = vmatprep.mubr.msk.f32.mxu1 %vm300_vm0, %v281_v27  ;;  %1738 = vrot.lane.b32.xlu1 %v4227_v35, %s4064_s9 }
  0x25   : > { %3457 = vmatmul.mubr.msk.f32.gmra.mxu0 %vm300_vm0, %v266_v24  ;;  %3498 = vmatprep.subr.msk.mxu1 %vm630_vm1, %v4181_v23 }
  0x26   : > { %3459 = vmatprep.mubr.msk.f32.mxu0 %vm300_vm0, %v267_v26  ;;  %3499 = vmatpush3.xpose.msk.msra.mxu1 %vm630_vm1, %v4181_v23 }
  0x27   : > { %3481 = vmatmul.mubr.msk.f32.gmra.mxu1 %vm300_vm0, %v282_v31  ;;  %3500 = vmatprep.subr.msk.mxu1 %vm630_vm1, %v4198_v28 }
  0x28   : > { %3483 = vmatprep.mubr.msk.f32.mxu1 %vm300_vm0, %v283_v33 }
  0x29   : > { %3460 = vmatmul.mubr.msk.f32.gmra.mxu0 %vm300_vm0, %v268_v30 }
  0x2a   : > { %3462 = vmatprep.mubr.msk.f32.mxu0 %vm300_vm0, %v269_v32  ;;  %3501 = vmatpush3.xpose.msk.msra.mxu1 %vm630_vm1, %v4198_v28 }
  0x2b   : > { %3484 = vmatmul.mubr.msk.f32.gmra.mxu1 %vm300_vm0, %v284_v37  ;;  %3502 = vmatprep.subr.msk.mxu1 %vm630_vm1, %v4205_v29 }
  0x2c   : > { %3486 = vmatprep.mubr.msk.f32.mxu1 %vm300_vm0, %v285_v39 }
  0x2d   : > { %3463 = vmatmul.mubr.msk.f32.gmra.mxu0 %vm300_vm0, %v270_v36 }
  0x2e   : > { %3465 = vmatprep.mubr.msk.f32.mxu0 %vm300_vm0, %v271_v38  ;;  %3503 = vmatpush3.xpose.msk.msra.mxu1 %vm630_vm1, %v4205_v29 }
  0x2f   : > { %3487 = vmatmul.mubr.msk.f32.gmra.mxu1 %vm300_vm0, %v286_v41  ;;  %3504 = vmatprep.subr.msk.mxu1 %vm630_vm1, %v4222_v34 }
  0x30   : > { %3489 = vmatprep.mubr.msk.f32.mxu1 %vm300_vm0, %v287_v42 }
  0x31   : > { %3466 = vmatmul.mubr.msk.f32.gmra.mxu0 %vm300_vm0, %v272_v40 }
  0x32   : > { %3505 = vmatpush3.xpose.msk.msra.mxu1 %vm630_vm1, %v4222_v34 }
  0x33   : > { %3490 = vmatmul.mubr.msk.f32.gmra.mxu1 %vm300_vm0, %v288_v43  ;;  %3506 = vmatprep.subr.msk.mxu1 %vm630_vm1, %v4227_v35 }
  0x36   : > { %3507 = vmatpush3.xpose.msk.msra.mxu1 %vm630_vm1, %v4227_v35 }
  0x89   : > { %v1753_v44 = vpop.permute.xlu0 %1752 }
  0x8a   : > { %3620 = vmatprep.subr.msk.mxu1 %vm630_vm1, %v1753_v44  ;;  %v1749_v56 = vpop.permute.xlu1 %1748 }
  0x8d   : > { %v1751_v52 = vpop.permute.xlu0 %1750 }
  0x8e   : > { %v1747_v1 = vpop.permute.xlu1 %1746 }
  0x91   : > { %v1745_v7 = vpop.permute.xlu0 %1744 }
  0x92   : > { %v1743_v13 = vpop.permute.xlu1 %1742 }
  0x95   : > { %v1741_v21 = vpop.permute.xlu0 %1740 }
  0x96   : > { %v1739_v37 = vpop.permute.xlu1 %1738 }
  0xd5   : > { %v3446_v46 = vpop.f32.mrf.mxu0 }
  0xd6   : > { %v469_v47 = vadd.f32 %v3446_v46, %v4279_v45 }
  0xd7   : > { %v463_v48 = vpop.f32.mrf.mxu0  ;;  %v4288_v54 = vpop.f32.mrf.mxu1 }
  0xd8   : > { %v464_v49 = vadd.f32 %v4279_v45, %v463_v48  ;;  %1676 = vrot.lane.b32.xlu1 %v469_v47, %s4064_s9  ;;  %v549_v36 = vadd.f32 %v4288_v54, %v4279_v45 }
  0xd9   : > { %v3449_v50 = vpop.f32.mrf.mxu0  ;;  %v4298_v60 = vpop.f32.mrf.mxu1 }
  0xda   : > { %v479_v51 = vadd.f32 %v3449_v50, %v4279_v45  ;;  %1674 = vrot.lane.b32.xlu0 %v464_v49, %s4064_s9  ;;  %3508 = vmatprep.mubr.msk.f32.mxu1 %vm630_vm1, %v464_v49  ;;  %v544_v39 = vadd.f32 %v4279_v45, %v4298_v60 }
  0xdb   : > { %v473_v53 = vpop.f32.mrf.mxu0  ;;  %3509 = vmatmul.mubr.msk.f32.vlgmr.msra.gmra.mxu1 %vm630_vm1, %v469_v47  ;;  %v4303_v63 = vpop.f32.mrf.mxu1 }
  0xdc   : > { %v474_v55 = vadd.f32 %v4279_v45, %v473_v53  ;;  %1680 = vrot.lane.b32.xlu1 %v479_v51, %s4064_s9  ;;  %3621 = vmatpush3.xpose.msk.msra.mxu1 %vm630_vm1, %v1753_v44  ;;  %v559_v40 = vadd.f32 %v4303_v63, %v4279_v45 }
  0xdd   : > { %v3452_v57 = vpop.f32.mrf.mxu0  ;;  %3622 = vmatprep.subr.msk.mxu1 %vm630_vm1, %v1751_v52  ;;  %v553_v5 = vpop.f32.mrf.mxu1 }
  0xde   : > { %v489_v58 = vadd.f32 %v3452_v57, %v4279_v45  ;;  %1678 = vrot.lane.b32.xlu0 %v474_v55, %s4064_s9  ;;  %3511 = vmatprep.mubr.msk.f32.mxu1 %vm630_vm1, %v474_v55  ;;  %v554_v42 = vadd.f32 %v4279_v45, %v553_v5 }
  0xdf   : > { %v483_v59 = vpop.f32.mrf.mxu0  ;;  %3512 = vmatmul.mubr.msk.f32.gmra.mxu1 %vm630_vm1, %v479_v51  ;;  %v3476_v9 = vpop.f32.mrf.mxu1 }
  0xe0   : > { %v484_v61 = vadd.f32 %v4279_v45, %v483_v59  ;;  %1684 = vrot.lane.b32.xlu1 %v489_v58, %s4064_s9  ;;  %3623 = vmatpush3.xpose.msk.msra.mxu1 %vm630_vm1, %v1751_v52  ;;  %v569_v44 = vadd.f32 %v3476_v9, %v4279_v45 }
  0xe1   : > { %v3455_v62 = vpop.f32.mrf.mxu0  ;;  %3624 = vmatprep.subr.msk.mxu1 %vm630_vm1, %v1749_v56  ;;  %v563_v15 = vpop.f32.mrf.mxu1 }
  0xe2   : > { %v499_v0 = vadd.f32 %v3455_v62, %v4279_v45  ;;  %1682 = vrot.lane.b32.xlu0 %v484_v61, %s4064_s9  ;;  %3514 = vmatprep.mubr.msk.f32.mxu1 %vm630_vm1, %v484_v61  ;;  %v564_v46 = vadd.f32 %v4279_v45, %v563_v15 }
  0xe3   : > { %v493_v2 = vpop.f32.mrf.mxu0  ;;  %3515 = vmatmul.mubr.msk.f32.gmra.mxu1 %vm630_vm1, %v489_v58  ;;  %v3479_v25 = vpop.f32.mrf.mxu1 }
  0xe4   : > { %v494_v3 = vadd.f32 %v4279_v45, %v493_v2  ;;  %1688 = vrot.lane.b32.xlu1 %v499_v0, %s4064_s9  ;;  %3625 = vmatpush3.xpose.msk.msra.mxu1 %vm630_vm1, %v1749_v56  ;;  %v579_v48 = vadd.f32 %v3479_v25, %v4279_v45 }
  0xe5   : > { %v3458_v4 = vpop.f32.mrf.mxu0  ;;  %3626 = vmatprep.subr.msk.mxu1 %vm630_vm1, %v1747_v1  ;;  %v573_v32 = vpop.f32.mrf.mxu1 }
  0xe6   : > { %v509_v6 = vadd.f32 %v3458_v4, %v4279_v45  ;;  %1686 = vrot.lane.b32.xlu0 %v494_v3, %s4064_s9  ;;  %3517 = vmatprep.mubr.msk.f32.mxu1 %vm630_vm1, %v494_v3  ;;  %v574_v50 = vadd.f32 %v4279_v45, %v573_v32 }
  0xe7   : > { %v503_v8 = vpop.f32.mrf.mxu0  ;;  %3518 = vmatmul.mubr.msk.f32.gmra.mxu1 %vm630_vm1, %v499_v0  ;;  %v3482_v38 = vpop.f32.mrf.mxu1 }
  0xe8   : > { %v504_v10 = vadd.f32 %v4279_v45, %v503_v8  ;;  %1692 = vrot.lane.b32.xlu1 %v509_v6, %s4064_s9  ;;  %3627 = vmatpush3.xpose.msk.msra.mxu1 %vm630_vm1, %v1747_v1  ;;  %v589_v51 = vadd.f32 %v3482_v38, %v4279_v45 }
  0xe9   : > { %v3461_v11 = vpop.f32.mrf.mxu0  ;;  %3628 = vmatprep.subr.msk.mxu1 %vm630_vm1, %v1745_v7  ;;  %v583_v41 = vpop.f32.mrf.mxu1 }
  0xea   : > { %v519_v12 = vadd.f32 %v3461_v11, %v4279_v45  ;;  %1690 = vrot.lane.b32.xlu0 %v504_v10, %s4064_s9  ;;  %3520 = vmatprep.mubr.msk.f32.mxu1 %vm630_vm1, %v504_v10  ;;  %v584_v53 = vadd.f32 %v4279_v45, %v583_v41 }
  0xeb   : > { %v513_v14 = vpop.f32.mrf.mxu0  ;;  %3521 = vmatmul.mubr.msk.f32.gmra.mxu1 %vm630_vm1, %v509_v6  ;;  %v3485_v43 = vpop.f32.mrf.mxu1 }
  0xec   : > { %v514_v18 = vadd.f32 %v4279_v45, %v513_v14  ;;  %1696 = vrot.lane.b32.xlu1 %v519_v12, %s4064_s9  ;;  %3629 = vmatpush3.xpose.msk.msra.mxu1 %vm630_vm1, %v1745_v7  ;;  %v599_v54 = vadd.f32 %v3485_v43, %v4279_v45 }
  0xed   : > { %v3464_v19 = vpop.f32.mrf.mxu0  ;;  %3630 = vmatprep.subr.msk.mxu1 %vm630_vm1, %v1743_v13  ;;  %v593_v47 = vpop.f32.mrf.mxu1 }
  0xee   : > { %v529_v20 = vadd.f32 %v3464_v19, %v4279_v45  ;;  %1694 = vrot.lane.b32.xlu0 %v514_v18, %s4064_s9  ;;  %3523 = vmatprep.mubr.msk.f32.mxu1 %vm630_vm1, %v514_v18  ;;  %v594_v56 = vadd.f32 %v4279_v45, %v593_v47 }
  0xef   : > { %v523_v24 = vpop.f32.mrf.mxu0  ;;  %3524 = vmatmul.mubr.msk.f32.gmra.mxu1 %vm630_vm1, %v519_v12  ;;  %v3488_v49 = vpop.f32.mrf.mxu1 }
  0xf0   : > { %v524_v26 = vadd.f32 %v4279_v45, %v523_v24  ;;  %1700 = vrot.lane.b32.xlu1 %v529_v20, %s4064_s9  ;;  %3631 = vmatpush3.xpose.msk.msra.mxu1 %vm630_vm1, %v1743_v13  ;;  %v609_v57 = vadd.f32 %v3488_v49, %v4279_v45 }
  0xf1   : > { %v3467_v27 = vpop.f32.mrf.mxu0  ;;  %3632 = vmatprep.subr.msk.mxu1 %vm630_vm1, %v1741_v21  ;;  %v603_v52 = vpop.f32.mrf.mxu1 }
  0xf2   : > { %v539_v30 = vadd.f32 %v3467_v27, %v4279_v45  ;;  %1698 = vrot.lane.b32.xlu0 %v524_v26, %s4064_s9  ;;  %3526 = vmatprep.mubr.msk.f32.mxu1 %vm630_vm1, %v524_v26  ;;  %v604_v58 = vadd.f32 %v4279_v45, %v603_v52 }
  0xf3   : > { %v533_v31 = vpop.f32.mrf.mxu0  ;;  %3527 = vmatmul.mubr.msk.f32.gmra.mxu1 %vm630_vm1, %v529_v20  ;;  %v3491_v55 = vpop.f32.mrf.mxu1 }
  0xf4   : > { %v534_v33 = vadd.f32 %v4279_v45, %v533_v31  ;;  %1704 = vrot.lane.b32.xlu1 %v539_v30, %s4064_s9  ;;  %3633 = vmatpush3.xpose.msk.msra.mxu1 %vm630_vm1, %v1741_v21  ;;  %v619_v60 = vadd.f32 %v3491_v55, %v4279_v45 }
  0xf5   : > { %3634 = vmatprep.subr.msk.mxu1 %vm630_vm1, %v1739_v37  ;;  %v613_v59 = vpop.f32.mrf.mxu1 }
  0xf6   : > { %1702 = vrot.lane.b32.xlu0 %v534_v33, %s4064_s9  ;;  %3529 = vmatprep.mubr.msk.f32.mxu1 %vm630_vm1, %v534_v33  ;;  %v614_v61 = vadd.f32 %v4279_v45, %v613_v59 }
  0xf7   : > { %3530 = vmatmul.mubr.msk.f32.gmra.mxu1 %vm630_vm1, %v539_v30 }
  0xf8   : > { %1708 = vrot.lane.b32.xlu1 %v549_v36, %s4064_s9  ;;  %3532 = vmatprep.mubr.msk.f32.mxu1 %vm630_vm1, %v544_v39 }
  0xf9   : > { %3635 = vmatpush3.xpose.msk.msra.mxu1 %vm630_vm1, %v1739_v37 }
  0xfa   : > { %1706 = vrot.lane.b32.xlu0 %v544_v39, %s4064_s9 }
  0xfb   : > { %3533 = vmatmul.mubr.msk.f32.gmra.mxu1 %vm630_vm1, %v549_v36 }
  0xfc   : > { %1712 = vrot.lane.b32.xlu1 %v559_v40, %s4064_s9  ;;  %3535 = vmatprep.mubr.msk.f32.mxu1 %vm630_vm1, %v554_v42 }
  0xfe   : > { %1710 = vrot.lane.b32.xlu0 %v554_v42, %s4064_s9 }
  0xff   : > { %3536 = vmatmul.mubr.msk.f32.gmra.mxu1 %vm630_vm1, %v559_v40 }
 0x100   : > { %1716 = vrot.lane.b32.xlu1 %v569_v44, %s4064_s9  ;;  %3538 = vmatprep.mubr.msk.f32.mxu1 %vm630_vm1, %v564_v46 }
 0x102   : > { %1714 = vrot.lane.b32.xlu0 %v564_v46, %s4064_s9 }
 0x103   : > { %3539 = vmatmul.mubr.msk.f32.gmra.mxu1 %vm630_vm1, %v569_v44 }
 0x104   : > { %1720 = vrot.lane.b32.xlu1 %v579_v48, %s4064_s9  ;;  %3541 = vmatprep.mubr.msk.f32.mxu1 %vm630_vm1, %v574_v50 }
 0x106   : > { %1718 = vrot.lane.b32.xlu0 %v574_v50, %s4064_s9 }
 0x107   : > { %3542 = vmatmul.mubr.msk.f32.gmra.mxu1 %vm630_vm1, %v579_v48 }
 0x108   : > { %1724 = vrot.lane.b32.xlu1 %v589_v51, %s4064_s9  ;;  %3544 = vmatprep.mubr.msk.f32.mxu1 %vm630_vm1, %v584_v53 }
 0x10a   : > { %1722 = vrot.lane.b32.xlu0 %v584_v53, %s4064_s9 }
 0x10b   : > { %3545 = vmatmul.mubr.msk.f32.gmra.mxu1 %vm630_vm1, %v589_v51 }
 0x10c   : > { %1728 = vrot.lane.b32.xlu1 %v599_v54, %s4064_s9  ;;  %3547 = vmatprep.mubr.msk.f32.mxu1 %vm630_vm1, %v594_v56 }
 0x10e   : > { %1726 = vrot.lane.b32.xlu0 %v594_v56, %s4064_s9 }
 0x10f   : > { %3548 = vmatmul.mubr.msk.f32.gmra.mxu1 %vm630_vm1, %v599_v54 }
 0x110   : > { %3550 = vmatprep.mubr.msk.f32.mxu1 %vm630_vm1, %v604_v58  ;;  %1732 = vrot.lane.b32.xlu1 %v609_v57, %s4064_s9 }
 0x112   : > { %1730 = vrot.lane.b32.xlu0 %v604_v58, %s4064_s9 }
 0x113   : > { %3551 = vmatmul.mubr.msk.f32.gmra.mxu1 %vm630_vm1, %v609_v57 }
 0x114   : > { %3553 = vmatprep.mubr.msk.f32.mxu1 %vm630_vm1, %v614_v61  ;;  %1736 = vrot.lane.b32.xlu1 %v619_v60, %s4064_s9 }
 0x116   : > { %1734 = vrot.lane.b32.xlu0 %v614_v61, %s4064_s9 }
 0x117   : > { %3554 = vmatmul.mubr.msk.f32.gmra.mxu1 %vm630_vm1, %v619_v60 }
 0x118   : > { %1279 = vrot.lane.b32.xlu1 %v4160_v16, %s4065_s12 }
 0x11a   : > { %1277 = vrot.lane.b32.xlu0 %v4178_v22, %s4065_s12 }
 0x11c   : > { %1275 = vrot.lane.b32.xlu1 %v4165_v17, %s4065_s12 }
 0x11e   : > { %1271 = vrot.lane.b32.xlu0 %v4198_v28, %s4065_s12 }
 0x120   : > { %1273 = vrot.lane.b32.xlu1 %v4181_v23, %s4065_s12 }
 0x122   : > { %1267 = vrot.lane.b32.xlu0 %v4222_v34, %s4065_s12 }
 0x124   : > { %1269 = vrot.lane.b32.xlu1 %v4205_v29, %s4065_s12 }
 0x126   : > { %2361 = vrot.lane.b32.xlu0 %v4160_v16, %s4066_s13 }
 0x128   : > { %1265 = vrot.lane.b32.xlu1 %v4227_v35, %s4065_s12 }
 0x12a   : > { %2357 = vrot.lane.b32.xlu0 %v4165_v17, %s4066_s13 }
 0x12c   : > { %2359 = vrot.lane.b32.xlu1 %v4178_v22, %s4066_s13 }
 0x12e   : > { %2355 = vrot.lane.b32.xlu0 %v4181_v23, %s4066_s13 }
 0x130   : > { %2353 = vrot.lane.b32.xlu1 %v4198_v28, %s4066_s13 }
 0x132   : > { %2351 = vrot.lane.b32.xlu0 %v4205_v29, %s4066_s13 }
 0x14a   : > { %v1677_v45 = vpop.permute.xlu1 %1676 }
 0x14c   : > { %v1675_v62 = vpop.permute.xlu0 %1674 }
 0x14d   : > { %3636 = vmatprep.mubr.msk.f32.mxu1 %vm630_vm1, %v1675_v62 }
 0x14e   : > { %v1681_v16 = vpop.permute.xlu1 %1680  ;;  %3637 = vmatmul.mubr.msk.f32.vlgmr.msra.gmra.mxu1 %vm630_vm1, %v1677_v45 }
 0x150   : > { %v1679_v17 = vpop.permute.xlu0 %1678 }
 0x151   : > { %3639 = vmatprep.mubr.msk.f32.mxu1 %vm630_vm1, %v1679_v17 }
 0x152   : > { %v1685_v22 = vpop.permute.xlu1 %1684  ;;  %3640 = vmatmul.mubr.msk.f32.gmra.mxu1 %vm630_vm1, %v1681_v16 }
 0x154   : > { %v1683_v23 = vpop.permute.xlu0 %1682 }
 0x155   : > { %3642 = vmatprep.mubr.msk.f32.mxu1 %vm630_vm1, %v1683_v23 }
 0x156   : > { %v1689_v28 = vpop.permute.xlu1 %1688  ;;  %3643 = vmatmul.mubr.msk.f32.gmra.mxu1 %vm630_vm1, %v1685_v22 }
 0x158   : > { %v1687_v29 = vpop.permute.xlu0 %1686 }
 0x159   : > { %3645 = vmatprep.mubr.msk.f32.mxu1 %vm630_vm1, %v1687_v29 }
 0x15a   : > { %v1693_v63 = vpop.permute.xlu1 %1692  ;;  %3646 = vmatmul.mubr.msk.f32.gmra.mxu1 %vm630_vm1, %v1689_v28 }
 0x15c   : > { %v1691_v0 = vpop.permute.xlu0 %1690 }
 0x15d   : > { %3648 = vmatprep.mubr.msk.f32.mxu1 %vm630_vm1, %v1691_v0 }
 0x15e   : > { %v1697_v1 = vpop.permute.xlu1 %1696  ;;  %3649 = vmatmul.mubr.msk.f32.gmra.mxu1 %vm630_vm1, %v1693_v63 }
 0x160   : > { %v1695_v2 = vpop.permute.xlu0 %1694 }
 0x161   : > { %3651 = vmatprep.mubr.msk.f32.mxu1 %vm630_vm1, %v1695_v2 }
 0x162   : > { %v1701_v3 = vpop.permute.xlu1 %1700  ;;  %3652 = vmatmul.mubr.msk.f32.gmra.mxu1 %vm630_vm1, %v1697_v1 }
 0x164   : > { %v1699_v4 = vpop.permute.xlu0 %1698 }
 0x165   : > { %3654 = vmatprep.mubr.msk.f32.mxu1 %vm630_vm1, %v1699_v4 }
 0x166   : > { %v1705_v5 = vpop.permute.xlu1 %1704  ;;  %3655 = vmatmul.mubr.msk.f32.gmra.mxu1 %vm630_vm1, %v1701_v3 }
 0x168   : > { %v1703_v6 = vpop.permute.xlu0 %1702 }
 0x169   : > { %3657 = vmatprep.mubr.msk.f32.mxu1 %vm630_vm1, %v1703_v6 }
 0x16a   : > { %3658 = vmatmul.mubr.msk.f32.gmra.mxu1 %vm630_vm1, %v1705_v5  ;;  %v1709_v7 = vpop.permute.xlu1 %1708 }
 0x16c   : > { %v1707_v8 = vpop.permute.xlu0 %1706 }
 0x16d   : > { %3660 = vmatprep.mubr.msk.f32.mxu1 %vm630_vm1, %v1707_v8 }
 0x16e   : > { %3661 = vmatmul.mubr.msk.f32.gmra.mxu1 %vm630_vm1, %v1709_v7  ;;  %v1713_v9 = vpop.permute.xlu1 %1712 }
 0x170   : > { %v1711_v10 = vpop.permute.xlu0 %1710 }
 0x171   : > { %3663 = vmatprep.mubr.msk.f32.mxu1 %vm630_vm1, %v1711_v10 }
 0x172   : > { %3664 = vmatmul.mubr.msk.f32.gmra.mxu1 %vm630_vm1, %v1713_v9  ;;  %v1717_v11 = vpop.permute.xlu1 %1716 }
 0x174   : > { %v1715_v12 = vpop.permute.xlu0 %1714 }
 0x175   : > { %3666 = vmatprep.mubr.msk.f32.mxu1 %vm630_vm1, %v1715_v12 }
 0x176   : > { %3667 = vmatmul.mubr.msk.f32.gmra.mxu1 %vm630_vm1, %v1717_v11  ;;  %v1721_v13 = vpop.permute.xlu1 %1720 }
 0x178   : > { %v1719_v14 = vpop.permute.xlu0 %1718 }
 0x179   : > { %3669 = vmatprep.mubr.msk.f32.mxu1 %vm630_vm1, %v1719_v14 }
 0x17a   : > { %3670 = vmatmul.mubr.msk.f32.gmra.mxu1 %vm630_vm1, %v1721_v13  ;;  %v1725_v15 = vpop.permute.xlu1 %1724 }
 0x17c   : > { %v1723_v18 = vpop.permute.xlu0 %1722 }
 0x17d   : > { %3672 = vmatprep.mubr.msk.f32.mxu1 %vm630_vm1, %v1723_v18 }
 0x17e   : > { %3673 = vmatmul.mubr.msk.f32.gmra.mxu1 %vm630_vm1, %v1725_v15  ;;  %v1729_v19 = vpop.permute.xlu1 %1728 }
 0x180   : > { %v1727_v20 = vpop.permute.xlu0 %1726 }
 0x181   : > { %3675 = vmatprep.mubr.msk.f32.mxu1 %vm630_vm1, %v1727_v20 }
 0x182   : > { %3676 = vmatmul.mubr.msk.f32.gmra.mxu1 %vm630_vm1, %v1729_v19  ;;  %v1733_v21 = vpop.permute.xlu1 %1732 }
 0x184   : > { %v1731_v24 = vpop.permute.xlu0 %1730 }
 0x185   : > { %3678 = vmatprep.mubr.msk.f32.mxu1 %vm630_vm1, %v1731_v24 }
 0x186   : > { %3679 = vmatmul.mubr.msk.f32.gmra.mxu1 %vm630_vm1, %v1733_v21  ;;  %v1737_v25 = vpop.permute.xlu1 %1736 }
 0x188   : > { %v1735_v26 = vpop.permute.xlu0 %1734 }
 0x189   : > { %3681 = vmatprep.mubr.msk.f32.mxu1 %vm630_vm1, %v1735_v26 }
 0x18a   : > { %3682 = vmatmul.mubr.msk.f32.gmra.mxu1 %vm630_vm1, %v1737_v25  ;;  %v1280_v27 = vpop.permute.xlu1 %1279 }
 0x18b   : > { %3556 = vmatprep.subr.mxu0 %v1280_v27 }
 0x18c   : > { %3557 = vmatpush3.msra.mxu0 %v1280_v27  ;;  %v1278_v30 = vpop.permute.xlu0 %1277 }
 0x18d   : > { %3558 = vmatprep.subr.mxu0 %v1278_v30 }
 0x18e   : > { %v1276_v31 = vpop.permute.xlu1 %1275  ;;  %3559 = vmatpush3.msra.mxu0 %v1278_v30 }
 0x18f   : > { %3560 = vmatprep.subr.mxu0 %v1276_v31 }
 0x190   : > { %3561 = vmatpush3.msra.mxu0 %v1276_v31  ;;  %v1272_v32 = vpop.permute.xlu0 %1271 }
 0x192   : > { %v1274_v33 = vpop.permute.xlu1 %1273 }
 0x193   : > { %3562 = vmatprep.subr.mxu0 %v1274_v33 }
 0x194   : > { %3563 = vmatpush3.msra.mxu0 %v1274_v33  ;;  %v1268_v36 = vpop.permute.xlu0 %1267 }
 0x195   : > { %3564 = vmatprep.subr.mxu0 %v1272_v32 }
 0x196   : > { %v1270_v37 = vpop.permute.xlu1 %1269  ;;  %3565 = vmatpush3.msra.mxu0 %v1272_v32 }
 0x197   : > { %3566 = vmatprep.subr.mxu0 %v1270_v37 }
 0x198   : > { %3567 = vmatpush3.msra.mxu0 %v1270_v37  ;;  %v4453_v39 = vpop.permute.xlu0 %2361 }
 0x199   : > { %3568 = vmatprep.subr.mxu0 %v1268_v36 }
 0x19a   : > { %3569 = vmatpush3.msra.mxu0 %v1268_v36  ;;  %v1266_v38 = vpop.permute.xlu1 %1265 }
 0x19b   : > { %v4455_v40 = vpop.f32.mrf.mxu1  ;;  %3570 = vmatprep.subr.mxu0 %v1266_v38 }
 0x19c   : > { %v980_v41 = vsel %vm976_vm2, %v4455_v40, -inf  ;;  %3571 = vmatpush3.msra.mxu0 %v1266_v38 }
 0x19d   : > { %981 = vmax.xlane.f32.xlu1 %v980_v41  ;;  %v4459_v42 = vpop.f32.mrf.mxu1  ;;  %3684 = vmatprep.subr.mxu0 %v4453_v39 }
 0x19e   : > { %v977_v43 = vsel %vm976_vm2, %v4459_v42, -inf }
 0x19f   : > { %978 = vmax.xlane.f32.xlu0 %v977_v43  ;;  %v4464_v44 = vpop.f32.mrf.mxu1 }
 0x1a0   : > { %v986_v47 = vsel %vm976_vm2, %v4464_v44, -inf }
 0x1a1   : > { %v4466_v46 = vpop.f32.mrf.mxu1 }
 0x1a2   : > { %v983_v50 = vsel %vm976_vm2, %v4466_v46, -inf }
 0x1a3   : > { %987 = vmax.xlane.f32.xlu0 %v986_v47  ;;  %v4470_v48 = vpop.f32.mrf.mxu1 }
 0x1a4   : > { %v992_v53 = vsel %vm976_vm2, %v4470_v48, -inf }
 0x1a5   : > { %v4472_v49 = vpop.f32.mrf.mxu1 }
 0x1a6   : > { %v989_v9 = vsel %vm976_vm2, %v4472_v49, -inf }
 0x1a7   : > { %984 = vmax.xlane.f32.xlu0 %v983_v50  ;;  %v4476_v51 = vpop.f32.mrf.mxu1 }
 0x1a8   : > { %v998_v56 = vsel %vm976_vm2, %v4476_v51, -inf }
 0x1a9   : > { %v4478_v52 = vpop.f32.mrf.mxu1 }
 0x1aa   : > { %v995_v12 = vsel %vm976_vm2, %v4478_v52, -inf }
 0x1ab   : > { %993 = vmax.xlane.f32.xlu0 %v992_v53  ;;  %v4482_v54 = vpop.f32.mrf.mxu1 }
 0x1ac   : > { %v1004_v59 = vsel %vm976_vm2, %v4482_v54, -inf }
 0x1ad   : > { %v4484_v55 = vpop.f32.mrf.mxu1 }
 0x1ae   : > { %2349 = vrot.lane.b32.xlu1 %v4222_v34, %s4066_s13  ;;  %v1001_v45 = vsel %vm976_vm2, %v4484_v55, -inf }
 0x1af   : > { %999 = vmax.xlane.f32.xlu0 %v998_v56  ;;  %v4490_v57 = vpop.f32.mrf.mxu1 }
 0x1b0   : > { %v1010_v16 = vsel %vm976_vm2, %v4490_v57, -inf }
 0x1b1   : > { %v4492_v58 = vpop.f32.mrf.mxu1 }
 0x1b2   : > { %v1007_v15 = vsel %vm976_vm2, %v4492_v58, -inf }
 0x1b3   : > { %1005 = vmax.xlane.f32.xlu0 %v1004_v59  ;;  %v4496_v60 = vpop.f32.mrf.mxu1 }
 0x1b4   : > { %v1016_v23 = vsel %vm976_vm2, %v4496_v60, -inf }
 0x1b5   : > { %v4498_v61 = vpop.f32.mrf.mxu1 }
 0x1b6   : > { %v1013_v20 = vsel %vm976_vm2, %v4498_v61, -inf }
 0x1b7   : > { %1002 = vmax.xlane.f32.xlu0 %v1001_v45  ;;  %v4502_v34 = vpop.f32.mrf.mxu1 }
 0x1b8   : > { %v1022_v29 = vsel %vm976_vm2, %v4502_v34, -inf }
 0x1b9   : > { %v4504_v62 = vpop.f32.mrf.mxu1 }
 0x1ba   : > { %v1019_v25 = vsel %vm976_vm2, %v4504_v62, -inf }
 0x1bb   : > { %1011 = vmax.xlane.f32.xlu0 %v1010_v16  ;;  %v4508_v17 = vpop.f32.mrf.mxu1 }
 0x1bc   : > { %v1028_v63 = vsel %vm976_vm2, %v4508_v17, -inf }
 0x1bd   : > { %v4510_v22 = vpop.f32.mrf.mxu1 }
 0x1be   : > { %v1025_v2 = vsel %vm976_vm2, %v4510_v22, -inf }
 0x1bf   : > { %1017 = vmax.xlane.f32.xlu0 %v1016_v23  ;;  %v4514_v28 = vpop.f32.mrf.mxu1 }
 0x1c0   : > { %v1034_v30 = vsel %vm976_vm2, %v4514_v28, -inf }
 0x1c1   : > { %v4520_v0 = vpop.f32.mrf.mxu1 }
 0x1c2   : > { %v1031_v5 = vsel %vm976_vm2, %v4520_v0, -inf }
 0x1c3   : > { %1023 = vmax.xlane.f32.xlu0 %v1022_v29  ;;  %v4522_v1 = vpop.f32.mrf.mxu1 }
 0x1c4   : > { %v1040_v7 = vsel %vm976_vm2, %v4522_v1, -inf }
 0x1c5   : > { %v4526_v3 = vpop.f32.mrf.mxu1 }
 0x1c6   : > { %v1037_v10 = vsel %vm976_vm2, %v4526_v3, -inf }
 0x1c7   : > { %1029 = vmax.xlane.f32.xlu0 %v1028_v63  ;;  %v4528_v4 = vpop.f32.mrf.mxu1 }
 0x1c8   : > { %v1046_v13 = vsel %vm976_vm2, %v4528_v4, -inf }
 0x1c9   : > { %v4532_v6 = vpop.f32.mrf.mxu1 }
 0x1ca   : > { %v1043_v18 = vsel %vm976_vm2, %v4532_v6, -inf }
 0x1cb   : > { %1026 = vmax.xlane.f32.xlu0 %v1025_v2  ;;  %v4536_v8 = vpop.f32.mrf.mxu1  ;;  %v4606_v2 = vpop.permute.xlu0 %2357 }
 0x1cc   : > { %v1052_v21 = vsel %vm976_vm2, %v4536_v8, -inf }
 0x1cd   : > { %v4542_v11 = vpop.f32.mrf.mxu1 }
 0x1ce   : > { %v1049_v26 = vsel %vm976_vm2, %v4542_v11, -inf }
 0x1cf   : > { %1032 = vmax.xlane.f32.xlu0 %v1031_v5  ;;  %v4548_v14 = vpop.f32.mrf.mxu1 }
 0x1d0   : > { %v1058_v32 = vsel %vm976_vm2, %v4548_v14, -inf }
 0x1d1   : > { %v4554_v19 = vpop.f32.mrf.mxu1 }
 0x1d2   : > { %990 = vmax.xlane.f32.xlu1 %v989_v9  ;;  %v1055_v37 = vsel %vm976_vm2, %v4554_v19, -inf }
 0x1d3   : > { %1041 = vmax.xlane.f32.xlu0 %v1040_v7  ;;  %v4560_v24 = vpop.f32.mrf.mxu1 }
 0x1d4   : > { %v1064_v31 = vsel %vm976_vm2, %v4560_v24, -inf }
 0x1d5   : > { %v4566_v27 = vpop.f32.mrf.mxu1 }
 0x1d6   : > { %996 = vmax.xlane.f32.xlu1 %v995_v12  ;;  %v1061_v38 = vsel %vm976_vm2, %v4566_v27, -inf  ;;  %v4616_v12 = vpop.permute.xlu1 %2359 }
 0x1d7   : > { %1038 = vmax.xlane.f32.xlu0 %v1037_v10  ;;  %v4574_v33 = vpop.f32.mrf.mxu1 }
 0x1d8   : > { %v1070_v36 = vsel %vm976_vm2, %v4574_v33, -inf }
 0x1d9   : > { %v4582_v41 = vpop.f32.mrf.mxu1 }
 0x1da   : > { %1008 = vmax.xlane.f32.xlu1 %v1007_v15  ;;  %v1067_v43 = vsel %vm976_vm2, %v4582_v41, -inf }
 0x1db   : > { %1047 = vmax.xlane.f32.xlu0 %v1046_v13 }
 0x1de   : > { %1014 = vmax.xlane.f32.xlu1 %v1013_v20 }
 0x1df   : > { %1044 = vmax.xlane.f32.xlu0 %v1043_v18  ;;  %v4622_v18 = vpop.permute.xlu0 %2355 }
 0x1e2   : > { %1020 = vmax.xlane.f32.xlu1 %v1019_v25 }
 0x1e3   : > { %1053 = vmax.xlane.f32.xlu0 %v1052_v21 }
 0x1e6   : > { %1035 = vmax.xlane.f32.xlu1 %v1034_v30 }
 0x1e7   : > { %1050 = vmax.xlane.f32.xlu0 %v1049_v26  ;;  %v4630_v26 = vpop.permute.xlu1 %2353 }
 0x1ea   : > { %1065 = vmax.xlane.f32.xlu1 %v1064_v31 }
 0x1eb   : > { %1059 = vmax.xlane.f32.xlu0 %v1058_v32  ;;  %v4636_v32 = vpop.permute.xlu0 %2351 }
 0x1ee   : > { %1071 = vmax.xlane.f32.xlu1 %v1070_v36 }
 0x1ef   : > { %1056 = vmax.xlane.f32.xlu0 %v1055_v37 }
 0x1f3   : > { %1062 = vmax.xlane.f32.xlu0 %v1061_v38 }
 0x1f7   : > { %1068 = vmax.xlane.f32.xlu0 %v1067_v43 }
 0x20e   : > { %v4586_v47 = vpop.f32.mrf.mxu1 }
 0x20f   : > { %v2062_v50 = vsel %vm976_vm2, %v4586_v47, -inf }
 0x210   : > { %2063 = vmax.xlane.f32.xlu1 %v2062_v50  ;;  %v4590_v53 = vpop.f32.mrf.mxu1 }
 0x211   : > { %v2059_v56 = vsel %vm976_vm2, %v4590_v53, -inf }
 0x212   : > { %v4594_v59 = vpop.f32.mrf.mxu1  ;;  %2060 = vmax.xlane.f32.xlu0 %v2059_v56 }
 0x213   : > { %v2068_v45 = vsel %vm976_vm2, %v4594_v59, -inf }
 0x214   : > { %2069 = vmax.xlane.f32.xlu1 %v2068_v45  ;;  %v4598_v16 = vpop.f32.mrf.mxu1 }
 0x215   : > { %v2065_v23 = vsel %vm976_vm2, %v4598_v16, -inf }
 0x216   : > { %v4602_v29 = vpop.f32.mrf.mxu1  ;;  %2066 = vmax.xlane.f32.xlu0 %v2065_v23 }
 0x217   : > { %v2074_v63 = vsel %vm976_vm2, %v4602_v29, -inf }
 0x218   : > { %2075 = vmax.xlane.f32.xlu1 %v2074_v63  ;;  %v4608_v5 = vpop.f32.mrf.mxu1 }
 0x219   : > { %v2071_v7 = vsel %vm976_vm2, %v4608_v5, -inf }
 0x21a   : > { %v4612_v9 = vpop.f32.mrf.mxu1  ;;  %2072 = vmax.xlane.f32.xlu0 %v2071_v7 }
 0x21b   : > { %v2080_v10 = vsel %vm976_vm2, %v4612_v9, -inf }
 0x21c   : > { %2081 = vmax.xlane.f32.xlu1 %v2080_v10  ;;  %v4618_v13 = vpop.f32.mrf.mxu1 }
 0x21d   : > { %v2077_v15 = vsel %vm976_vm2, %v4618_v13, -inf }
 0x21e   : > { %v4624_v20 = vpop.f32.mrf.mxu1  ;;  %2078 = vmax.xlane.f32.xlu0 %v2077_v15 }
 0x21f   : > { %5276 = vst [vmem:[#allocation2_spill] sm:$0xff] %v4624_v20  ;;  %v2086_v21 = vsel %vm976_vm2, %v4624_v20, -inf }
 0x220   : > { %2087 = vmax.xlane.f32.xlu1 %v2086_v21  ;;  %v4628_v25 = vpop.f32.mrf.mxu1 }
 0x221   : > { %5277 = vst [vmem:[#allocation3_spill] sm:$0xff] %v4628_v25  ;;  %v2083_v31 = vsel %vm976_vm2, %v4628_v25, -inf }
 0x222   : > { %v4632_v30 = vpop.f32.mrf.mxu1 }
 0x223   : > { %5278 = vst [vmem:[#allocation4_spill] sm:$0xff] %v4632_v30  ;;  %v2092_v56 = vsel %vm976_vm2, %v4632_v30, -inf }
 0x224   : > { %2084 = vmax.xlane.f32.xlu1 %v2083_v31  ;;  %v4638_v36 = vpop.f32.mrf.mxu1 }
 0x225   : > { %5279 = vst [vmem:[#allocation5_spill] sm:$0xff] %v4638_v36  ;;  %v2089_v37 = vsel %vm976_vm2, %v4638_v36, -inf }
 0x226   : > { %v982_v38 = vpop.xlane.xlu1 %981  ;;  %v4642_v43 = vpop.f32.mrf.mxu1  ;;  %2090 = vmax.xlane.f32.xlu0 %v2089_v37 }
 0x227   : > { %5280 = vst [vmem:[#allocation6_spill] sm:$0xff] %v4642_v43  ;;  %v1074_v50 = vsub.f32 %v4455_v40, %v982_v38  ;;  %v2098_v40 = vsel %vm976_vm2, %v4642_v43, -inf }
 0x228   : > { %v979_v45 = vpop.xlane.xlu0 %978  ;;  %2093 = vmax.xlane.f32.xlu1 %v2092_v56  ;;  %v4647_v23 = vpop.f32.mrf.mxu1 }
 0x229   : > { %5281 = vst [vmem:[#allocation7_spill] sm:$0xff] %v4647_v23  ;;  %v1073_v63 = vsub.f32 %v4459_v42, %v979_v45  ;;  %v2095_v7 = vsel %vm976_vm2, %v4647_v23, -inf  ;;  %v1107_v10 = vmul.f32 1.442695, %v1074_v50 }
 0x22a   : > { %v4652_v15 = vpop.f32.mrf.mxu1  ;;  %2096 = vmax.xlane.f32.xlu0 %v2095_v7 }
 0x22b   : > { %5282 = vst [vmem:[#allocation8_spill] sm:$0xff] %v4652_v15  ;;  %v1105_v21 = vmul.f32 1.442695, %v1073_v63  ;;  %v2104_v56 = vsel %vm976_vm2, %v4652_v15, -inf }
 0x22c   : > { %v988_v31 = vpop.xlane.xlu0 %987  ;;  %2099 = vmax.xlane.f32.xlu1 %v2098_v40  ;;  %v4656_v37 = vpop.f32.mrf.mxu1 }
 0x22d   : > { %5283 = vst [vmem:[#allocation9_spill] sm:$0xff] %v4656_v37  ;;  %3784 = vpow2.f32 %v1105_v21  ;;  %v2101_v38 = vsel %vm976_vm2, %v4656_v37, -inf  ;;  %v1076_v42 = vsub.f32 %v4464_v44, %v988_v31 }
 0x22e   : > { %3786 = vpow2.f32 %v1107_v10  ;;  %2102 = vmax.xlane.f32.xlu0 %v2101_v38  ;;  %v4661_v50 = vpop.f32.mrf.mxu1 }
 0x22f   : > { %5284 = vst [vmem:[#allocation10_spill] sm:$0xff] %v4661_v50  ;;  %v2110_v7 = vsel %vm976_vm2, %v4661_v50, -inf  ;;  %v1111_v21 = vmul.f32 1.442695, %v1076_v42 }
 0x230   : > { %v985_v45 = vpop.xlane.xlu0 %984  ;;  %2105 = vmax.xlane.f32.xlu1 %v2104_v56  ;;  %v4668_v40 = vpop.f32.mrf.mxu1 }
 0x231   : > { %v1075_v63 = vsub.f32 %v4466_v46, %v985_v45  ;;  %5285 = vst [vmem:[#allocation11_spill] sm:$0xff] %v4668_v40  ;;  %v2107_v44 = vsel %vm976_vm2, %v4668_v40, -inf }
 0x232   : > { %v4674_v31 = vpop.f32.mrf.mxu1 }
 0x233   : > { %v1109_v37 = vmul.f32 1.442695, %v1075_v63  ;;  %5286 = vst [vmem:[#allocation12_spill] sm:$0xff] %v4674_v31  ;;  %v2116_v46 = vsel %vm976_vm2, %v4674_v31, -inf }
 0x234   : > { %v4670_v10 = vpop.xlane.xlu0 %993  ;;  %2111 = vmax.xlane.f32.xlu1 %v2110_v7  ;;  %v4680_v42 = vpop.f32.mrf.mxu1 }
 0x235   : > { %3788 = vpow2.f32 %v1109_v37  ;;  %5287 = vst [vmem:[#allocation13_spill] sm:$0xff] %v4680_v42  ;;  %v2113_v7 = vsel %vm976_vm2, %v4680_v42, -inf }
 0x236   : > { %3790 = vpow2.f32 %v1111_v21  ;;  %v4688_v37 = vpop.f32.mrf.mxu1 }
 0x237   : > { %5288 = vst [vmem:[#allocation14_spill] sm:$0xff] %v4688_v37 }
 0x238   : > { %v4676_v38 = vpop.xlane.xlu0 %999  ;;  %2108 = vmax.xlane.f32.xlu1 %v2107_v44  ;;  %v4699_v21 = vpop.f32.mrf.mxu1 }
 0x23a   : > { %v4682_v56 = vpop.eup %3784 }
 0x23b   : > { %v4684_v45 = vpop.eup %3786  ;;  %3572 = vmatprep.mubr.msk.f32.mxu0 %vm976_vm2, %v4682_v56 }
 0x23c   : > { %3573 = vmatmul.mubr.msk.f32.vlgmr.msra.gmra.mxu0 %vm976_vm2, %v4684_v45  ;;  %v4692_v63 = vpop.xlane.xlu0 %1005  ;;  %2117 = vmax.xlane.f32.xlu1 %v2116_v46 }
 0x23d   : > { %3685 = vmatpush3.msra.mxu0 %v4453_v39  ;;  %v2122_v39 = vsel %vm976_vm2, %v4688_v37, -inf  ;;  %v2350_v37 = vpop.permute.xlu1 %2349 }
 0x23e   : > { %3686 = vmatprep.subr.mxu0 %v4616_v12 }
 0x23f   : > { %3687 = vmatpush3.msra.mxu0 %v4616_v12  ;;  %v4715_v12 = vpop.f32.mrf.mxu1 }
 0x240   : > { %3688 = vmatprep.subr.mxu0 %v4606_v2  ;;  %v4702_v44 = vpop.xlane.xlu0 %1002  ;;  %2114 = vmax.xlane.f32.xlu1 %v2113_v7  ;;  %5289 = vst [vmem:[#allocation15_spill] sm:$0xff] %v4715_v12 }
 0x241   : > { %3689 = vmatpush3.msra.mxu0 %v4606_v2  ;;  %v4723_v7 = vpop.f32.mrf.mxu1  ;;  %v1081_v20 = vsub.f32 %v4484_v55, %v4702_v44 }
 0x242   : > { %v4705_v31 = vpop.eup %3788  ;;  %3690 = vmatprep.subr.mxu0 %v4622_v18  ;;  %5290 = vst [vmem:[#allocation16_spill] sm:$0xff] %v4723_v7 }
 0x243   : > { %v4710_v46 = vpop.eup %3790  ;;  %3691 = vmatpush3.msra.mxu0 %v4622_v18  ;;  %3575 = vmatprep.mubr.msk.f32.mxu0 %vm976_vm2, %v4705_v31  ;;  %v2128_v18 = vsel %vm976_vm2, %v4715_v12, -inf  ;;  %v4731_v42 = vpop.f32.mrf.mxu1 }
 0x244   : > { %3692 = vmatprep.subr.mxu0 %v4630_v26  ;;  %3576 = vmatmul.mubr.msk.f32.gmra.mxu0 %vm976_vm2, %v4710_v46  ;;  %v4720_v2 = vpop.xlane.xlu0 %1011  ;;  %5291 = vst [vmem:[#allocation17_spill] sm:$0xff] %v4731_v42 }
 0x245   : > { %3693 = vmatpush3.msra.mxu0 %v4630_v26  ;;  %2123 = vmax.xlane.f32.xlu1 %v2122_v39  ;;  %v4735_v26 = vpop.f32.mrf.mxu1  ;;  %v2125_v39 = vsel %vm976_vm2, %v4723_v7, -inf }
 0x246   : > { %2347 = vrot.lane.b32.xlu0 %v4227_v35, %s4066_s13  ;;  %3694 = vmatprep.subr.mxu0 %v4636_v32  ;;  %5292 = vst [vmem:[#allocation18_spill] sm:$0xff] %v4735_v26 }
 0x247   : > { %3695 = vmatpush3.msra.mxu0 %v4636_v32  ;;  %v4741_v50 = vpop.f32.mrf.mxu1  ;;  %v2134_v32 = vsel %vm976_vm2, %v4731_v42, -inf }
 0x248   : > { %v4733_v40 = vpop.xlane.xlu0 %1017  ;;  %3696 = vmatprep.subr.mxu0 %v2350_v37  ;;  %5293 = vst [vmem:[#allocation19_spill] sm:$0xff] %v4741_v50  ;;  %v2140_v42 = vsel %vm976_vm2, %v4741_v50, -inf }
 0x249   : > { %2129 = vmax.xlane.f32.xlu1 %v2128_v18  ;;  %3697 = vmatpush3.msra.mxu0 %v2350_v37  ;;  %v4747_v15 = vpop.f32.mrf.mxu1  ;;  %v2131_v37 = vsel %vm976_vm2, %v4735_v26, -inf }
 0x24a   : > { %5294 = vst [vmem:[#allocation20_spill] sm:$0xff] %v4747_v15 }
 0x24b   : > { %v4751_v18 = vpop.f32.mrf.mxu1 }
 0x24c   : > { %v4739_v35 = vpop.xlane.xlu0 %1023 }
 0x24d   : > { %2126 = vmax.xlane.f32.xlu1 %v2125_v39  ;;  %v2137_v39 = vsel %vm976_vm2, %v4747_v15, -inf  ;;  %v4757_v7 = vpop.f32.mrf.mxu1  ;;  %v1080_v15 = vsub.f32 %v4476_v51, %v4676_v38  ;;  %v1082_v51 = vsub.f32 %v4482_v54, %v4692_v63  ;;  %v1121_v38 = vmul.f32 1.442695, %v1081_v20 }
 0x24e   : > { %v1084_v54 = vsub.f32 %v4490_v57, %v4720_v2  ;;  %v1086_v57 = vsub.f32 %v4496_v60, %v4733_v40  ;;  %v1088_v60 = vsub.f32 %v4502_v34, %v4739_v35 }
 0x24f   : > { %v4765_v30 = vpop.f32.mrf.mxu1 }
 0x250   : > { %v4745_v12 = vpop.xlane.xlu0 %1029  ;;  %v1135_v35 = vmul.f32 1.442695, %v1088_v60 }
 0x251   : > { %2135 = vmax.xlane.f32.xlu1 %v2134_v32  ;;  %v1078_v32 = vsub.f32 %v4470_v48, %v4670_v10  ;;  %v2143_v10 = vsel %vm976_vm2, %v4757_v7, -inf  ;;  %v4776_v50 = vpop.f32.mrf.mxu1 }
 0x253   : > { %v1115_v25 = vmul.f32 1.442695, %v1078_v32  ;;  %v1119_v32 = vmul.f32 1.442695, %v1080_v15  ;;  %v2146_v15 = vsel %vm976_vm2, %v4751_v18, -inf }
 0x254   : > { %v4753_v43 = vpop.xlane.xlu0 %1026 }
 0x255   : > { %2132 = vmax.xlane.f32.xlu1 %v2131_v37 }
 0x258   : > { %v4759_v23 = vpop.xlane.xlu0 %1032 }
 0x259   : > { %2138 = vmax.xlane.f32.xlu1 %v2137_v39 }
 0x25b   : > { %v991_v26 = vpop.xlane.xlu1 %990 }
 0x25c   : > { %v1077_v36 = vsub.f32 %v4472_v49, %v991_v26  ;;  %v4768_v37 = vpop.xlane.xlu0 %1041 }
 0x25d   : > { %2141 = vmax.xlane.f32.xlu1 %v2140_v42 }
 0x25e   : > { %v1113_v48 = vmul.f32 1.442695, %v1077_v36  ;;  %v2149_v36 = vsel %vm976_vm2, %v4776_v50, -inf }
 0x25f   : > { %v997_v39 = vpop.xlane.xlu1 %996 }
 0x260   : > { %3792 = vpow2.f32 %v1113_v48  ;;  %v1079_v49 = vsub.f32 %v4478_v52, %v997_v39  ;;  %v4779_v26 = vpop.xlane.xlu0 %1038  ;;  %v2119_v52 = vsel %vm976_vm2, %v4699_v21, -inf  ;;  %v1169_v39 = vsel %vm976_vm2, %v4682_v56, 0.0 }
 0x261   : > { %3794 = vpow2.f32 %v1115_v25  ;;  %2144 = vmax.xlane.f32.xlu1 %v2143_v10  ;;  %v1123_v25 = vmul.f32 1.442695, %v1082_v51  ;;  %v1175_v56 = vsel %vm976_vm2, %v4705_v31, 0.0  ;;  %v1172_v31 = vsel %vm976_vm2, %v4684_v45, 0.0 }
 0x262   : > { %v1117_v55 = vmul.f32 1.442695, %v1079_v49  ;;  %v1127_v49 = vmul.f32 1.442695, %v1084_v54  ;;  %v1091_v54 = vsub.f32 %v4520_v0, %v4759_v23 }
 0x263   : > { %v1009_v42 = vpop.xlane.xlu1 %1008 }
 0x264   : > { %3796 = vpow2.f32 %v1117_v55  ;;  %v1083_v44 = vsub.f32 %v4492_v58, %v1009_v42  ;;  %v4788_v48 = vpop.xlane.xlu0 %1047  ;;  %v1089_v42 = vsub.f32 %v4510_v22, %v4753_v43 }
 0x265   : > { %3798 = vpow2.f32 %v1119_v32  ;;  %2120 = vmax.xlane.f32.xlu0 %v2119_v52  ;;  %2150 = vmax.xlane.f32.xlu1 %v2149_v36  ;;  %v2152_v32 = vsel %vm976_vm2, %v4765_v30, -inf  ;;  %v1131_v36 = vmul.f32 1.442695, %v1086_v57 }
 0x266   : > { %3800 = vpow2.f32 %v1121_v38  ;;  %v1125_v20 = vmul.f32 1.442695, %v1083_v44  ;;  %v1137_v43 = vmul.f32 1.442695, %v1089_v42 }
 0x267   : > { %v1015_v63 = vpop.xlane.xlu1 %1014  ;;  %3802 = vpow2.f32 %v1123_v25  ;;  %v1090_v25 = vsub.f32 %v4508_v17, %v4745_v12 }
 0x268   : > { %v1085_v58 = vsub.f32 %v4498_v61, %v1015_v63  ;;  %v4795_v10 = vpop.xlane.xlu0 %1044  ;;  %3804 = vpow2.f32 %v1125_v20  ;;  %v1178_v63 = vsel %vm976_vm2, %v4710_v46, 0.0 }
 0x269   : > { %2147 = vmax.xlane.f32.xlu0 %v2146_v15  ;;  %1170 = vadd.xlane.f32.xlu1 %v1169_v39  ;;  %3806 = vpow2.f32 %v1127_v49  ;;  %v1139_v17 = vmul.f32 1.442695, %v1090_v25  ;;  %v1093_v39 = vsub.f32 %v4526_v3, %v4779_v26  ;;  %v1095_v3 = vsub.f32 %v4532_v6, %v4795_v10 }
 0x26a   : > { %v1129_v2 = vmul.f32 1.442695, %v1085_v58  ;;  %v1141_v58 = vmul.f32 1.442695, %v1091_v54 }
 0x26b   : > { %v1021_v51 = vpop.xlane.xlu1 %1020  ;;  %v1149_v6 = vmul.f32 1.442695, %v1095_v3 }
 0x26c   : > { %v1087_v61 = vsub.f32 %v4504_v62, %v1021_v51  ;;  %v4804_v38 = vpop.xlane.xlu0 %1053  ;;  %3808 = vpow2.f32 %v1129_v2  ;;  %v1145_v51 = vmul.f32 1.442695, %v1093_v39 }
 0x26d   : > { %v3793_v55 = vpop.eup %3792  ;;  %2153 = vmax.xlane.f32.xlu0 %v2152_v32  ;;  %1176 = vadd.xlane.f32.xlu1 %v1175_v56  ;;  %3810 = vpow2.f32 %v1131_v36 }
 0x26e   : > { %v3795_v40 = vpop.eup %3794  ;;  %v1133_v44 = vmul.f32 1.442695, %v1087_v61  ;;  %3578 = vmatprep.mubr.msk.f32.mxu0 %vm976_vm2, %v3793_v55  ;;  %v1181_v62 = vsel %vm976_vm2, %v3793_v55, 0.0 }
 0x26f   : > { %3579 = vmatmul.mubr.msk.f32.gmra.mxu0 %vm976_vm2, %v3795_v40  ;;  %v1036_v20 = vpop.xlane.xlu1 %1035  ;;  %v1184_v46 = vsel %vm976_vm2, %v3795_v40, 0.0 }
 0x270   : > { %v4817_v52 = vpop.xlane.xlu0 %1050  ;;  %3812 = vpow2.f32 %v1133_v44  ;;  %v1092_v12 = vsub.f32 %v4514_v28, %v1036_v20  ;;  %v1094_v28 = vsub.f32 %v4522_v1, %v4768_v37  ;;  %v1096_v37 = vsub.f32 %v4528_v4, %v4788_v48 }
 0x271   : > { %v3797_v34 = vpop.eup %3796  ;;  %1173 = vadd.xlane.f32.xlu0 %v1172_v31  ;;  %1182 = vadd.xlane.f32.xlu1 %v1181_v62  ;;  %3814 = vpow2.f32 %v1135_v35  ;;  %v1097_v10 = vsub.f32 %v4542_v11, %v4817_v52  ;;  %v1098_v48 = vsub.f32 %v4536_v8, %v4804_v38 }
 0x272   : > { %v3799_v22 = vpop.eup %3798  ;;  %3581 = vmatprep.mubr.msk.f32.mxu0 %vm976_vm2, %v3797_v34  ;;  %v1187_v45 = vsel %vm976_vm2, %v3797_v34, 0.0  ;;  %3816 = vpow2.f32 %v1137_v43  ;;  %v1143_v2 = vmul.f32 1.442695, %v1092_v12  ;;  %v1147_v1 = vmul.f32 1.442695, %v1094_v28 }
 0x273   : > { %v3801_v15 = vpop.eup %3800  ;;  %3582 = vmatmul.mubr.msk.f32.gmra.mxu0 %vm976_vm2, %v3799_v22  ;;  %3818 = vpow2.f32 %v1139_v17  ;;  %v1190_v56 = vsel %vm976_vm2, %v3799_v22, 0.0  ;;  %v1151_v4 = vmul.f32 1.442695, %v1096_v37  ;;  %v1153_v11 = vmul.f32 1.442695, %v1097_v10  ;;  %v1066_v34 = vpop.xlane.xlu1 %1065 }
 0x274   : > { %3584 = vmatprep.mubr.msk.f32.mxu0 %vm976_vm2, %v3801_v15  ;;  %v4830_v0 = vpop.xlane.xlu0 %1059  ;;  %v3803_v23 = vpop.eup %3802  ;;  %v1193_v57 = vsel %vm976_vm2, %v3801_v15, 0.0  ;;  %3820 = vpow2.f32 %v1141_v58  ;;  %v1155_v8 = vmul.f32 1.442695, %v1098_v48 }
 0x275   : > { %1179 = vadd.xlane.f32.xlu0 %v1178_v63  ;;  %1188 = vadd.xlane.f32.xlu1 %v1187_v45  ;;  %v3805_v49 = vpop.eup %3804  ;;  %3822 = vpow2.f32 %v1143_v2  ;;  %v1196_v40 = vsel %vm976_vm2, %v3803_v23, 0.0  ;;  %v1100_v38 = vsub.f32 %v4548_v14, %v4830_v0  ;;  %v1102_v14 = vsub.f32 %v4560_v24, %v1066_v34 }
 0x276   : > { %v3807_v32 = vpop.eup %3806  ;;  %v1199_v55 = vsel %vm976_vm2, %v3805_v49, 0.0  ;;  %3824 = vpow2.f32 %v1145_v51 }
 0x277   : > { %3585 = vmatmul.mubr.msk.f32.gmra.mxu0 %vm976_vm2, %v3803_v23  ;;  %3826 = vpow2.f32 %v1147_v1  ;;  %v1202_v35 = vsel %vm976_vm2, %v3807_v32, 0.0  ;;  %v1159_v63 = vmul.f32 1.442695, %v1100_v38  ;;  %v1072_v12 = vpop.xlane.xlu1 %1071 }
 0x278   : > { %3587 = vmatprep.mubr.msk.f32.mxu0 %vm976_vm2, %v3805_v49  ;;  %v1057_v61 = vpop.xlane.xlu0 %1056  ;;  %3828 = vpow2.f32 %v1149_v6  ;;  %v1163_v49 = vmul.f32 1.442695, %v1102_v14  ;;  %v1104_v24 = vsub.f32 %v4574_v33, %v1072_v12 }
 0x279   : > { %1185 = vadd.xlane.f32.xlu0 %v1184_v46  ;;  %1194 = vadd.xlane.f32.xlu1 %v1193_v57  ;;  %v3809_v26 = vpop.eup %3808  ;;  %v1099_v31 = vsub.f32 %v4554_v19, %v1057_v61  ;;  %3830 = vpow2.f32 %v1151_v4 }
 0x27a   : > { %v3811_v36 = vpop.eup %3810  ;;  %v1205_v42 = vsel %vm976_vm2, %v3809_v26, 0.0  ;;  %3832 = vpow2.f32 %v1153_v11 }
 0x27b   : > { %3588 = vmatmul.mubr.msk.f32.gmra.mxu0 %vm976_vm2, %v3807_v32  ;;  %v1157_v19 = vmul.f32 1.442695, %v1099_v31  ;;  %v1208_v45 = vsel %vm976_vm2, %v3811_v36, 0.0  ;;  %3834 = vpow2.f32 %v1155_v8  ;;  %v1167_v32 = vmul.f32 1.442695, %v1104_v24 }
 0x27c   : > { %3590 = vmatprep.mubr.msk.f32.mxu0 %vm976_vm2, %v3809_v26  ;;  %v1063_v44 = vpop.xlane.xlu0 %1062 }
 0x27d   : > { %1191 = vadd.xlane.f32.xlu0 %v1190_v56  ;;  %1200 = vadd.xlane.f32.xlu1 %v1199_v55  ;;  %v3813_v60 = vpop.eup %3812  ;;  %v1101_v43 = vsub.f32 %v4566_v27, %v1063_v44  ;;  %3836 = vpow2.f32 %v1157_v19 }
 0x27e   : > { %v3815_v62 = vpop.eup %3814  ;;  %v1211_v25 = vsel %vm976_vm2, %v3813_v60, 0.0  ;;  %3838 = vpow2.f32 %v1159_v63 }
 0x27f   : > { %3591 = vmatmul.mubr.msk.f32.gmra.mxu0 %vm976_vm2, %v3811_v36  ;;  %v3817_v52 = vpop.eup %3816  ;;  %v1161_v27 = vmul.f32 1.442695, %v1101_v43  ;;  %v1214_v58 = vsel %vm976_vm2, %v3815_v62, 0.0 }
 0x280   : > { %3593 = vmatprep.mubr.msk.f32.mxu0 %vm976_vm2, %v3813_v60  ;;  %v3819_v22 = vpop.eup %3818  ;;  %v1069_v20 = vpop.xlane.xlu0 %1068  ;;  %v1217_v15 = vsel %vm976_vm2, %v3817_v52, 0.0 }
 0x281   : > { %1197 = vadd.xlane.f32.xlu0 %v1196_v40  ;;  %1206 = vadd.xlane.f32.xlu1 %v1205_v42  ;;  %v3821_v54 = vpop.eup %3820  ;;  %v1103_v0 = vsub.f32 %v4582_v41, %v1069_v20  ;;  %3840 = vpow2.f32 %v1161_v27  ;;  %v1220_v41 = vsel %vm976_vm2, %v3819_v22, 0.0 }
 0x282   : > { %v3823_v17 = vpop.eup %3822  ;;  %v1223_v39 = vsel %vm976_vm2, %v3821_v54, 0.0  ;;  %3842 = vpow2.f32 %v1163_v49 }
 0x283   : > { %3594 = vmatmul.mubr.msk.f32.gmra.mxu0 %vm976_vm2, %v3815_v62  ;;  %v3825_v23 = vpop.eup %3824  ;;  %v1165_v57 = vmul.f32 1.442695, %v1103_v0  ;;  %v1226_v3 = vsel %vm976_vm2, %v3823_v17, 0.0 }
 0x284   : > { %3596 = vmatprep.mubr.msk.f32.mxu0 %vm976_vm2, %v3817_v52  ;;  %v3827_v46 = vpop.eup %3826  ;;  %v1229_v2 = vsel %vm976_vm2, %v3825_v23, 0.0 }
 0x285   : > { %1203 = vadd.xlane.f32.xlu0 %v1202_v35  ;;  %1212 = vadd.xlane.f32.xlu1 %v1211_v25  ;;  %v3829_v28 = vpop.eup %3828  ;;  %3844 = vpow2.f32 %v1165_v57  ;;  %v1232_v55 = vsel %vm976_vm2, %v3827_v46, 0.0 }
 0x286   : > { %v3831_v51 = vpop.eup %3830  ;;  %v1235_v26 = vsel %vm976_vm2, %v3829_v28, 0.0  ;;  %3846 = vpow2.f32 %v1167_v32 }
 0x287   : > { %3597 = vmatmul.mubr.msk.f32.gmra.mxu0 %vm976_vm2, %v3819_v22  ;;  %v3833_v33 = vpop.eup %3832  ;;  %v1238_v42 = vsel %vm976_vm2, %v3831_v51, 0.0 }
 0x288   : > { %3599 = vmatprep.mubr.msk.f32.mxu0 %vm976_vm2, %v3821_v54  ;;  %v3835_v61 = vpop.eup %3834  ;;  %v1241_v1 = vsel %vm976_vm2, %v3833_v33, 0.0 }
 0x289   : > { %1209 = vadd.xlane.f32.xlu0 %v1208_v45  ;;  %1218 = vadd.xlane.f32.xlu1 %v1217_v15  ;;  %v1244_v52 = vsel %vm976_vm2, %v3835_v61, 0.0 }
 0x28a   : > { %v3837_v56 = vpop.eup %3836 }
 0x28b   : > { %3600 = vmatmul.mubr.msk.f32.gmra.mxu0 %vm976_vm2, %v3823_v17  ;;  %v3839_v36 = vpop.eup %3838  ;;  %v1247_v48 = vsel %vm976_vm2, %v3837_v56, 0.0 }
 0x28c   : > { %3602 = vmatprep.mubr.msk.f32.mxu0 %vm976_vm2, %v3825_v23  ;;  %v1250_v19 = vsel %vm976_vm2, %v3839_v36, 0.0 }
 0x28d   : > { %1215 = vadd.xlane.f32.xlu0 %v1214_v58  ;;  %1224 = vadd.xlane.f32.xlu1 %v1223_v39 }
 0x28e   : > { %v3841_v10 = vpop.eup %3840 }
 0x28f   : > { %3603 = vmatmul.mubr.msk.f32.gmra.mxu0 %vm976_vm2, %v3827_v46  ;;  %v3843_v62 = vpop.eup %3842  ;;  %v1253_v25 = vsel %vm976_vm2, %v3841_v10, 0.0  ;;  %v5296_v46 = vld [vmem:[#allocation3_spill] sm:$0xff] }
 0x290   : > { %3605 = vmatprep.mubr.msk.f32.mxu0 %vm976_vm2, %v3829_v28  ;;  %v1256_v17 = vsel %vm976_vm2, %v3843_v62, 0.0 }
 0x291   : > { %1221 = vadd.xlane.f32.xlu0 %v1220_v41  ;;  %1230 = vadd.xlane.f32.xlu1 %v1229_v2 }
 0x292   : > { %v3845_v31 = vpop.eup %3844 }
 0x293   : > { %3606 = vmatmul.mubr.msk.f32.gmra.mxu0 %vm976_vm2, %v3831_v51  ;;  %v3847_v38 = vpop.eup %3846  ;;  %v1259_v20 = vsel %vm976_vm2, %v3845_v31, 0.0  ;;  %v5297_v51 = vld [vmem:[#allocation5_spill] sm:$0xff] }
 0x294   : > { %3608 = vmatprep.mubr.msk.f32.mxu0 %vm976_vm2, %v3833_v33 }
 0x295   : > { %1227 = vadd.xlane.f32.xlu0 %v1226_v3  ;;  %1236 = vadd.xlane.f32.xlu1 %v1235_v26 }
 0x297   : > { %3609 = vmatmul.mubr.msk.f32.gmra.mxu0 %vm976_vm2, %v3835_v61 }
 0x298   : > { %3611 = vmatprep.mubr.msk.f32.mxu0 %vm976_vm2, %v3837_v56  ;;  %v5298_v56 = vld [vmem:[#allocation4_spill] sm:$0xff] }
 0x299   : > { %1233 = vadd.xlane.f32.xlu0 %v1232_v55  ;;  %1242 = vadd.xlane.f32.xlu1 %v1241_v1  ;;  %v2064_v37 = vpop.xlane.xlu1 %2063 }
 0x29a   : > { %v2156_v6 = vsub.f32 %v4586_v47, %v2064_v37 }
 0x29b   : > { %3612 = vmatmul.mubr.msk.f32.gmra.mxu0 %vm976_vm2, %v3839_v36  ;;  %v2061_v60 = vpop.xlane.xlu0 %2060 }
 0x29c   : > { %v2189_v40 = vmul.f32 1.442695, %v2156_v6  ;;  %v2155_v4 = vsub.f32 %v4590_v53, %v2061_v60  ;;  %3614 = vmatprep.mubr.msk.f32.mxu0 %vm976_vm2, %v3841_v10  ;;  %v5299_v60 = vld [vmem:[#allocation7_spill] sm:$0xff] }
 0x29d   : > { %1239 = vadd.xlane.f32.xlu0 %v1238_v42  ;;  %1248 = vadd.xlane.f32.xlu1 %v1247_v48  ;;  %v2070_v44 = vpop.xlane.xlu1 %2069 }
 0x29e   : > { %v2187_v11 = vmul.f32 1.442695, %v2155_v4  ;;  %v2158_v47 = vsub.f32 %v4594_v59, %v2070_v44  ;;  %3848 = vpow2.f32 %v2189_v40  ;;  %v5300_v44 = vld [vmem:[#allocation6_spill] sm:$0xff] }
 0x29f   : > { %3615 = vmatmul.mubr.msk.f32.gmra.mxu0 %vm976_vm2, %v3843_v62  ;;  %v2067_v34 = vpop.xlane.xlu0 %2066 }
 0x2a0   : > { %3850 = vpow2.f32 %v2187_v11  ;;  %v2193_v53 = vmul.f32 1.442695, %v2158_v47  ;;  %v2157_v35 = vsub.f32 %v4598_v16, %v2067_v34  ;;  %3617 = vmatprep.mubr.msk.f32.mxu0 %vm976_vm2, %v3845_v31 }
 0x2a1   : > { %1245 = vadd.xlane.f32.xlu0 %v1244_v52  ;;  %1254 = vadd.xlane.f32.xlu1 %v1253_v25  ;;  %v2076_v8 = vpop.xlane.xlu1 %2075 }
 0x2a2   : > { %v2191_v59 = vmul.f32 1.442695, %v2157_v35  ;;  %v2160_v22 = vsub.f32 %v4602_v29, %v2076_v8  ;;  %3852 = vpow2.f32 %v2193_v53  ;;  %v5301_v53 = vld [vmem:[#allocation9_spill] sm:$0xff] }
 0x2a3   : > { %3618 = vmatmul.mubr.msk.f32.gmra.mxu0 %vm976_vm2, %v3847_v38  ;;  %v2073_v43 = vpop.xlane.xlu0 %2072 }
 0x2a4   : > { %3854 = vpow2.f32 %v2191_v59  ;;  %v2197_v54 = vmul.f32 1.442695, %v2160_v22  ;;  %v2159_v16 = vsub.f32 %v4608_v5, %v2073_v43  ;;  %v5295_v5 = vld [vmem:[#allocation2_spill] sm:$0xff]  ;;  %v5302_v59 = vld [vmem:[#allocation8_spill] sm:$0xff] }
 0x2a5   : > { %1251 = vadd.xlane.f32.xlu0 %v1250_v19  ;;  %1260 = vadd.xlane.f32.xlu1 %v1259_v20  ;;  %v2082_v45 = vpop.xlane.xlu1 %2081 }
 0x2a6   : > { %v2195_v15 = vmul.f32 1.442695, %v2159_v16  ;;  %v2162_v14 = vsub.f32 %v4612_v9, %v2082_v45  ;;  %3856 = vpow2.f32 %v2197_v54  ;;  %v1262_v9 = vsel %vm976_vm2, %v3847_v38, 0.0 }
 0x2a7   : > { %v2079_v29 = vpop.xlane.xlu0 %2078 }
 0x2a8   : > { %3858 = vpow2.f32 %v2195_v15  ;;  %v2201_v63 = vmul.f32 1.442695, %v2162_v14  ;;  %v2161_v12 = vsub.f32 %v4618_v13, %v2079_v29  ;;  %v5303_v15 = vld [vmem:[#allocation10_spill] sm:$0xff] }
 0x2a9   : > { %1257 = vadd.xlane.f32.xlu0 %v1256_v17  ;;  %v2088_v27 = vpop.xlane.xlu1 %2087 }
 0x2aa   : > { %v2199_v0 = vmul.f32 1.442695, %v2161_v12  ;;  %v2164_v23 = vsub.f32 %v5295_v5, %v2088_v27  ;;  %3860 = vpow2.f32 %v2201_v63  ;;  %v5304_v5 = vld [vmem:[#allocation11_spill] sm:$0xff] }
 0x2ab   : > { %v4908_v58 = vpop.eup %3848 }
 0x2ac   : > { %3862 = vpow2.f32 %v2199_v0  ;;  %v2205_v39 = vmul.f32 1.442695, %v2164_v23  ;;  %v2254_v32 = vsel %vm976_vm2, %v4908_v58, 0.0 }
 0x2ad   : > { %v3851_v49 = vpop.eup %3850  ;;  %1263 = vadd.xlane.f32.xlu0 %v1262_v9  ;;  %v2085_v24 = vpop.xlane.xlu1 %2084 }
 0x2ae   : > { %v2163_v57 = vsub.f32 %v5296_v46, %v2085_v24  ;;  %3700 = vmatprep.mubr.msk.f32.mxu0 %vm976_vm2, %v3851_v49  ;;  %v2251_v13 = vsel %vm976_vm2, %v3851_v49, 0.0  ;;  %3864 = vpow2.f32 %v2205_v39 }
 0x2af   : > { %2252 = vadd.xlane.f32.xlu1 %v2251_v13  ;;  %v2091_v28 = vpop.xlane.xlu0 %2090  ;;  %v4914_v41 = vpop.eup %3852 }
 0x2b0   : > { %v2203_v2 = vmul.f32 1.442695, %v2163_v57  ;;  %v2165_v33 = vsub.f32 %v5297_v51, %v2091_v28  ;;  %v2260_v10 = vsel %vm976_vm2, %v4914_v41, 0.0  ;;  %v5305_v57 = vld [vmem:[#allocation12_spill] sm:$0xff] }
 0x2b1   : > { %v3855_v3 = vpop.eup %3854  ;;  %2255 = vadd.xlane.f32.xlu0 %v2254_v32  ;;  %v2094_v26 = vpop.xlane.xlu1 %2093 }
 0x2b2   : > { %3866 = vpow2.f32 %v2203_v2  ;;  %v2207_v61 = vmul.f32 1.442695, %v2165_v33  ;;  %v2166_v55 = vsub.f32 %v5298_v56, %v2094_v26  ;;  %v2257_v1 = vsel %vm976_vm2, %v3855_v3, 0.0 }
 0x2b3   : > { %2258 = vadd.xlane.f32.xlu1 %v2257_v1  ;;  %v2097_v37 = vpop.xlane.xlu0 %2096  ;;  %v3857_v36 = vpop.eup %3856 }
 0x2b4   : > { %3868 = vpow2.f32 %v2207_v61  ;;  %v2209_v6 = vmul.f32 1.442695, %v2166_v55  ;;  %v2167_v40 = vsub.f32 %v5299_v60, %v2097_v37  ;;  %v2266_v34 = vsel %vm976_vm2, %v3857_v36, 0.0 }
 0x2b5   : > { %v3859_v42 = vpop.eup %3858  ;;  %2261 = vadd.xlane.f32.xlu0 %v2260_v10  ;;  %v2100_v4 = vpop.xlane.xlu1 %2099 }
 0x2b6   : > { %3870 = vpow2.f32 %v2209_v6  ;;  %v2211_v48 = vmul.f32 1.442695, %v2167_v40  ;;  %v2168_v62 = vsub.f32 %v5300_v44, %v2100_v4  ;;  %v2263_v11 = vsel %vm976_vm2, %v3859_v42, 0.0  ;;  %v5307_v6 = vld [vmem:[#allocation14_spill] sm:$0xff] }
 0x2b7   : > { %2264 = vadd.xlane.f32.xlu1 %v2263_v11  ;;  %v2103_v47 = vpop.xlane.xlu0 %2102  ;;  %v3861_v31 = vpop.eup %3860 }
 0x2b8   : > { %3872 = vpow2.f32 %v2211_v48  ;;  %v2213_v52 = vmul.f32 1.442695, %v2168_v62  ;;  %v2169_v35 = vsub.f32 %v5301_v53, %v2103_v47  ;;  %v2272_v16 = vsel %vm976_vm2, %v3861_v31, 0.0  ;;  %v5308_v48 = vld [vmem:[#allocation15_spill] sm:$0xff] }
 0x2b9   : > { %v3863_v25 = vpop.eup %3862  ;;  %2267 = vadd.xlane.f32.xlu0 %v2266_v34  ;;  %v2106_v8 = vpop.xlane.xlu1 %2105 }
 0x2ba   : > { %3874 = vpow2.f32 %v2213_v52  ;;  %v2215_v38 = vmul.f32 1.442695, %v2169_v35  ;;  %v2170_v22 = vsub.f32 %v5302_v59, %v2106_v8  ;;  %v2269_v19 = vsel %vm976_vm2, %v3863_v25, 0.0  ;;  %v5309_v35 = vld [vmem:[#allocation17_spill] sm:$0xff] }
 0x2bb   : > { %2270 = vadd.xlane.f32.xlu1 %v2269_v19  ;;  %v2348_v43 = vpop.permute.xlu0 %2347  ;;  %v3865_v20 = vpop.eup %3864 }
 0x2bc   : > { %3876 = vpow2.f32 %v2215_v38  ;;  %v2217_v54 = vmul.f32 1.442695, %v2170_v22  ;;  %3698 = vmatprep.subr.mxu0 %v2348_v43  ;;  %v2278_v17 = vsel %vm976_vm2, %v3865_v20, 0.0 }
 0x2bd   : > { %2273 = vadd.xlane.f32.xlu0 %v2272_v16  ;;  %v2112_v45 = vpop.xlane.xlu1 %2111  ;;  %3699 = vmatpush3.msra.mxu0 %v2348_v43 }
 0x2be   : > { %3878 = vpow2.f32 %v2217_v54  ;;  %v2172_v14 = vsub.f32 %v5303_v15, %v2112_v45  ;;  %3701 = vmatmul.mubr.msk.f32.vlgmr.msra.gmra.mxu0 %vm976_vm2, %v4908_v58  ;;  %v5310_v45 = vld [vmem:[#allocation19_spill] sm:$0xff] }
 0x2bf   : > { %v3867_v29 = vpop.eup %3866  ;;  %3703 = vmatprep.mubr.msk.f32.mxu0 %vm976_vm2, %v3855_v3  ;;  %v5306_v3 = vld [vmem:[#allocation13_spill] sm:$0xff] }
 0x2c0   : > { %v2221_v63 = vmul.f32 1.442695, %v2172_v14  ;;  %v2275_v12 = vsel %vm976_vm2, %v3867_v29, 0.0 }
 0x2c1   : > { %v3869_v27 = vpop.eup %3868  ;;  %2279 = vadd.xlane.f32.xlu0 %v2278_v17  ;;  %v2109_v0 = vpop.xlane.xlu1 %2108  ;;  %2276 = vadd.xlane.f32.xlu1 %v2275_v12  ;;  %v5311_v17 = vld [vmem:[#allocation16_spill] sm:$0xff] }
 0x2c2   : > { %3880 = vpow2.f32 %v2221_v63  ;;  %v2171_v23 = vsub.f32 %v5304_v5, %v2109_v0  ;;  %3704 = vmatmul.mubr.msk.f32.gmra.mxu0 %vm976_vm2, %v4914_v41  ;;  %v2281_v49 = vsel %vm976_vm2, %v3869_v27, 0.0 }
 0x2c3   : > { %v3871_v39 = vpop.eup %3870  ;;  %3706 = vmatprep.mubr.msk.f32.mxu0 %vm976_vm2, %v3859_v42 }
 0x2c4   : > { %v2219_v58 = vmul.f32 1.442695, %v2171_v23  ;;  %v2284_v9 = vsel %vm976_vm2, %v3871_v39, 0.0 }
 0x2c5   : > { %v3873_v24 = vpop.eup %3872  ;;  %v2118_v46 = vpop.xlane.xlu1 %2117  ;;  %2285 = vadd.xlane.f32.xlu0 %v2284_v9  ;;  %2282 = vadd.xlane.f32.xlu1 %v2281_v49 }
 0x2c6   : > { %3882 = vpow2.f32 %v2219_v58  ;;  %v2174_v13 = vsub.f32 %v5305_v57, %v2118_v46  ;;  %3707 = vmatmul.mubr.msk.f32.gmra.mxu0 %vm976_vm2, %v3857_v36  ;;  %v2287_v32 = vsel %vm976_vm2, %v3873_v24, 0.0  ;;  %v5312_v58 = vld [vmem:[#allocation18_spill] sm:$0xff] }
 0x2c7   : > { %v3875_v28 = vpop.eup %3874  ;;  %3709 = vmatprep.mubr.msk.f32.mxu0 %vm976_vm2, %v3863_v25 }
 0x2c8   : > { %v2225_v41 = vmul.f32 1.442695, %v2174_v13  ;;  %v2290_v2 = vsel %vm976_vm2, %v3875_v28, 0.0 }
 0x2c9   : > { %v3877_v51 = vpop.eup %3876  ;;  %v2115_v33 = vpop.xlane.xlu1 %2114  ;;  %2291 = vadd.xlane.f32.xlu0 %v2290_v2  ;;  %2288 = vadd.xlane.f32.xlu1 %v2287_v32 }
 0x2ca   : > { %3884 = vpow2.f32 %v2225_v41  ;;  %v2173_v26 = vsub.f32 %v5306_v3, %v2115_v33  ;;  %3710 = vmatmul.mubr.msk.f32.gmra.mxu0 %vm976_vm2, %v3861_v31  ;;  %v2293_v1 = vsel %vm976_vm2, %v3877_v51, 0.0 }
 0x2cb   : > { %v3879_v61 = vpop.eup %3878  ;;  %3712 = vmatprep.mubr.msk.f32.mxu0 %vm976_vm2, %v3867_v29 }
 0x2cc   : > { %v2223_v56 = vmul.f32 1.442695, %v2173_v26  ;;  %v2296_v55 = vsel %vm976_vm2, %v3879_v61, 0.0 }
 0x2cd   : > { %2297 = vadd.xlane.f32.xlu0 %v2296_v55  ;;  %2294 = vadd.xlane.f32.xlu1 %v2293_v1 }
 0x2ce   : > { %3886 = vpow2.f32 %v2223_v56  ;;  %v2124_v37 = vpop.xlane.xlu1 %2123  ;;  %3713 = vmatmul.mubr.msk.f32.gmra.mxu0 %vm976_vm2, %v3865_v20 }
 0x2cf   : > { %v3881_v36 = vpop.eup %3880  ;;  %v2176_v10 = vsub.f32 %v5307_v6, %v2124_v37  ;;  %3715 = vmatprep.mubr.msk.f32.mxu0 %vm976_vm2, %v3869_v27 }
 0x2d0   : > { %v2302_v60 = vsel %vm976_vm2, %v3881_v36, 0.0 }
 0x2d1   : > { %v2229_v40 = vmul.f32 1.442695, %v2176_v10  ;;  %2303 = vadd.xlane.f32.xlu0 %v2302_v60 }
 0x2d2   : > { %v2130_v42 = vpop.xlane.xlu1 %2129  ;;  %3716 = vmatmul.mubr.msk.f32.gmra.mxu0 %vm976_vm2, %v3871_v39 }
 0x2d3   : > { %v3883_v4 = vpop.eup %3882  ;;  %3888 = vpow2.f32 %v2229_v40  ;;  %v2178_v44 = vsub.f32 %v5308_v48, %v2130_v42  ;;  %3718 = vmatprep.mubr.msk.f32.mxu0 %vm976_vm2, %v3873_v24 }
 0x2d4   : > { %v2299_v62 = vsel %vm976_vm2, %v3883_v4, 0.0 }
 0x2d5   : > { %v2233_v11 = vmul.f32 1.442695, %v2178_v44  ;;  %2300 = vadd.xlane.f32.xlu1 %v2299_v62 }
 0x2d6   : > { %v2127_v47 = vpop.xlane.xlu1 %2126  ;;  %3719 = vmatmul.mubr.msk.f32.gmra.mxu0 %vm976_vm2, %v3875_v28  ;;  %v5313_v28 = vld [vmem:[#allocation20_spill] sm:$0xff] }
 0x2d7   : > { %v3885_v31 = vpop.eup %3884  ;;  %3890 = vpow2.f32 %v2233_v11  ;;  %3721 = vmatprep.mubr.msk.f32.mxu0 %vm976_vm2, %v3877_v51  ;;  %v2177_v12 = vsub.f32 %v5311_v17, %v2127_v47 }
 0x2d8   : > { %v2308_v52 = vsel %vm976_vm2, %v3885_v31, 0.0 }
 0x2d9   : > { %2309 = vadd.xlane.f32.xlu0 %v2308_v52  ;;  %v2231_v39 = vmul.f32 1.442695, %v2177_v12 }
 0x2da   : > { %v2136_v34 = vpop.xlane.xlu1 %2135  ;;  %3722 = vmatmul.mubr.msk.f32.gmra.mxu0 %vm976_vm2, %v3879_v61 }
 0x2db   : > { %v3887_v53 = vpop.eup %3886  ;;  %v2180_v25 = vsub.f32 %v5309_v35, %v2136_v34  ;;  %3724 = vmatprep.mubr.msk.f32.mxu0 %vm976_vm2, %v3883_v4 }
 0x2dc   : > { %v2305_v8 = vsel %vm976_vm2, %v3887_v53, 0.0 }
 0x2dd   : > { %v2237_v38 = vmul.f32 1.442695, %v2180_v25  ;;  %2306 = vadd.xlane.f32.xlu1 %v2305_v8 }
 0x2de   : > { %v2133_v59 = vpop.xlane.xlu1 %2132  ;;  %3725 = vmatmul.mubr.msk.f32.gmra.mxu0 %vm976_vm2, %v3881_v36 }
 0x2df   : > { %3892 = vpow2.f32 %v2237_v38  ;;  %3727 = vmatprep.mubr.msk.f32.mxu0 %vm976_vm2, %v3887_v53  ;;  %v2179_v9 = vsub.f32 %v5312_v58, %v2133_v59 }
 0x2e0   : > { %v3889_v22 = vpop.eup %3888 }
 0x2e1   : > { %v2314_v19 = vsel %vm976_vm2, %v3889_v22, 0.0  ;;  %v2235_v13 = vmul.f32 1.442695, %v2179_v9 }
 0x2e2   : > { %v2139_v43 = vpop.xlane.xlu1 %2138  ;;  %2315 = vadd.xlane.f32.xlu0 %v2314_v19  ;;  %3728 = vmatmul.mubr.msk.f32.gmra.mxu0 %vm976_vm2, %v3885_v31 }
 0x2e3   : > { %v2181_v41 = vsub.f32 %v5313_v28, %v2139_v43 }
 0x2e4   : > { %v4972_v54 = vpop.eup %3890 }
 0x2e5   : > { %v2320_v16 = vsel %vm976_vm2, %v4972_v54, 0.0  ;;  %v2239_v3 = vmul.f32 1.442695, %v2181_v41 }
 0x2e6   : > { %v2142_v20 = vpop.xlane.xlu1 %2141  ;;  %2321 = vadd.xlane.f32.xlu0 %v2320_v16 }
 0x2e7   : > { %v2182_v15 = vsub.f32 %v5310_v45, %v2142_v20 }
 0x2e9   : > { %v2241_v14 = vmul.f32 1.442695, %v2182_v15 }
 0x2ea   : > { %v2145_v29 = vpop.xlane.xlu1 %2144 }
 0x2eb   : > { %3894 = vpow2.f32 %v2241_v14  ;;  %v2183_v26 = vsub.f32 %v4757_v7, %v2145_v29 }
 0x2ec   : > { %v4977_v63 = vpop.eup %3892 }
 0x2ed   : > { %v2326_v27 = vsel %vm976_vm2, %v4977_v63, 0.0  ;;  %v2243_v1 = vmul.f32 1.442695, %v2183_v26 }
 0x2ee   : > { %v2121_v0 = vpop.xlane.xlu0 %2120  ;;  %v2151_v5 = vpop.xlane.xlu1 %2150  ;;  %2327 = vadd.xlane.f32.xlu0 %v2326_v27 }
 0x2ef   : > { %v2175_v23 = vsub.f32 %v4699_v21, %v2121_v0  ;;  %v2185_v37 = vsub.f32 %v4776_v50, %v2151_v5 }
 0x2f1   : > { %v2227_v49 = vmul.f32 1.442695, %v2175_v23  ;;  %v2247_v7 = vmul.f32 1.442695, %v2185_v37 }
 0x2f2   : > { %v2148_v24 = vpop.xlane.xlu0 %2147  ;;  %v1171_v46 = vpop.xlane.xlu1 %1170 }
 0x2f3   : > { %3896 = vpow2.f32 %v2227_v49  ;;  %v2184_v57 = vsub.f32 %v4751_v18, %v2148_v24 }
 0x2f4   : > { %3898 = vpow2.f32 %v2231_v39 }
 0x2f5   : > { %v2245_v2 = vmul.f32 1.442695, %v2184_v57  ;;  %3900 = vrcp.f32 %v1171_v46 }
 0x2f6   : > { %v2154_v32 = vpop.xlane.xlu0 %2153  ;;  %v1177_v21 = vpop.xlane.xlu1 %1176 }
 0x2f7   : > { %3902 = vpow2.f32 %v2245_v2  ;;  %v2186_v51 = vsub.f32 %v4765_v30, %v2154_v32 }
 0x2f8   : > { %v3895_v33 = vpop.eup %3894  ;;  %3904 = vpow2.f32 %v2235_v13 }
 0x2f9   : > { %v2249_v61 = vmul.f32 1.442695, %v2186_v51  ;;  %v2332_v56 = vsel %vm976_vm2, %v3895_v33, 0.0  ;;  %3906 = vrcp.f32 %v1177_v21 }
 0x2fa   : > { %v1174_v18 = vpop.xlane.xlu0 %1173  ;;  %2333 = vadd.xlane.f32.xlu0 %v2332_v56  ;;  %v1183_v31 = vpop.xlane.xlu1 %1182 }
 0x2fb   : > { %3908 = vpow2.f32 %v2249_v61 }
 0x2fc   : > { %3910 = vrcp.f32 %v1174_v18  ;;  %v3574_v55 = vpop.f32.mrf.mxu0 }
 0x2fd   : > { %3912 = vpow2.f32 %v2239_v3 }
 0x2fe   : > { %v1180_v30 = vpop.xlane.xlu0 %1179  ;;  %v1451_v6 = vpop.f32.mrf.mxu0 }
 0x2ff   : > { %3914 = vrcp.f32 %v1180_v30  ;;  %v1189_v43 = vpop.xlane.xlu1 %1188 }
 0x300   : > { %v3897_v36 = vpop.eup %3896  ;;  %3916 = vpow2.f32 %v2243_v1 }
 0x301   : > { %v3899_v10 = vpop.eup %3898  ;;  %3730 = vmatprep.mubr.msk.f32.mxu0 %vm976_vm2, %v3897_v36  ;;  %v2311_v60 = vsel %vm976_vm2, %v3897_v36, 0.0  ;;  %3918 = vpow2.f32 %v2247_v7 }
 0x302   : > { %v3901_v40 = vpop.eup %3900  ;;  %3731 = vmatmul.mubr.msk.f32.gmra.mxu0 %vm976_vm2, %v3889_v22  ;;  %2312 = vadd.xlane.f32.xlu1 %v2311_v60  ;;  %v1186_v44 = vpop.xlane.xlu0 %1185  ;;  %v2317_v62 = vsel %vm976_vm2, %v3899_v10, 0.0 }
 0x303   : > { %v4993_v42 = vmul.f32 %v3901_v40, %v1451_v6  ;;  %3733 = vmatprep.mubr.msk.f32.mxu0 %vm976_vm2, %v3899_v10  ;;  %v1195_v29 = vpop.xlane.xlu1 %1194  ;;  %3920 = vrcp.f32 %v1186_v44 }
 0x304   : > { %v3903_v50 = vpop.eup %3902  ;;  %v3577_v4 = vpop.f32.mrf.mxu0  ;;  %3922 = vrcp.f32 %v1183_v31 }
 0x305   : > { %v3905_v48 = vpop.eup %3904  ;;  %v2338_v11 = vsel %vm976_vm2, %v3903_v50, 0.0 }
 0x306   : > { %3734 = vmatmul.mubr.msk.f32.gmra.mxu0 %vm976_vm2, %v4972_v54  ;;  %2318 = vadd.xlane.f32.xlu1 %v2317_v62  ;;  %v3907_v47 = vpop.eup %3906  ;;  %v1461_v52 = vpop.f32.mrf.mxu0  ;;  %v2323_v25 = vsel %vm976_vm2, %v3905_v48, 0.0 }
 0x307   : > { %2339 = vadd.xlane.f32.xlu0 %v2338_v11  ;;  %3736 = vmatprep.mubr.msk.f32.mxu0 %vm976_vm2, %v3905_v48  ;;  %v5001_v53 = vmul.f32 %v3907_v47, %v1461_v52  ;;  %v1192_v22 = vpop.xlane.xlu0 %1191  ;;  %v1201_v12 = vpop.xlane.xlu1 %1200 }
 0x308   : > { %v3909_v34 = vpop.eup %3908  ;;  %3924 = vrcp.f32 %v1192_v22 }
 0x309   : > { %v3911_v35 = vpop.eup %3910  ;;  %v2344_v8 = vsel %vm976_vm2, %v3909_v34, 0.0  ;;  %3926 = vrcp.f32 %v1189_v43 }
 0x30a   : > { %v3913_v38 = vpop.eup %3912  ;;  %v5005_v59 = vmul.f32 %v3911_v35, %v3574_v55  ;;  %3737 = vmatmul.mubr.msk.f32.gmra.mxu0 %vm976_vm2, %v4977_v63  ;;  %2324 = vadd.xlane.f32.xlu1 %v2323_v25 }
 0x30b   : > { %2345 = vadd.xlane.f32.xlu0 %v2344_v8  ;;  %3739 = vmatprep.mubr.msk.f32.mxu0 %vm976_vm2, %v3913_v38  ;;  %v2329_v16 = vsel %vm976_vm2, %v3913_v38, 0.0  ;;  %v1198_v45 = vpop.xlane.xlu0 %1197  ;;  %v1207_v0 = vpop.xlane.xlu1 %1206 }
 0x30c   : > { %v3915_v19 = vpop.eup %3914  ;;  %3928 = vrcp.f32 %v1198_v45 }
 0x30d   : > { %v5010_v54 = vmul.f32 %v3915_v19, %v3577_v4  ;;  %v3917_v20 = vpop.eup %3916  ;;  %3930 = vrcp.f32 %v1195_v29 }
 0x30e   : > { %3740 = vmatmul.mubr.msk.f32.gmra.mxu0 %vm976_vm2, %v3895_v33  ;;  %2330 = vadd.xlane.f32.xlu1 %v2329_v16  ;;  %v2335_v15 = vsel %vm976_vm2, %v3917_v20, 0.0  ;;  %v3919_v14 = vpop.eup %3918 }
 0x30f   : > { %3742 = vmatprep.mubr.msk.f32.mxu0 %vm976_vm2, %v3917_v20  ;;  %v2341_v63 = vsel %vm976_vm2, %v3919_v14, 0.0  ;;  %v1204_v17 = vpop.xlane.xlu0 %1203  ;;  %v1213_v23 = vpop.xlane.xlu1 %1212 }
 0x310   : > { %3932 = vrcp.f32 %v1204_v17  ;;  %v3921_v9 = vpop.eup %3920 }
 0x311   : > { %3934 = vrcp.f32 %v1201_v12  ;;  %v3923_v57 = vpop.eup %3922 }
 0x312   : > { %2336 = vadd.xlane.f32.xlu1 %v2335_v15  ;;  %3743 = vmatmul.mubr.msk.f32.gmra.mxu0 %vm976_vm2, %v3903_v50 }
 0x313   : > { %3745 = vmatprep.mubr.msk.f32.mxu0 %vm976_vm2, %v3919_v14  ;;  %v1210_v27 = vpop.xlane.xlu0 %1209  ;;  %v1219_v58 = vpop.xlane.xlu1 %1218 }
 0x314   : > { %3936 = vrcp.f32 %v1210_v27 }
 0x315   : > { %v3925_v2 = vpop.eup %3924  ;;  %3938 = vrcp.f32 %v1207_v0 }
 0x316   : > { %2342 = vadd.xlane.f32.xlu1 %v2341_v63  ;;  %3746 = vmatmul.mubr.msk.f32.gmra.mxu0 %vm976_vm2, %v3909_v34  ;;  %v3927_v21 = vpop.eup %3926 }
 0x317   : > { %v1216_v5 = vpop.xlane.xlu0 %1215  ;;  %v1225_v13 = vpop.xlane.xlu1 %1224 }
 0x318   : > { %3940 = vrcp.f32 %v1216_v5 }
 0x319   : > { %v3929_v61 = vpop.eup %3928  ;;  %3942 = vrcp.f32 %v1213_v23 }
 0x31a   : > { %v3931_v1 = vpop.eup %3930 }
 0x31b   : > { %v1222_v39 = vpop.xlane.xlu0 %1221  ;;  %v1231_v56 = vpop.xlane.xlu1 %1230 }
 0x31c   : > { %3944 = vrcp.f32 %v1222_v39 }
 0x31d   : > { %v3933_v36 = vpop.eup %3932  ;;  %3946 = vrcp.f32 %v1219_v58 }
 0x31e   : > { %v3935_v60 = vpop.eup %3934 }
 0x31f   : > { %v1228_v49 = vpop.xlane.xlu0 %1227  ;;  %v1237_v40 = vpop.xlane.xlu1 %1236 }
 0x320   : > { %3948 = vrcp.f32 %v1228_v49 }
 0x321   : > { %v3937_v48 = vpop.eup %3936  ;;  %3950 = vrcp.f32 %v1225_v13 }
 0x322   : > { %v3939_v11 = vpop.eup %3938 }
 0x323   : > { %v1234_v33 = vpop.xlane.xlu0 %1233  ;;  %v1243_v35 = vpop.xlane.xlu1 %1242 }
 0x324   : > { %3952 = vrcp.f32 %v1234_v33 }
 0x325   : > { %v3941_v34 = vpop.eup %3940  ;;  %3954 = vrcp.f32 %v1231_v56 }
 0x326   : > { %v3943_v38 = vpop.eup %3942 }
 0x327   : > { %v1240_v6 = vpop.xlane.xlu0 %1239  ;;  %v1249_v14 = vpop.xlane.xlu1 %1248 }
 0x328   : > { %3956 = vrcp.f32 %v1240_v6 }
 0x329   : > { %v3945_v43 = vpop.eup %3944  ;;  %3958 = vrcp.f32 %v1237_v40 }
 0x32a   : > { %v3947_v15 = vpop.eup %3946 }
 0x32b   : > { %v1246_v47 = vpop.xlane.xlu0 %1245 }
 0x32c   : > { %3960 = vrcp.f32 %v1246_v47 }
 0x32d   : > { %v3949_v17 = vpop.eup %3948  ;;  %3962 = vrcp.f32 %v1243_v35 }
 0x32e   : > { %v3951_v0 = vpop.eup %3950 }
 0x32f   : > { %v3580_v24 = vpop.f32.mrf.mxu0  ;;  %v1252_v16 = vpop.xlane.xlu0 %1251 }
 0x330   : > { %v5020_v46 = vmul.f32 %v3921_v9, %v3580_v24  ;;  %3964 = vrcp.f32 %v1252_v16  ;;  %v1255_v9 = vpop.xlane.xlu1 %1254 }
 0x331   : > { %v1471_v28 = vpop.f32.mrf.mxu0  ;;  %v3953_v58 = vpop.eup %3952  ;;  %3966 = vrcp.f32 %v1249_v14 }
 0x332   : > { %v5022_v41 = vmul.f32 %v3923_v57, %v1471_v28  ;;  %v3955_v57 = vpop.eup %3954 }
 0x333   : > { %v3583_v32 = vpop.f32.mrf.mxu0  ;;  %v1258_v5 = vpop.xlane.xlu0 %1257 }
 0x334   : > { %v5024_v51 = vmul.f32 %v3925_v2, %v3583_v32  ;;  %3968 = vrcp.f32 %v1258_v5 }
 0x335   : > { %v1481_v3 = vpop.f32.mrf.mxu0  ;;  %v3957_v2 = vpop.eup %3956  ;;  %3970 = vrcp.f32 %v1255_v9 }
 0x336   : > { %v5026_v26 = vmul.f32 %v3927_v21, %v1481_v3  ;;  %v3959_v3 = vpop.eup %3958 }
 0x337   : > { %v3586_v18 = vpop.f32.mrf.mxu0  ;;  %v1264_v32 = vpop.xlane.xlu0 %1263 }
 0x338   : > { %v5028_v55 = vmul.f32 %v3929_v61, %v3586_v18  ;;  %v1261_v61 = vpop.xlane.xlu1 %1260  ;;  %3972 = vrcp.f32 %v1264_v32 }
 0x339   : > { %v1491_v37 = vpop.f32.mrf.mxu0  ;;  %3974 = vrcp.f32 %v1261_v61 }
 0x33a   : > { %v5030_v30 = vmul.f32 %v3931_v1, %v1491_v37  ;;  %v3961_v1 = vpop.eup %3960 }
 0x33b   : > { %v3589_v10 = vpop.f32.mrf.mxu0  ;;  %v3963_v6 = vpop.eup %3962 }
 0x33c   : > { %v5032_v7 = vmul.f32 %v3933_v36, %v3589_v10 }
 0x33d   : > { %v1501_v50 = vpop.f32.mrf.mxu0  ;;  %v3965_v40 = vpop.eup %3964 }
 0x33e   : > { %v5034_v4 = vmul.f32 %v3935_v60, %v1501_v50 }
 0x33f   : > { %v3592_v44 = vpop.f32.mrf.mxu0 }
 0x340   : > { %v5036_v62 = vmul.f32 %v3937_v48, %v3592_v44  ;;  %v3967_v44 = vpop.eup %3966 }
 0x341   : > { %v1511_v31 = vpop.f32.mrf.mxu0 }
 0x342   : > { %v5038_v52 = vmul.f32 %v3939_v11, %v1511_v31  ;;  %v3969_v31 = vpop.eup %3968 }
 0x343   : > { %v3595_v25 = vpop.f32.mrf.mxu0 }
 0x344   : > { %v5040_v8 = vmul.f32 %v3941_v34, %v3595_v25  ;;  %v3971_v25 = vpop.eup %3970 }
 0x345   : > { %v1521_v22 = vpop.f32.mrf.mxu0 }
 0x346   : > { %v5042_v19 = vmul.f32 %v3943_v38, %v1521_v22 }
 0x347   : > { %v3598_v20 = vpop.f32.mrf.mxu0 }
 0x348   : > { %v5044_v45 = vmul.f32 %v3945_v43, %v3598_v20  ;;  %v3973_v43 = vpop.eup %3972  ;;  %v2253_v20 = vpop.xlane.xlu1 %2252 }
 0x349   : > { %v1531_v29 = vpop.f32.mrf.mxu0  ;;  %v3975_v14 = vpop.eup %3974 }
 0x34a   : > { %v5046_v63 = vmul.f32 %v3947_v15, %v1531_v29  ;;  %v2256_v29 = vpop.xlane.xlu0 %2255 }
 0x34b   : > { %v3601_v12 = vpop.f32.mrf.mxu0  ;;  %3976 = vrcp.f32 %v2256_v29 }
 0x34c   : > { %v5048_v27 = vmul.f32 %v3949_v17, %v3601_v12  ;;  %3978 = vrcp.f32 %v2253_v20 }
 0x34d   : > { %v1541_v23 = vpop.f32.mrf.mxu0 }
 0x34e   : > { %v5050_v39 = vmul.f32 %v3951_v0, %v1541_v23  ;;  %v2259_v0 = vpop.xlane.xlu1 %2258  ;;  %v2262_v5 = vpop.xlane.xlu0 %2261 }
 0x34f   : > { %v3604_v49 = vpop.f32.mrf.mxu0  ;;  %3980 = vrcp.f32 %v2262_v5 }
 0x350   : > { %v5052_v24 = vmul.f32 %v3953_v58, %v3604_v49  ;;  %3982 = vrcp.f32 %v2259_v0 }
 0x351   : > { %v1551_v13 = vpop.f32.mrf.mxu0 }
 0x352   : > { %v5054_v28 = vmul.f32 %v3955_v57, %v1551_v13  ;;  %v2265_v23 = vpop.xlane.xlu1 %2264  ;;  %v2268_v58 = vpop.xlane.xlu0 %2267 }
 0x353   : > { %v3607_v21 = vpop.f32.mrf.mxu0  ;;  %3984 = vrcp.f32 %v2265_v23 }
 0x354   : > { %v5056_v33 = vmul.f32 %v3957_v2, %v3607_v21  ;;  %3986 = vrcp.f32 %v2268_v58 }
 0x355   : > { %v1561_v56 = vpop.f32.mrf.mxu0 }
 0x356   : > { %v5058_v18 = vmul.f32 %v3959_v3, %v1561_v56  ;;  %v2271_v9 = vpop.xlane.xlu1 %2270  ;;  %v2274_v49 = vpop.xlane.xlu0 %2273 }
 0x357   : > { %v3610_v37 = vpop.f32.mrf.mxu0  ;;  %3988 = vrcp.f32 %v2271_v9 }
 0x358   : > { %v5060_v36 = vmul.f32 %v3961_v1, %v3610_v37  ;;  %v3977_v2 = vpop.eup %3976  ;;  %3990 = vrcp.f32 %v2274_v49 }
 0x359   : > { %v1571_v10 = vpop.f32.mrf.mxu0  ;;  %v3979_v3 = vpop.eup %3978 }
 0x35a   : > { %v5062_v60 = vmul.f32 %v3963_v6, %v1571_v10  ;;  %v2277_v57 = vpop.xlane.xlu1 %2276  ;;  %v2280_v13 = vpop.xlane.xlu0 %2279 }
 0x35b   : > { %v3613_v50 = vpop.f32.mrf.mxu0  ;;  %3992 = vrcp.f32 %v2277_v57 }
 0x35c   : > { %v5064_v48 = vmul.f32 %v3965_v40, %v3613_v50  ;;  %v3981_v10 = vpop.eup %3980  ;;  %3994 = vrcp.f32 %v2280_v13 }
 0x35d   : > { %v1581_v11 = vpop.f32.mrf.mxu0 }
 0x35e   : > { %v5066_v47 = vmul.f32 %v3967_v44, %v1581_v11  ;;  %v2283_v61 = vpop.xlane.xlu1 %2282  ;;  %v2286_v1 = vpop.xlane.xlu0 %2285 }
 0x35f   : > { %v3616_v34 = vpop.f32.mrf.mxu0  ;;  %3996 = vrcp.f32 %v2283_v61 }
 0x360   : > { %v5068_v35 = vmul.f32 %v3969_v31, %v3616_v34  ;;  %v3983_v31 = vpop.eup %3982  ;;  %3998 = vrcp.f32 %v2286_v1 }
 0x361   : > { %v1591_v38 = vpop.f32.mrf.mxu0 }
 0x362   : > { %v5070_v22 = vmul.f32 %v3971_v25, %v1591_v38  ;;  %v2289_v44 = vpop.xlane.xlu1 %2288  ;;  %v2292_v34 = vpop.xlane.xlu0 %2291 }
 0x363   : > { %v3619_v16 = vpop.f32.mrf.mxu0  ;;  %v3985_v25 = vpop.eup %3984  ;;  %4000 = vrcp.f32 %v2289_v44 }
 0x364   : > { %v5072_v15 = vmul.f32 %v3973_v43, %v3619_v16  ;;  %4002 = vrcp.f32 %v2292_v34 }
 0x365   : > { %v1601_v17 = vpop.f32.mrf.mxu0 }
 0x366   : > { %v5074_v12 = vmul.f32 %v3975_v14, %v1601_v17  ;;  %v3987_v14 = vpop.eup %3986  ;;  %v2295_v17 = vpop.xlane.xlu1 %2294 }
 0x367   : > { %v3989_v29 = vpop.eup %3988  ;;  %v2298_v5 = vpop.xlane.xlu0 %2297  ;;  %4004 = vrcp.f32 %v2295_v17 }
 0x368   : > { %v3991_v49 = vpop.eup %3990  ;;  %4006 = vrcp.f32 %v2298_v5 }
 0x369   : > { %v3993_v57 = vpop.eup %3992 }
 0x36a   : > { %v2301_v13 = vpop.xlane.xlu1 %2300  ;;  %v3995_v61 = vpop.eup %3994 }
 0x36b   : > { %4008 = vrcp.f32 %v2301_v13 }
 0x36c   : > { %v3997_v1 = vpop.eup %3996 }
 0x36d   : > { %v3999_v44 = vpop.eup %3998 }
 0x37e   : > { %v3702_v32 = vpop.f32.mrf.mxu0 }
 0x37f   : > { %v2695_v21 = vmul.f32 %v3977_v2, %v3702_v32 }
 0x380   : > { %v2533_v56 = vpop.f32.mrf.mxu0 }
 0x381   : > { %v2693_v37 = vmul.f32 %v3979_v3, %v2533_v56  ;;  %2790 = vrot.lane.b32.xlu0 %v2695_v21, %s4067_s14  ;;  %v2304_v56 = vpop.xlane.xlu0 %2303 }
 0x382   : > { %v3705_v6 = vpop.f32.mrf.mxu0  ;;  %4010 = vrcp.f32 %v2304_v56 }
 0x383   : > { %2788 = vrot.lane.b32.xlu1 %v2693_v37, %s4067_s14  ;;  %v2699_v50 = vmul.f32 %v3981_v10, %v3705_v6  ;;  %v2307_v37 = vpop.xlane.xlu1 %2306 }
 0x384   : > { %v2543_v40 = vpop.f32.mrf.mxu0  ;;  %4012 = vrcp.f32 %v2307_v37 }
 0x385   : > { %v2697_v43 = vmul.f32 %v3983_v31, %v2543_v40  ;;  %v2310_v31 = vpop.xlane.xlu0 %2309 }
 0x386   : > { %v3708_v11 = vpop.f32.mrf.mxu0  ;;  %4014 = vrcp.f32 %v2310_v31 }
 0x387   : > { %2794 = vrot.lane.b32.xlu1 %v2699_v50, %s4067_s14  ;;  %v2703_v23 = vmul.f32 %v3987_v14, %v3708_v11  ;;  %v4001_v11 = vpop.eup %4000 }
 0x388   : > { %v2553_v38 = vpop.f32.mrf.mxu0 }
 0x389   : > { %v2701_v16 = vmul.f32 %v3985_v25, %v2553_v38  ;;  %v2316_v37 = vpop.xlane.xlu0 %2315 }
 0x38a   : > { %v3711_v20 = vpop.f32.mrf.mxu0  ;;  %4016 = vrcp.f32 %v2316_v37 }
 0x38b   : > { %2796 = vrot.lane.b32.xlu0 %v2701_v16, %s4067_s14  ;;  %2792 = vrot.lane.b32.xlu1 %v2697_v43, %s4067_s14  ;;  %v2707_v32 = vmul.f32 %v3991_v49, %v3711_v20  ;;  %v4003_v16 = vpop.eup %4002 }
 0x38c   : > { %v2563_v0 = vpop.f32.mrf.mxu0  ;;  %v4005_v20 = vpop.eup %4004 }
 0x38d   : > { %v2705_v58 = vmul.f32 %v3989_v29, %v2563_v0  ;;  %v4007_v5 = vpop.eup %4006 }
 0x38e   : > { %v3714_v9 = vpop.f32.mrf.mxu0 }
 0x38f   : > { %2800 = vrot.lane.b32.xlu0 %v2705_v58, %s4067_s14  ;;  %2798 = vrot.lane.b32.xlu1 %v2703_v23, %s4067_s14  ;;  %v2711_v10 = vmul.f32 %v3995_v61, %v3714_v9  ;;  %v4009_v23 = vpop.eup %4008 }
 0x390   : > { %v2573_v2 = vpop.f32.mrf.mxu0  ;;  %v4011_v13 = vpop.eup %4010 }
 0x391   : > { %v2709_v21 = vmul.f32 %v3993_v57, %v2573_v2  ;;  %v4013_v2 = vpop.eup %4012 }
 0x392   : > { %v3717_v3 = vpop.f32.mrf.mxu0 }
 0x393   : > { %2804 = vrot.lane.b32.xlu0 %v2709_v21, %s4067_s14  ;;  %2802 = vrot.lane.b32.xlu1 %v2707_v32, %s4067_s14  ;;  %v2715_v25 = vmul.f32 %v3999_v44, %v3717_v3  ;;  %v4015_v61 = vpop.eup %4014 }
 0x394   : > { %v2583_v6 = vpop.f32.mrf.mxu0 }
 0x395   : > { %v2713_v40 = vmul.f32 %v3997_v1, %v2583_v6  ;;  %v2313_v1 = vpop.xlane.xlu1 %2312 }
 0x396   : > { %v3720_v50 = vpop.f32.mrf.mxu0  ;;  %4018 = vrcp.f32 %v2313_v1 }
 0x397   : > { %2808 = vrot.lane.b32.xlu0 %v2713_v40, %s4067_s14  ;;  %2806 = vrot.lane.b32.xlu1 %v2711_v10, %s4067_s14  ;;  %v2719_v29 = vmul.f32 %v4003_v16, %v3720_v50  ;;  %v2322_v10 = vpop.xlane.xlu0 %2321 }
 0x398   : > { %v2593_v34 = vpop.f32.mrf.mxu0  ;;  %4020 = vrcp.f32 %v2322_v10 }
 0x399   : > { %v2717_v38 = vmul.f32 %v4001_v11, %v2593_v34  ;;  %v2319_v6 = vpop.xlane.xlu1 %2318  ;;  %v4017_v34 = vpop.eup %4016 }
 0x39a   : > { %v3723_v43 = vpop.f32.mrf.mxu0  ;;  %4022 = vrcp.f32 %v2319_v6 }
 0x39b   : > { %2812 = vrot.lane.b32.xlu0 %v2717_v38, %s4067_s14  ;;  %2810 = vrot.lane.b32.xlu1 %v2715_v25, %s4067_s14  ;;  %v2723_v9 = vmul.f32 %v4007_v5, %v3723_v43  ;;  %v2328_v50 = vpop.xlane.xlu0 %2327 }
 0x39c   : > { %v2603_v14 = vpop.f32.mrf.mxu0  ;;  %4024 = vrcp.f32 %v2328_v50 }
 0x39d   : > { %v2721_v17 = vmul.f32 %v4005_v20, %v2603_v14  ;;  %v2325_v40 = vpop.xlane.xlu1 %2324 }
 0x39e   : > { %v3726_v0 = vpop.f32.mrf.mxu0  ;;  %4026 = vrcp.f32 %v2325_v40 }
 0x39f   : > { %2816 = vrot.lane.b32.xlu0 %v2721_v17, %s4067_s14  ;;  %2814 = vrot.lane.b32.xlu1 %v2719_v29, %s4067_s14  ;;  %v2727_v21 = vmul.f32 %v4011_v13, %v3726_v0  ;;  %v2334_v44 = vpop.xlane.xlu0 %2333 }
 0x3a0   : > { %v2613_v58 = vpop.f32.mrf.mxu0  ;;  %4028 = vrcp.f32 %v2334_v44 }
 0x3a1   : > { %v2725_v49 = vmul.f32 %v4009_v23, %v2613_v58  ;;  %v2331_v11 = vpop.xlane.xlu1 %2330 }
 0x3a2   : > { %v3729_v57 = vpop.f32.mrf.mxu0  ;;  %4030 = vrcp.f32 %v2331_v11 }
 0x3a3   : > { %2820 = vrot.lane.b32.xlu0 %v2725_v49, %s4067_s14  ;;  %2818 = vrot.lane.b32.xlu1 %v2723_v9, %s4067_s14  ;;  %v2731_v56 = vmul.f32 %v4015_v61, %v3729_v57  ;;  %v2340_v31 = vpop.xlane.xlu0 %2339  ;;  %v4019_v16 = vpop.eup %4018 }
 0x3a4   : > { %v2623_v32 = vpop.f32.mrf.mxu0  ;;  %4032 = vrcp.f32 %v2340_v31 }
 0x3a5   : > { %v2729_v3 = vmul.f32 %v4013_v2, %v2623_v32  ;;  %v2337_v25 = vpop.xlane.xlu1 %2336  ;;  %v4021_v29 = vpop.eup %4020 }
 0x3a6   : > { %4034 = vrcp.f32 %v2337_v25 }
 0x3a7   : > { %2824 = vrot.lane.b32.xlu0 %v2729_v3, %s4067_s14  ;;  %2822 = vrot.lane.b32.xlu1 %v2727_v21, %s4067_s14  ;;  %v2346_v17 = vpop.xlane.xlu0 %2345  ;;  %v4023_v23 = vpop.eup %4022 }
 0x3a8   : > { %4036 = vrcp.f32 %v2346_v17 }
 0x3a9   : > { %v2343_v58 = vpop.xlane.xlu1 %2342  ;;  %v4025_v57 = vpop.eup %4024 }
 0x3aa   : > { %4038 = vrcp.f32 %v2343_v58 }
 0x3ab   : > { %2826 = vrot.lane.b32.xlu1 %v2731_v56, %s4067_s14  ;;  %v4027_v32 = vpop.eup %4026 }
 0x3ad   : > { %v4029_v61 = vpop.eup %4028 }
 0x3af   : > { %v4031_v37 = vpop.eup %4030 }
 0x3b1   : > { %v4033_v40 = vpop.eup %4032 }
 0x3b3   : > { %v4035_v11 = vpop.eup %4034 }
 0x3b5   : > { %v4037_v25 = vpop.eup %4036 }
 0x3c2   : > { %v3732_v38 = vpop.f32.mrf.mxu0 }
 0x3c3   : > { %v2735_v43 = vmul.f32 %v4017_v34, %v3732_v38 }
 0x3c4   : > { %v2633_v20 = vpop.f32.mrf.mxu0 }
 0x3c5   : > { %v2733_v14 = vmul.f32 %v4019_v16, %v2633_v20  ;;  %2830 = vrot.lane.b32.xlu1 %v2735_v43, %s4067_s14  ;;  %v4039_v16 = vpop.eup %4038 }
 0x3c6   : > { %v3735_v0 = vpop.f32.mrf.mxu0 }
 0x3c7   : > { %v2739_v5 = vmul.f32 %v4021_v29, %v3735_v0  ;;  %2828 = vrot.lane.b32.xlu0 %v2733_v14, %s4067_s14 }
 0x3c8   : > { %v2643_v9 = vpop.f32.mrf.mxu0 }
 0x3c9   : > { %v2737_v49 = vmul.f32 %v4023_v23, %v2643_v9  ;;  %2834 = vrot.lane.b32.xlu1 %v2739_v5, %s4067_s14 }
 0x3ca   : > { %v3738_v13 = vpop.f32.mrf.mxu0 }
 0x3cb   : > { %v2743_v2 = vmul.f32 %v4025_v57, %v3738_v13  ;;  %2832 = vrot.lane.b32.xlu0 %v2737_v49, %s4067_s14 }
 0x3cc   : > { %v2653_v21 = vpop.f32.mrf.mxu0 }
 0x3cd   : > { %v2741_v3 = vmul.f32 %v4027_v32, %v2653_v21  ;;  %2838 = vrot.lane.b32.xlu1 %v2743_v2, %s4067_s14 }
 0x3ce   : > { %v3741_v56 = vpop.f32.mrf.mxu0 }
 0x3cf   : > { %v2747_v1 = vmul.f32 %v4029_v61, %v3741_v56  ;;  %2836 = vrot.lane.b32.xlu0 %v2741_v3, %s4067_s14 }
 0x3d0   : > { %v2663_v6 = vpop.f32.mrf.mxu0 }
 0x3d1   : > { %v2745_v10 = vmul.f32 %v4031_v37, %v2663_v6  ;;  %2842 = vrot.lane.b32.xlu1 %v2747_v1, %s4067_s14 }
 0x3d2   : > { %v3744_v50 = vpop.f32.mrf.mxu0 }
 0x3d3   : > { %v2751_v44 = vmul.f32 %v4033_v40, %v3744_v50  ;;  %2840 = vrot.lane.b32.xlu0 %v2745_v10, %s4067_s14 }
 0x3d4   : > { %v2673_v31 = vpop.f32.mrf.mxu0 }
 0x3d5   : > { %v2749_v34 = vmul.f32 %v4035_v11, %v2673_v31  ;;  %2846 = vrot.lane.b32.xlu1 %v2751_v44, %s4067_s14 }
 0x3d6   : > { %v3747_v38 = vpop.f32.mrf.mxu0 }
 0x3d7   : > { %v2755_v43 = vmul.f32 %v4037_v25, %v3747_v38  ;;  %2844 = vrot.lane.b32.xlu0 %v2749_v34, %s4067_s14 }
 0x3d8   : > { %v2683_v20 = vpop.f32.mrf.mxu0 }
 0x3d9   : > { %v2753_v14 = vmul.f32 %v4039_v16, %v2683_v20  ;;  %2850 = vrot.lane.b32.xlu1 %v2755_v43, %s4067_s14 }
 0x3db   : > { %2848 = vrot.lane.b32.xlu0 %v2753_v14, %s4067_s14 }
 0x3f3   : > { %v2791_v29 = vpop.permute.xlu0 %2790 }
 0x3f4   : > { %v2885_v17 = vsel %vm630_vm1, %v5005_v59, %v2791_v29 }
 0x3f5   : > { %2917 = vst.msk [vmem:[%s5113_s21 + $0x8] sm:$0xff] %vm300_vm0, %v2885_v17  ;;  %v2789_v0 = vpop.permute.xlu1 %2788 }
 0x3f6   : > { %v2884_v5 = vsel %vm630_vm1, %v4993_v42, %v2789_v0 }
 0x3f7   : > { %2916 = vst.msk [vmem:[%s5113_s21] sm:$0xff] %vm300_vm0, %v2884_v5 }
 0x3f9   : > { %v2795_v23 = vpop.permute.xlu1 %2794 }
 0x3fa   : > { %v2887_v58 = vsel %vm630_vm1, %v5010_v54, %v2795_v23 }
 0x3fb   : > { %2919 = vst.msk [vmem:[%s5113_s21 + $0x18] sm:$0xff] %vm300_vm0, %v2887_v58 }
 0x3fd   : > { %v2793_v9 = vpop.permute.xlu1 %2792  ;;  %v2797_v49 = vpop.permute.xlu0 %2796 }
 0x3fe   : > { %v2886_v59 = vsel %vm630_vm1, %v5001_v53, %v2793_v9  ;;  %v2888_v57 = vsel %vm630_vm1, %v5022_v41, %v2797_v49 }
 0x3ff   : > { %2918 = vst.msk [vmem:[%s5113_s21 + $0x10] sm:$0xff] %vm300_vm0, %v2886_v59  ;;  %2920 = vst.msk [vmem:[%s5113_s21 + $0x20] sm:$0xff] %vm300_vm0, %v2888_v57 }
 0x401   : > { %v2799_v42 = vpop.permute.xlu1 %2798  ;;  %v2801_v13 = vpop.permute.xlu0 %2800 }
 0x402   : > { %v2889_v54 = vsel %vm630_vm1, %v5020_v46, %v2799_v42  ;;  %v2890_v2 = vsel %vm630_vm1, %v5026_v26, %v2801_v13 }
 0x403   : > { %2921 = vst.msk [vmem:[%s5113_s21 + $0x28] sm:$0xff] %vm300_vm0, %v2889_v54  ;;  %2922 = vst.msk [vmem:[%s5113_s21 + $0x30] sm:$0xff] %vm300_vm0, %v2890_v2 }
 0x405   : > { %v2803_v53 = vpop.permute.xlu1 %2802  ;;  %v2805_v41 = vpop.permute.xlu0 %2804 }
 0x406   : > { %v2891_v32 = vsel %vm630_vm1, %v5024_v51, %v2803_v53  ;;  %v2892_v21 = vsel %vm630_vm1, %v5030_v30, %v2805_v41 }
 0x407   : > { %2923 = vst.msk [vmem:[%s5113_s21 + $0x38] sm:$0xff] %vm300_vm0, %v2891_v32  ;;  %2924 = vst.msk [vmem:[%s5113_s21 + $0x40] sm:$0xff] %vm300_vm0, %v2892_v21 }
 0x409   : > { %v2807_v46 = vpop.permute.xlu1 %2806  ;;  %v2809_v26 = vpop.permute.xlu0 %2808 }
 0x40a   : > { %v2893_v3 = vsel %vm630_vm1, %v5028_v55, %v2807_v46  ;;  %v2894_v61 = vsel %vm630_vm1, %v5034_v4, %v2809_v26 }
 0x40b   : > { %2925 = vst.msk [vmem:[%s5113_s21 + $0x48] sm:$0xff] %vm300_vm0, %v2893_v3  ;;  %2926 = vst.msk [vmem:[%s5113_s21 + $0x50] sm:$0xff] %vm300_vm0, %v2894_v61 }
 0x40d   : > { %v2811_v51 = vpop.permute.xlu1 %2810  ;;  %v2813_v30 = vpop.permute.xlu0 %2812 }
 0x40e   : > { %v2895_v56 = vsel %vm630_vm1, %v5032_v7, %v2811_v51  ;;  %v2896_v1 = vsel %vm630_vm1, %v5038_v52, %v2813_v30 }
 0x40f   : > { %2927 = vst.msk [vmem:[%s5113_s21 + $0x58] sm:$0xff] %vm300_vm0, %v2895_v56  ;;  %2928 = vst.msk [vmem:[%s5113_s21 + $0x60] sm:$0xff] %vm300_vm0, %v2896_v1 }
 0x411   : > { %v2815_v55 = vpop.permute.xlu1 %2814  ;;  %v2817_v4 = vpop.permute.xlu0 %2816 }
 0x412   : > { %v2897_v37 = vsel %vm630_vm1, %v5036_v62, %v2815_v55  ;;  %v2898_v6 = vsel %vm630_vm1, %v5042_v19, %v2817_v4 }
 0x413   : > { %2929 = vst.msk [vmem:[%s5113_s21 + $0x68] sm:$0xff] %vm300_vm0, %v2897_v37  ;;  %2930 = vst.msk [vmem:[%s5113_s21 + $0x70] sm:$0xff] %vm300_vm0, %v2898_v6 }
 0x415   : > { %v2819_v7 = vpop.permute.xlu1 %2818  ;;  %v2821_v52 = vpop.permute.xlu0 %2820 }
 0x416   : > { %v2899_v10 = vsel %vm630_vm1, %v5040_v8, %v2819_v7  ;;  %v2900_v40 = vsel %vm630_vm1, %v5046_v63, %v2821_v52 }
 0x417   : > { %2931 = vst.msk [vmem:[%s5113_s21 + $0x78] sm:$0xff] %vm300_vm0, %v2899_v10  ;;  %2932 = vst.msk [vmem:[%s5113_s21 + $0x80] sm:$0xff] %vm300_vm0, %v2900_v40 }
 0x419   : > { %v2823_v62 = vpop.permute.xlu1 %2822  ;;  %v2825_v19 = vpop.permute.xlu0 %2824 }
 0x41a   : > { %v2901_v50 = vsel %vm630_vm1, %v5044_v45, %v2823_v62  ;;  %v2902_v44 = vsel %vm630_vm1, %v5050_v39, %v2825_v19 }
 0x41b   : > { %2933 = vst.msk [vmem:[%s5113_s21 + $0x88] sm:$0xff] %vm300_vm0, %v2901_v50  ;;  %2934 = vst.msk [vmem:[%s5113_s21 + $0x90] sm:$0xff] %vm300_vm0, %v2902_v44 }
 0x41d   : > { %v2827_v8 = vpop.permute.xlu1 %2826 }
 0x41e   : > { %v2903_v63 = vsel %vm630_vm1, %v5048_v27, %v2827_v8 }
 0x41f   : > { %2935 = vst.msk [vmem:[%s5113_s21 + $0x98] sm:$0xff] %vm300_vm0, %v2903_v63 }
 0x437   : > { %v2831_v11 = vpop.permute.xlu1 %2830 }
 0x438   : > { %v2905_v31 = vsel %vm630_vm1, %v5052_v24, %v2831_v11 }
 0x439   : > { %2937 = vst.msk [vmem:[%s5113_s21 + $0xa8] sm:$0xff] %vm300_vm0, %v2905_v31  ;;  %v2829_v45 = vpop.permute.xlu0 %2828 }
 0x43a   : > { %v2904_v39 = vsel %vm630_vm1, %v5054_v28, %v2829_v45 }
 0x43b   : > { %2936 = vst.msk [vmem:[%s5113_s21 + $0xa0] sm:$0xff] %vm300_vm0, %v2904_v39  ;;  %v2835_v34 = vpop.permute.xlu1 %2834 }
 0x43c   : > { %v2907_v27 = vsel %vm630_vm1, %v5056_v33, %v2835_v34 }
 0x43d   : > { %2939 = vst.msk [vmem:[%s5113_s21 + $0xb8] sm:$0xff] %vm300_vm0, %v2907_v27  ;;  %v2833_v25 = vpop.permute.xlu0 %2832 }
 0x43e   : > { %v2906_v24 = vsel %vm630_vm1, %v5058_v18, %v2833_v25 }
 0x43f   : > { %2938 = vst.msk [vmem:[%s5113_s21 + $0xb0] sm:$0xff] %vm300_vm0, %v2906_v24  ;;  %v2839_v38 = vpop.permute.xlu1 %2838 }
 0x440   : > { %v2909_v28 = vsel %vm630_vm1, %v5060_v36, %v2839_v38 }
 0x441   : > { %2941 = vst.msk [vmem:[%s5113_s21 + $0xc8] sm:$0xff] %vm300_vm0, %v2909_v28  ;;  %v2837_v43 = vpop.permute.xlu0 %2836 }
 0x442   : > { %v2908_v33 = vsel %vm630_vm1, %v5062_v60, %v2837_v43 }
 0x443   : > { %2940 = vst.msk [vmem:[%s5113_s21 + $0xc0] sm:$0xff] %vm300_vm0, %v2908_v33  ;;  %v2843_v16 = vpop.permute.xlu1 %2842 }
 0x444   : > { %v2911_v18 = vsel %vm630_vm1, %v5064_v48, %v2843_v16 }
 0x445   : > { %2943 = vst.msk [vmem:[%s5113_s21 + $0xd8] sm:$0xff] %vm300_vm0, %v2911_v18  ;;  %v2841_v20 = vpop.permute.xlu0 %2840 }
 0x446   : > { %v2910_v36 = vsel %vm630_vm1, %v5066_v47, %v2841_v20 }
 0x447   : > { %2942 = vst.msk [vmem:[%s5113_s21 + $0xd0] sm:$0xff] %vm300_vm0, %v2910_v36  ;;  %v2847_v14 = vpop.permute.xlu1 %2846 }
 0x448   : > { %v2913_v60 = vsel %vm630_vm1, %v5068_v35, %v2847_v14 }
 0x449   : > { %2945 = vst.msk [vmem:[%s5113_s21 + $0xe8] sm:$0xff] %vm300_vm0, %v2913_v60  ;;  %v2845_v29 = vpop.permute.xlu0 %2844 }
 0x44a   : > { %v2912_v17 = vsel %vm630_vm1, %v5070_v22, %v2845_v29 }
 0x44b   : > { %2944 = vst.msk [vmem:[%s5113_s21 + $0xe0] sm:$0xff] %vm300_vm0, %v2912_v17  ;;  %v2851_v48 = vpop.permute.xlu1 %2850 }
 0x44c   : > { %v2915_v0 = vsel %vm630_vm1, %v5072_v15, %v2851_v48 }
 0x44d   : > { %2947 = vst.msk [vmem:[%s5113_s21 + $0xf8] sm:$0xff] %vm300_vm0, %v2915_v0  ;;  %v2849_v47 = vpop.permute.xlu0 %2848 }
 0x44e   : > { %v2914_v5 = vsel %vm630_vm1, %v5074_v12, %v2849_v47 }
 0x44f   : > { %2946 = vst.msk [vmem:[%s5113_s21 + $0xf0] sm:$0xff] %vm300_vm0, %v2914_v5 }
 0x450 PF: > { %s14_s17 = sadd.s32 1, %s4062_s17   ;;  %s5314_s15 = smov %s4058_s16 }
 0x451   : > { %p11_p5 = scmp.ge.s32.totalorder %s14_s17, 4   ;;  %s5315_s16 = smov %s5317_s18 }
 0x453   :  { %13 = sbr.rel (!%p11_p5) target bundleno = 2 (0x2), region = 69 }

</bundles_post_ra>
